<compile_context>
chip_gen: v7x
topology: tpu7x:2x2x1
jax: 0.10.0
libtpu: 0.0.40
codegen_flags: <defaults>
</compile_context>

<pallas_src>
import numpy as np
import jax
import jax.numpy as jnp
from jax.experimental import pallas as pl
from jax.experimental.pallas import tpu as pltpu

NEG_SLOPE = 0.01      # nn.LeakyReLU() default negative_slope
BCE_EPS = 1e-12       # epsilon in the module's binary_cross_entropy


# ----------------------------------------------------------------------------
# Fused discriminator-forward kernel.
# Ref order: x, labels, w_0 ... w_{L-1}, misc, out.
# misc rows (f32, width = hidden width):
#   row 2*l   : bias of hidden layer l
#   row 2*l+1 : per-output-channel dequant scale of layer l (unused if bf16)
#   row 2*L   : w_out (the Linear(1024, 1) weight as a row vector)
#   row 2*L+1 : [b_out, 0, 0, ...]
# ----------------------------------------------------------------------------
def _make_disc_kernel(num_hidden, smoothing):
    smoothing = float(smoothing)

    def kernel(*refs):
        x_ref, y_ref = refs[0], refs[1]
        w_refs = refs[2:2 + num_hidden]
        misc_ref = refs[2 + num_hidden]
        out_ref = refs[-1]

        # torch.max(x.transpose(1, 2).contiguous(), 2)[0]  ==  max over T.
        # Cast in-kernel (free VPU work under the DMA).
        h = jnp.max(x_ref[...].astype(jnp.float32), axis=1)          # (B, D)

        # TODO(synk): Dropout(0.3) layers are eval-mode identity here
        # (training-mode stochastic dropout not reproduced).
        for li in range(num_hidden):
            w_raw = w_refs[li][...]
            if w_raw.dtype == jnp.int8:
                # int8 weight -> bf16 for the MXU; per-channel scale folded
                # into the epilogue below (scale commutes with column sums).
                w = w_raw.astype(jnp.float32).astype(jnp.bfloat16)
            else:
                w = w_raw.astype(jnp.bfloat16)
            z = jnp.dot(h.astype(jnp.bfloat16), w,
                        preferred_element_type=jnp.float32)          # (B, H)
            if w_raw.dtype == jnp.int8:
                z = z * misc_ref[2 * li + 1:2 * li + 2, :]           # dequant
            z = z + misc_ref[2 * li:2 * li + 1, :]                   # bias
            h = jnp.where(z > 0, z, NEG_SLOPE * z)                   # LeakyReLU

        # Final Linear(1024, 1): row-vector weight * activations, lane reduce.
        wout = misc_ref[2 * num_hidden:2 * num_hidden + 1, :]        # (1, H) f32
        b_out = misc_ref[2 * num_hidden + 1:2 * num_hidden + 2, 0:1] # (1, 1)
        logit = jnp.sum(h * wout, axis=-1, keepdims=True) + b_out    # (B, 1)
        p = jax.nn.sigmoid(logit)

        y = y_ref[...].astype(jnp.float32)                           # (B, 1)
        if smoothing > 0.0:   # static at trace time
            s = 2.0 * smoothing   # matches ENDEMIC binary_cross_entropy exactly
            y = y * (1.0 - s) + 0.5 * s
        bce = (jnp.log(p + BCE_EPS) * y
               + jnp.log(1.0 - p + BCE_EPS) * (1.0 - y))             # (B, 1)
        n = float(bce.shape[0] * bce.shape[1])
        loss = -jnp.sum(bce, axis=0, keepdims=True) / n              # (1, 1)
        # lane-dense output row; caller slices [0, 0].
        out_ref[...] = jnp.broadcast_to(loss, out_ref.shape)

    return kernel


# ----------------------------------------------------------------------------
# One-time parameter packing (do this OUTSIDE the training step): collapses
# 2*L + 2 tiny arrays into a single f32 (2*L+2, H) array -> one prologue DMA.
# ----------------------------------------------------------------------------
def pack_discriminator_params(params):
    hid = params['hidden_b'][0].shape[-1]
    rows = []
    for b, s in zip(params['hidden_b'], params['hidden_scale']):
        rows.append(jnp.reshape(b, (1, hid)).astype(jnp.float32))
        rows.append(jnp.reshape(s, (1, hid)).astype(jnp.float32))
    rows.append(jnp.reshape(params['w_out'], (1, hid)).astype(jnp.float32))
    b_out_row = jnp.zeros((1, hid), jnp.float32).at[0, 0].set(
        jnp.reshape(params['b_out'], ()).astype(jnp.float32))
    rows.append(b_out_row)
    return {'hidden_w': list(params['hidden_w']),
            'misc': jnp.concatenate(rows, axis=0)}


def discriminator_forward(packed, x, sequence_lengths, ids_, smoothing=0.0):
    # sequence_lengths is unused by the original forward (max is over all T).
    del sequence_lengths
    B = x.shape[0]
    hidden_w = packed['hidden_w']
    misc = packed['misc']
    num_hidden = len(hidden_w)
    hid = misc.shape[-1]

    labels = jnp.reshape(ids_, (B, 1))        # native dtype; cast in-kernel

    kernel = _make_disc_kernel(num_hidden, smoothing)
    inputs = [x, labels] + hidden_w + [misc]

    # Advisory cost estimate so XLA overlaps this tiny call with neighbors.
    flops = 2 * B * hid                       # final row-vector dot
    for w in hidden_w:
        flops += 2 * B * int(w.shape[0]) * int(w.shape[1])
    bytes_accessed = sum(int(np.prod(a.shape)) * jnp.dtype(a.dtype).itemsize
                         for a in inputs) + 128 * 4
    ce = pl.CostEstimate(flops=int(flops), transcendentals=int(3 * B),
                         bytes_accessed=int(bytes_accessed))

    out = pl.pallas_call(
        kernel,
        out_shape=jax.ShapeDtypeStruct((1, 128), jnp.float32),
        in_specs=[pl.BlockSpec(memory_space=pltpu.MemorySpace.VMEM)
                  for _ in inputs],
        out_specs=pl.BlockSpec(memory_space=pltpu.MemorySpace.VMEM),
        cost_estimate=ce,
    )(*inputs)
    return out[0, 0]


# ----------------------------------------------------------------------------
# Weight-storage policy: int8 + per-channel scale for the dominant 1024x1024
# weight only where it pays off (v5e/v6e are DMA-bound and int8-friendly);
# keep bf16 on v7x (fp8-only MXU, 3.2 TB/s HBM) and anything unrecognized.
# ----------------------------------------------------------------------------
def _use_int8_hidden_weights():
    try:
        kind = jax.devices()[0].device_kind.lower()
    except Exception:
        return False
    if 'v7' in kind:
        return False
    return ('v5' in kind) or ('v6' in kind)


def quantize_per_channel_int8(w):
    w = jnp.asarray(w, jnp.float32)
    amax = jnp.max(jnp.abs(w), axis=0, keepdims=True)        # (1, out)
    scale = jnp.maximum(amax / 127.0, 1e-8)
    q = jnp.clip(jnp.round(w / scale), -127.0, 127.0).astype(jnp.int8)
    return q, scale


# ----------------------------------------------------------------------------
# Pure-JAX reference (same math / same weight storage) for a sanity check.
# ----------------------------------------------------------------------------
def reference_forward(params, x, sequence_lengths, ids_, smoothing=0.0):
    del sequence_lengths
    h = jnp.max(x.astype(jnp.float32), axis=1)
    for w, s, b in zip(params['hidden_w'], params['hidden_scale'],
                       params['hidden_b']):
        if w.dtype == jnp.int8:
            wf = w.astype(jnp.float32).astype(jnp.bfloat16)
        else:
            wf = w.astype(jnp.bfloat16)
        z = jnp.dot(h.astype(jnp.bfloat16), wf,
                    preferred_element_type=jnp.float32)
        if w.dtype == jnp.int8:
            z = z * s
        z = z + b
        h = jnp.where(z > 0, z, NEG_SLOPE * z)
    wout = params['w_out'].astype(jnp.float32)
    logit = jnp.sum(h * wout, axis=-1, keepdims=True) + params['b_out']
    p = jax.nn.sigmoid(logit)
    y = ids_.astype(jnp.float32).reshape(-1, 1)
    if smoothing > 0.0:
        sm = 2.0 * smoothing
        y = y * (1.0 - sm) + 0.5 * sm
    bce = jnp.log(p + BCE_EPS) * y + jnp.log(1.0 - p + BCE_EPS) * (1.0 - y)
    return -jnp.mean(bce)


# ----------------------------------------------------------------------------
if __name__ == "__main__":
    # Shapes consistent with the module:
    #   config.d_hidden=64, use_addn with addn_dim=64, brnn=True
    #   -> seq_in_size = (64 + 64) * 2 = 256; hidden width 1024 is hardcoded.
    #   num_discriminator_layers = 2 -> two Linear(.,1024)+LeakyReLU layers.
    B, T, D = 4, 8, 256
    HID = 1024
    SMOOTHING = 0.1

    key = jax.random.PRNGKey(0)
    ks = jax.random.split(key, 8)
    sc = 0.05

    w1 = sc * jax.random.normal(ks[0], (D, HID), jnp.float32)
    w2 = sc * jax.random.normal(ks[1], (HID, HID), jnp.float32)
    b1 = sc * jax.random.normal(ks[2], (1, HID), jnp.float32)
    b2 = sc * jax.random.normal(ks[3], (1, HID), jnp.float32)
    w_out = sc * jax.random.normal(ks[4], (1, HID), jnp.float32)
    b_out = sc * jax.random.normal(ks[5], (1, 1), jnp.float32)

    ones = jnp.ones((1, HID), jnp.float32)
    hidden_w, hidden_scale = [], []
    # Layer 1: small (D, HID) -> keep bf16 everywhere.
    hidden_w.append(w1.astype(jnp.bfloat16))
    hidden_scale.append(ones)
    # Layer 2: dominant 1024x1024 -> int8 + scale on v5e/v6e, bf16 elsewhere.
    if _use_int8_hidden_weights():
        q2, s2 = quantize_per_channel_int8(w2)
        hidden_w.append(q2)
        hidden_scale.append(s2)
    else:
        hidden_w.append(w2.astype(jnp.bfloat16))
        hidden_scale.append(ones)

    params = {
        'hidden_w': hidden_w,
        'hidden_scale': hidden_scale,
        'hidden_b': [b1, b2],
        'w_out': w_out.astype(jnp.bfloat16),
        'b_out': b_out,
    }
    packed = pack_discriminator_params(params)     # done once, outside the step

    x = jax.random.normal(ks[6], (B, T, D), jnp.float32)
    sequence_lengths = jnp.array([8, 5, 8, 3], dtype=jnp.int32)   # unused
    ids_ = jnp.array([[1.0], [0.0], [1.0], [0.0]], dtype=jnp.float32)

    loss = discriminator_forward(packed, x, sequence_lengths, ids_,
                                 smoothing=SMOOTHING)
    loss = jax.block_until_ready(loss)

    ref = jax.block_until_ready(
        reference_forward(params, x, sequence_lengths, ids_,
                          smoothing=SMOOTHING))

    assert np.isfinite(float(loss))
    np.testing.assert_allclose(float(loss), float(ref), rtol=1e-3, atol=1e-3)
    print("KERNEL_OK")
</pallas_src>

<mosaic_0001>
module attributes {stable_mosaic.version = 11 : i64} {
  func.func @kernel(%arg0: memref<4x8x256xf32, #tpu.memory_space<vmem>>, %arg1: memref<4x1xf32, #tpu.memory_space<vmem>>, %arg2: memref<256x1024xbf16, #tpu.memory_space<vmem>>, %arg3: memref<1024x1024xbf16, #tpu.memory_space<vmem>>, %arg4: memref<6x1024xf32, #tpu.memory_space<vmem>>, %arg5: memref<1x128xf32, #tpu.memory_space<vmem>>) attributes {dimension_semantics = [], scalar_prefetch = 0 : i64, scratch_operands = 0 : i64, tpu.core_type = #tpu.core_type<tc>} {
    %c0 = arith.constant 0 : index
    %c0_0 = arith.constant 0 : index
    %c0_1 = arith.constant 0 : index
    %0 = vector.load %arg0[%c0, %c0_0, %c0_1] : memref<4x8x256xf32, #tpu.memory_space<vmem>>, vector<4x8x256xf32>
    %cst = arith.constant dense<0xFF800000> : vector<4x256xf32>
    %1 = vector.multi_reduction <maximumf>, %0, %cst [1] : vector<4x8x256xf32> to vector<4x256xf32>
    %c0_2 = arith.constant 0 : index
    %c0_3 = arith.constant 0 : index
    %2 = vector.load %arg2[%c0_2, %c0_3] : memref<256x1024xbf16, #tpu.memory_space<vmem>>, vector<256x1024xbf16>
    %3 = arith.truncf %1 : vector<4x256xf32> to vector<4x256xbf16>
    %cst_4 = arith.constant dense<0.000000e+00> : vector<4x1024xf32>
    %4 = tpu.matmul %3, %2, %cst_4 {dimension_numbers = #tpu.dot_dimension_numbers<[1], [0], [0], [1], [0, 0, 1, 1], [], []>} : vector<4x256xbf16>, vector<256x1024xbf16>, vector<4x1024xf32> -> vector<4x1024xf32>
    %c0_5 = arith.constant 0 : index
    %c0_6 = arith.constant 0 : index
    %5 = vector.load %arg4[%c0_5, %c0_6] : memref<6x1024xf32, #tpu.memory_space<vmem>>, vector<1x1024xf32>
    %6 = vector.broadcast %5 : vector<1x1024xf32> to vector<4x1024xf32>
    %7 = arith.addf %4, %6 : vector<4x1024xf32>
    %cst_7 = arith.constant 0.000000e+00 : f32
    %8 = vector.broadcast %cst_7 : f32 to vector<4x1024xf32>
    %9 = arith.cmpf ogt, %7, %8 : vector<4x1024xf32>
    %cst_8 = arith.constant 0.00999999977 : f32
    %10 = vector.broadcast %cst_8 : f32 to vector<4x1024xf32>
    %11 = arith.mulf %10, %7 : vector<4x1024xf32>
    %12 = arith.select %9, %7, %11 : vector<4x1024xi1>, vector<4x1024xf32>
    %c0_9 = arith.constant 0 : index
    %c0_10 = arith.constant 0 : index
    %13 = vector.load %arg3[%c0_9, %c0_10] : memref<1024x1024xbf16, #tpu.memory_space<vmem>>, vector<1024x1024xbf16>
    %14 = arith.truncf %12 : vector<4x1024xf32> to vector<4x1024xbf16>
    %cst_11 = arith.constant dense<0.000000e+00> : vector<4x1024xf32>
    %15 = tpu.matmul %14, %13, %cst_11 {dimension_numbers = #tpu.dot_dimension_numbers<[1], [0], [0], [1], [0, 0, 1, 1], [], []>} : vector<4x1024xbf16>, vector<1024x1024xbf16>, vector<4x1024xf32> -> vector<4x1024xf32>
    %c2 = arith.constant 2 : index
    %c0_12 = arith.constant 0 : index
    %16 = vector.load %arg4[%c2, %c0_12] : memref<6x1024xf32, #tpu.memory_space<vmem>>, vector<1x1024xf32>
    %17 = vector.broadcast %16 : vector<1x1024xf32> to vector<4x1024xf32>
    %18 = arith.addf %15, %17 : vector<4x1024xf32>
    %cst_13 = arith.constant 0.000000e+00 : f32
    %19 = vector.broadcast %cst_13 : f32 to vector<4x1024xf32>
    %20 = arith.cmpf ogt, %18, %19 : vector<4x1024xf32>
    %cst_14 = arith.constant 0.00999999977 : f32
    %21 = vector.broadcast %cst_14 : f32 to vector<4x1024xf32>
    %22 = arith.mulf %21, %18 : vector<4x1024xf32>
    %23 = arith.select %20, %18, %22 : vector<4x1024xi1>, vector<4x1024xf32>
    %c4 = arith.constant 4 : index
    %c0_15 = arith.constant 0 : index
    %24 = vector.load %arg4[%c4, %c0_15] : memref<6x1024xf32, #tpu.memory_space<vmem>>, vector<1x1024xf32>
    %c5 = arith.constant 5 : index
    %c0_16 = arith.constant 0 : index
    %25 = vector.load %arg4[%c5, %c0_16] : memref<6x1024xf32, #tpu.memory_space<vmem>>, vector<1x1xf32>
    %26 = vector.broadcast %24 : vector<1x1024xf32> to vector<4x1024xf32>
    %27 = arith.mulf %23, %26 : vector<4x1024xf32>
    %cst_17 = arith.constant dense<0.000000e+00> : vector<4xf32>
    %28 = vector.multi_reduction <add>, %27, %cst_17 [1] : vector<4x1024xf32> to vector<4xf32>
    %29 = vector.shape_cast %28 : vector<4xf32> to vector<4x1xf32>
    %30 = vector.broadcast %25 : vector<1x1xf32> to vector<4x1xf32>
    %31 = arith.addf %29, %30 : vector<4x1xf32>
    %32 = arith.negf %31 : vector<4x1xf32>
    %33 = math.exp %32 : vector<4x1xf32>
    %cst_18 = arith.constant 1.000000e+00 : f32
    %34 = vector.broadcast %cst_18 : f32 to vector<4x1xf32>
    %35 = arith.addf %34, %33 : vector<4x1xf32>
    %36 = arith.divf %34, %35 : vector<4x1xf32>
    %c0_19 = arith.constant 0 : index
    %c0_20 = arith.constant 0 : index
    %37 = vector.load %arg1[%c0_19, %c0_20] : memref<4x1xf32, #tpu.memory_space<vmem>>, vector<4x1xf32>
    %cst_21 = arith.constant 8.000000e-01 : f32
    %38 = vector.broadcast %cst_21 : f32 to vector<4x1xf32>
    %39 = arith.mulf %37, %38 : vector<4x1xf32>
    %cst_22 = arith.constant 1.000000e-01 : f32
    %40 = vector.broadcast %cst_22 : f32 to vector<4x1xf32>
    %41 = arith.addf %39, %40 : vector<4x1xf32>
    %cst_23 = arith.constant 9.99999996E-13 : f32
    %42 = vector.broadcast %cst_23 : f32 to vector<4x1xf32>
    %43 = arith.addf %36, %42 : vector<4x1xf32>
    %44 = math.log %43 : vector<4x1xf32>
    %45 = arith.mulf %44, %41 : vector<4x1xf32>
    %cst_24 = arith.constant 1.000000e+00 : f32
    %46 = vector.broadcast %cst_24 : f32 to vector<4x1xf32>
    %47 = arith.subf %46, %36 : vector<4x1xf32>
    %cst_25 = arith.constant 9.99999996E-13 : f32
    %48 = vector.broadcast %cst_25 : f32 to vector<4x1xf32>
    %49 = arith.addf %47, %48 : vector<4x1xf32>
    %50 = math.log %49 : vector<4x1xf32>
    %cst_26 = arith.constant 1.000000e+00 : f32
    %51 = vector.broadcast %cst_26 : f32 to vector<4x1xf32>
    %52 = arith.subf %51, %41 : vector<4x1xf32>
    %53 = arith.mulf %50, %52 : vector<4x1xf32>
    %54 = arith.addf %45, %53 : vector<4x1xf32>
    %cst_27 = arith.constant dense<0.000000e+00> : vector<1xf32>
    %55 = vector.multi_reduction <add>, %54, %cst_27 [0] : vector<4x1xf32> to vector<1xf32>
    %56 = vector.shape_cast %55 : vector<1xf32> to vector<1x1xf32>
    %cst_28 = arith.constant 0.000000e+00 : f32
    %57 = vector.broadcast %cst_28 : f32 to vector<1x1xf32>
    %58 = arith.subf %57, %56 : vector<1x1xf32>
    %cst_29 = arith.constant 4.000000e+00 : f32
    %59 = vector.broadcast %cst_29 : f32 to vector<1x1xf32>
    %60 = arith.divf %58, %59 : vector<1x1xf32>
    %61 = vector.shape_cast %60 : vector<1x1xf32> to vector<1x1xf32>
    %62 = vector.broadcast %61 : vector<1x1xf32> to vector<1x128xf32>
    %c0_30 = arith.constant 0 : index
    %c0_31 = arith.constant 0 : index
    %63 = vector.load %arg5[%c0_30, %c0_31] : memref<1x128xf32, #tpu.memory_space<vmem>>, vector<1x128xf32>
    tpu.vector_store %arg5[%c0_30, %c0_31], %62 {strides = array<i32>} : memref<1x128xf32, #tpu.memory_space<vmem>>, vector<1x128xf32>,
    return
  }
}

</mosaic_0001>

<bundles_post_ra>
// kernel: tpu_custom_call.1
= control target key start
LH: loop header
LB: loop body
LE: loop exit
PB: predicated region body
PF: predicated region fallthrough
CT: control target
= control target key end

     0   :  { %10 = vsyncpa [#allocation3], 0  ;;  %s6261_s0 = inlined_call_operand.hbm [shape: f32[4,8,256], index: 0, kind: input, shape index: {}]   ;;  %s6262_s1 = inlined_call_operand.vmem [shape: f32[4,1], index: 1, kind: input, shape index: {}]   ;;  %s6263_s2 = inlined_call_operand.hbm [shape: bf16[256,1024], index: 2, kind: input, shape index: {}]   ;;  %s6264_s3 = inlined_call_operand.hbm [shape: bf16[1024,1024], index: 3, kind: input, shape index: {}]   ;;  %s6265_s4 = inlined_call_operand.hbm [shape: f32[6,1024], index: 4, kind: input, shape index: {}]   ;;  %s6266_s5 = inlined_call_operand.hbm [shape: f32[1,128], index: 5, kind: output, shape index: {}]  }
   0x1   :  { %11 = vsyncpa [#allocation6], 0 }
   0x2   :  { %12 = vsyncpa [#allocation9], 0 }
   0x3   :  { %13 = vsyncpa [#allocation4], 0  ;;  %s5933_s18 = smov [#allocation5]   ;;  %s5815_s22 = scalar_lea.hbm %s6263_s2, 16384 }
   0x4   :  { %s33_s19 = sshll.u32 %s5933_s18, 4  ;;  %p5816_p0 = scmp.ne.s32.totalorder %s6263_s2, %s5815_s22  ;;  %s34_s19 = int_to_ptr.vmem [resolvable:$true] %s33_s19 }
   0x5   :  { %p5819_p1 = scmp.lt.u32.totalorder %s5815_s22, %s6263_s2 }
   0x7   :  { %p5821_p2 = pnand %p5819_p1, %p5816_p0 }
   0x9   :  { %5824 = shalt.err (!%p5821_p2)
}
   0xa   :  { %s5825_s27 = scalar_lea.vmem %s34_s19, 16384  ;;  %p5830_p4 = scmp.lt.s32.totalorder %s34_s19, %s34_s19 }
   0xb   :  { %p5826_p3 = scmp.ne.s32.totalorder %s34_s19, %s5825_s27  ;;  %p5831_p5 = scmp.lt.s32.totalorder %s5825_s27, %s5825_s27 }
   0xd   :  { %p5832_p6 = por %p5831_p5, %p5830_p4 }
   0xf   :  { %p5833_p7 = pnand %p5832_p6, %p5826_p3 }
  0x11   :  { %5836 = shalt.err (!%p5833_p7)
}
  0x12   :  { %s5934_s28 = smov 512   ;;  %s5935_s29 = smov 32  }
  0x13   :  { %39 = dma.hbm_to_vmem [thread:$0]  %s6263_s2, 16384, %s34_s19, [#allocation6], %s5934_s28, %s5934_s28, %s5935_s29  }
  0x14   :  { %s5936_s7 = smov [#allocation2]   ;;  %s5837_s11 = scalar_lea.hbm %s6261_s0, 1024 }
  0x15   :  { %s19_s8 = sshll.u32 %s5936_s7, 4  ;;  %p5838_p8 = scmp.ne.s32.totalorder %s6261_s0, %s5837_s11  ;;  %s20_s8 = int_to_ptr.vmem [resolvable:$true] %s19_s8 }
  0x16   :  { %p5841_p9 = scmp.lt.u32.totalorder %s5837_s11, %s6261_s0 }
  0x18   :  { %p5843_p10 = pnand %p5841_p9, %p5838_p8 }
  0x1a   :  { %5846 = shalt.err (!%p5843_p10)
}
  0x1b   :  { %s5847_s16 = scalar_lea.vmem %s20_s8, 1024  ;;  %p5852_p12 = scmp.lt.s32.totalorder %s20_s8, %s20_s8 }
  0x1c   :  { %p5848_p11 = scmp.ne.s32.totalorder %s20_s8, %s5847_s16  ;;  %p5853_p13 = scmp.lt.s32.totalorder %s5847_s16, %s5847_s16 }
  0x1e   :  { %p5854_p0 = por %p5853_p13, %p5852_p12 }
  0x20   :  { %p5855_p1 = pnand %p5854_p0, %p5848_p11 }
  0x22   :  { %5858 = shalt.err (!%p5855_p1)
}
  0x23   :  { %s5937_s2 = smov 256   ;;  %s5938_s17 = smov 16  }
  0x24   :  { %25 = dma.hbm_to_vmem [thread:$0]  %s6261_s0, 1024, %s20_s8, [#allocation3], %s5937_s2, %s5937_s2, %s5938_s17  }
  0x25   :  { %s5939_s20 = smov [#allocation7]   ;;  %s5940_s22 = smov [#allocation8]  }
  0x26   :  { %s45_s21 = sshll.u32 %s5939_s20, 4  ;;  %s58_s23 = sshll.u32 %s5940_s22, 4  ;;  %s46_s21 = int_to_ptr.vmem [resolvable:$true] %s45_s21  ;;  %s59_s23 = int_to_ptr.vmem [resolvable:$true] %s58_s23 }
  0x27   :  { %s5859_s26 = scalar_lea.hbm %s6264_s3, 65536 }
  0x28   :  { %p5860_p2 = scmp.ne.s32.totalorder %s6264_s3, %s5859_s26  ;;  %p5863_p3 = scmp.lt.u32.totalorder %s5859_s26, %s6264_s3 }
  0x2a   :  { %p5865_p4 = pnand %p5863_p3, %p5860_p2 }
  0x2c   :  { %5868 = shalt.err (!%p5865_p4)
}
  0x2d   :  { %s5869_s0 = scalar_lea.vmem %s46_s21, 65536  ;;  %p5874_p6 = scmp.lt.s32.totalorder %s46_s21, %s46_s21 }
  0x2e   :  { %p5870_p5 = scmp.ne.s32.totalorder %s46_s21, %s5869_s0  ;;  %p5875_p7 = scmp.lt.s32.totalorder %s5869_s0, %s5869_s0 }
  0x30   :  { %p5876_p8 = por %p5875_p7, %p5874_p6 }
  0x32   :  { %p5877_p9 = pnand %p5876_p8, %p5870_p5 }
  0x34   :  { %5880 = shalt.err (!%p5877_p9)
}
  0x35   :  { %51 = dma.hbm_to_vmem [thread:$0]  %s6264_s3, 65536, %s46_s21, [#allocation6], %s5934_s28, %s5934_s28, %s5935_s29  }
  0x36   :  { %s5881_s12 = scalar_lea.hbm %s6265_s4, 1024 }
  0x37   :  { %p5882_p10 = scmp.ne.s32.totalorder %s6265_s4, %s5881_s12  ;;  %p5885_p11 = scmp.lt.u32.totalorder %s5881_s12, %s6265_s4 }
  0x39   :  { %p5887_p12 = pnand %p5885_p11, %p5882_p10 }
  0x3b   :  { %5890 = shalt.err (!%p5887_p12)
}
  0x3c   :  { %s5891_s2 = scalar_lea.vmem %s59_s23, 1024  ;;  %p5896_p0 = scmp.lt.s32.totalorder %s59_s23, %s59_s23 }
  0x3d   :  { %p5892_p13 = scmp.ne.s32.totalorder %s59_s23, %s5891_s2  ;;  %p5897_p1 = scmp.lt.s32.totalorder %s5891_s2, %s5891_s2 }
  0x3f   :  { %p5898_p2 = por %p5897_p1, %p5896_p0 }
  0x41   :  { %p5899_p3 = pnand %p5898_p2, %p5892_p13 }
  0x43   :  { %5902 = shalt.err (!%p5899_p3)
}
  0x44   :  { %61 = dma.hbm_to_vmem [thread:$0]  %s6265_s4, 1024, %s59_s23, [#allocation9]  }
  0x45   :  { %5925 = dma.done.wait [#allocation3], 1024  }
  0x46   :  { %5926 = vsyncadd [#allocation3], 4294966272 }
  0x47   :  { %5927 = dma.done.wait [#allocation6], 81920  }
  0x48   :  { %5928 = vsyncadd [#allocation6], 4294885376 }
  0x49   :  { %5929 = dma.done.wait [#allocation9], 1024  }
  0x4a   :  { %5930 = vsyncadd [#allocation9], 4294966272  ;;  %v130_v0 = vld [vmem:[#allocation5] sm:$0xff]  ;;  %v131_v17 = vld [vmem:[#allocation5 + $0x8] sm:$0xff]  ;;  %vm326_vm0 = vcmask 1041409   ;;  %vm328_vm1 = vcmask 1042434  }
  0x4b   :  { %v134_v1 = vld [vmem:[#allocation5 + $0x20] sm:$0xff]  ;;  %v135_v19 = vld [vmem:[#allocation5 + $0x28] sm:$0xff]  ;;  %v77_v21 = vld [vmem:[#allocation2 + $0x18] sm:$0xff]  ;;  %vm330_vm2 = vcmask 1043459   ;;  %vm5026_vm11 = vcmask 1043456  }
  0x4c   :  { %v138_v2 = vld [vmem:[#allocation5 + $0x40] sm:$0xff]  ;;  %v5100_v3 = vcombine.high %v130_v0, %v134_v1  ;;  %v5099_v4 = vcombine.low %v130_v0, %v134_v1  ;;  %v75_v20 = vld [vmem:[#allocation2 + $0x8] sm:$0xff]  ;;  %v5102_v22 = vcombine.high %v131_v17, %v135_v19  ;;  %v5101_v23 = vcombine.low %v131_v17, %v135_v19  ;;  %v81_v25 = vld [vmem:[#allocation2 + $0x38] sm:$0xff] }
  0x4d   :  { %v142_v5 = vld [vmem:[#allocation5 + $0x60] sm:$0xff]  ;;  %v79_v24 = vld [vmem:[#allocation2 + $0x28] sm:$0xff]  ;;  %v88_v26 = vrot.slane %v75_v20, 4  ;;  %v100_v27 = vrot.slane %v77_v21, 4  ;;  %v124_v30 = vrot.slane %v81_v25, 4  ;;  %v76_v50 = vld [vmem:[#allocation2 + $0x10] sm:$0xff] }
  0x4e   :  { %v5108_v6 = vcombine.high %v138_v2, %v142_v5  ;;  %v146_v7 = vld [vmem:[#allocation5 + $0x80] sm:$0xff]  ;;  %979 = vmatprep.subr.bf16.mxu0 %v5100_v3  ;;  %v5107_v9 = vcombine.low %v138_v2, %v142_v5  ;;  %v112_v29 = vrot.slane %v79_v24, 4  ;;  %1020 = vmatprep.subr.bf16.mxu1 %v5102_v22  ;;  %v94_v63 = vrot.slane %v76_v50, 4  ;;  %v151_v19 = vld [vmem:[#allocation5 + $0xa8] sm:$0xff] }
  0x4f   :  { %v150_v8 = vld [vmem:[#allocation5 + $0xa0] sm:$0xff]  ;;  %980 = vmatpush1.bf16.msra.mxu0 %v5099_v4  ;;  %v89_v33 = vmax.f32 %v75_v20, %v88_v26  ;;  %v101_v34 = vmax.f32 %v77_v21, %v100_v27  ;;  %1021 = vmatpush1.bf16.msra.mxu1 %v5101_v23  ;;  %v125_v36 = vmax.f32 %v81_v25, %v124_v30 }
  0x50   :  { %981 = vmatprep.subr.bf16.mxu0 %v5108_v6  ;;  %v5116_v10 = vcombine.high %v146_v7, %v150_v8  ;;  %v154_v11 = vld [vmem:[#allocation5 + $0xc0] sm:$0xff]  ;;  %v5115_v13 = vcombine.low %v146_v7, %v150_v8  ;;  %v113_v35 = vmax.f32 %v79_v24, %v112_v29  ;;  %v95_v17 = vmax.f32 %v76_v50, %v94_v63 }
  0x51   :  { %v158_v12 = vld [vmem:[#allocation5 + $0xe0] sm:$0xff]  ;;  %v90_v38 = vrot.slane %v89_v33, 2  ;;  %v102_v39 = vrot.slane %v101_v34, 2  ;;  %v126_v42 = vrot.slane %v125_v36, 2 }
  0x52   :  { %v5124_v14 = vcombine.high %v154_v11, %v158_v12  ;;  %v162_v15 = vld [vmem:[#allocation5 + $0x100] sm:$0xff]  ;;  %v5123_v18 = vcombine.low %v154_v11, %v158_v12  ;;  %v114_v41 = vrot.slane %v113_v35, 2  ;;  %v139_v12 = vld [vmem:[#allocation5 + $0x48] sm:$0xff] }
  0x53   :  { %982 = vmatpush1.bf16.msra.mxu0 %v5107_v9  ;;  %v166_v16 = vld [vmem:[#allocation5 + $0x120] sm:$0xff]  ;;  %v91_v45 = vmax.f32 %v89_v33, %v90_v38  ;;  %v103_v46 = vmax.f32 %v101_v34, %v102_v39  ;;  %v127_v48 = vmax.f32 %v125_v36, %v126_v42 }
  0x54   :  { %983 = vmatprep.subr.bf16.mxu0 %v5116_v10  ;;  %v5132_v28 = vcombine.high %v162_v15, %v166_v16  ;;  %v170_v31 = vld [vmem:[#allocation5 + $0x140] sm:$0xff]  ;;  %v5131_v37 = vcombine.low %v162_v15, %v166_v16  ;;  %v115_v47 = vmax.f32 %v113_v35, %v114_v41  ;;  %v80_v10 = vld [vmem:[#allocation2 + $0x30] sm:$0xff] }
  0x55   :  { %v174_v32 = vld [vmem:[#allocation5 + $0x160] sm:$0xff]  ;;  %v92_v52 = vrot.slane %v91_v45, 1  ;;  %v104_v53 = vrot.slane %v103_v46, 1  ;;  %v128_v56 = vrot.slane %v127_v48, 1  ;;  %v118_v25 = vrot.slane %v80_v10, 4 }
  0x56   :  { %v5140_v40 = vcombine.high %v170_v31, %v174_v32  ;;  %v178_v43 = vld [vmem:[#allocation5 + $0x180] sm:$0xff]  ;;  %v5139_v51 = vcombine.low %v170_v31, %v174_v32  ;;  %v116_v55 = vrot.slane %v115_v47, 1  ;;  %v155_v31 = vld [vmem:[#allocation5 + $0xc8] sm:$0xff] }
  0x57   :  { %984 = vmatpush1.bf16.msra.mxu0 %v5115_v13  ;;  %v182_v44 = vld [vmem:[#allocation5 + $0x1a0] sm:$0xff]  ;;  %v93_v59 = vmax.f32 %v91_v45, %v92_v52  ;;  %v105_v60 = vmax.f32 %v103_v46, %v104_v53  ;;  %v129_v1 = vmax.f32 %v127_v48, %v128_v56  ;;  %v143_v13 = vld [vmem:[#allocation5 + $0x68] sm:$0xff]  ;;  %v119_v41 = vmax.f32 %v80_v10, %v118_v25 }
  0x58   :  { %985 = vmatprep.subr.bf16.mxu0 %v5124_v14  ;;  %v74_v49 = vld [vmem:[#allocation2] sm:$0xff]  ;;  %v5148_v54 = vcombine.high %v178_v43, %v182_v44  ;;  %v117_v0 = vmax.f32 %v115_v47, %v116_v55  ;;  %v5147_v2 = vcombine.low %v178_v43, %v182_v44  ;;  %v5110_v26 = vcombine.high %v139_v12, %v143_v13  ;;  %v159_v32 = vld [vmem:[#allocation5 + $0xe8] sm:$0xff] }
  0x59   :  { %v186_v57 = vld [vmem:[#allocation5 + $0x1c0] sm:$0xff]  ;;  %v82_v62 = vrot.slane %v74_v49, 4  ;;  %v259_v5 = vpack.c.bf16 %v93_v59, %v93_v59  ;;  %v261_v6 = vpack.c.bf16 %v105_v60, %v105_v60  ;;  %v265_v9 = vpack.c.bf16 %v129_v1, %v129_v1  ;;  %v163_v45 = vld [vmem:[#allocation5 + $0x108] sm:$0xff] }
  0x5a   :  { %v190_v58 = vld [vmem:[#allocation5 + $0x1e0] sm:$0xff]  ;;  %v263_v8 = vpack.c.bf16 %v117_v0, %v117_v0  ;;  %v5109_v29 = vcombine.low %v139_v12, %v143_v13  ;;  %1022 = vmatprep.subr.bf16.mxu1 %v5110_v26  ;;  %v5126_v42 = vcombine.high %v155_v31, %v159_v32  ;;  %v167_v46 = vld [vmem:[#allocation5 + $0x128] sm:$0xff]  ;;  %v120_v53 = vrot.slane %v119_v41, 2 }
  0x5b   :  { %986 = vmatpush1.bf16.msra.mxu0 %v5123_v18  ;;  %v78_v61 = vld [vmem:[#allocation2 + $0x20] sm:$0xff]  ;;  %v5156_v7 = vcombine.high %v186_v57, %v190_v58  ;;  %v319_v14 = vunpack.c.l.b16 %v259_v5  ;;  %v321_v15 = vunpack.c.l.b16 %v261_v6  ;;  %v83_v16 = vmax.f32 %v74_v49, %v82_v62  ;;  %v147_v18 = vld [vmem:[#allocation5 + $0x88] sm:$0xff] }
  0x5c   :  { %987 = vmatprep.subr.bf16.mxu0 %v5132_v28  ;;  %v194_v3 = vld [vmem:[#allocation5 + $0x200] sm:$0xff]  ;;  %v106_v11 = vrot.slane %v78_v61, 4  ;;  %v5155_v20 = vcombine.low %v186_v57, %v190_v58  ;;  %v323_v21 = vunpack.c.l.b16 %v263_v8  ;;  %v325_v22 = vunpack.c.l.b16 %v265_v9  ;;  %1023 = vmatpush1.bf16.msra.mxu1 %v5109_v29  ;;  %v171_v57 = vld [vmem:[#allocation5 + $0x148] sm:$0xff] }
  0x5d   :  { %v198_v4 = vld [vmem:[#allocation5 + $0x220] sm:$0xff]  ;;  %v332_v24 = vsel %vm326_vm0, %v321_v15, %v319_v14  ;;  %v5118_v30 = vcombine.high %v147_v18, %v151_v19  ;;  %v84_v36 = vrot.slane %v83_v16, 2  ;;  %v5117_v39 = vcombine.low %v147_v18, %v151_v19  ;;  %v175_v58 = vld [vmem:[#allocation5 + $0x168] sm:$0xff] }
  0x5e   :  { %v5164_v23 = vcombine.high %v194_v3, %v198_v4  ;;  %v333_v27 = vsel %vm328_vm1, %v323_v21, %v332_v24  ;;  %v107_v28 = vmax.f32 %v78_v61, %v106_v11  ;;  %v202_v33 = vld [vmem:[#allocation5 + $0x240] sm:$0xff]  ;;  %v5133_v63 = vcombine.low %v163_v45, %v167_v46  ;;  %v179_v5 = vld [vmem:[#allocation5 + $0x188] sm:$0xff] }
  0x5f   :  { %988 = vmatpush1.bf16.msra.mxu0 %v5131_v37  ;;  %v206_v34 = vld [vmem:[#allocation5 + $0x260] sm:$0xff]  ;;  %v334_v35 = vsel %vm330_vm2, %v325_v22, %v333_v27  ;;  %v96_v37 = vrot.slane %v95_v17, 2  ;;  %1024 = vmatprep.subr.bf16.mxu1 %v5118_v30  ;;  %v85_v49 = vmax.f32 %v83_v16, %v84_v36  ;;  %v121_v1 = vmax.f32 %v119_v41, %v120_v53  ;;  %v183_v6 = vld [vmem:[#allocation5 + $0x1a8] sm:$0xff] }
  0x60   :  { %989 = vmatprep.subr.bf16.mxu0 %v5140_v40  ;;  %v6030_v38 = vpack.c.b16 %v334_v35, %v334_v35  ;;  %v5163_v40 = vcombine.low %v194_v3, %v198_v4  ;;  %v5172_v43 = vcombine.high %v202_v33, %v206_v34  ;;  %v108_v44 = vrot.slane %v107_v28, 2  ;;  %v210_v47 = vld [vmem:[#allocation5 + $0x280] sm:$0xff]  ;;  %1025 = vmatpush1.bf16.msra.mxu1 %v5117_v39  ;;  %v191_v18 = vld [vmem:[#allocation5 + $0x1e8] sm:$0xff] }
  0x61   :  { %v214_v48 = vld [vmem:[#allocation5 + $0x2a0] sm:$0xff]  ;;  %v97_v50 = vmax.f32 %v95_v17, %v96_v37  ;;  %v5171_v52 = vcombine.low %v202_v33, %v206_v34  ;;  %1026 = vmatprep.subr.bf16.mxu1 %v5126_v42  ;;  %v86_v61 = vrot.slane %v85_v49, 1  ;;  %v5141_v11 = vcombine.low %v171_v57, %v175_v58  ;;  %v187_v17 = vld [vmem:[#allocation5 + $0x1c8] sm:$0xff] }
  0x62   :  { %1011 = vmatprep.mubr.bf16.mxu0 %v6030_v38  ;;  %1052 = vmatprep.mubr.bf16.mxu1 %v6030_v38  ;;  %v5180_v55 = vcombine.high %v210_v47, %v214_v48  ;;  %v109_v56 = vmax.f32 %v107_v28, %v108_v44  ;;  %v218_v59 = vld [vmem:[#allocation5 + $0x2c0] sm:$0xff]  ;;  %v5179_v0 = vcombine.low %v210_v47, %v214_v48  ;;  %v122_v13 = vrot.slane %v121_v1, 1  ;;  %v195_v29 = vld [vmem:[#allocation5 + $0x208] sm:$0xff] }
  0x63   :  { %990 = vmatpush1.bf16.msra.mxu0 %v5139_v51  ;;  %v5125_v51 = vcombine.low %v155_v31, %v159_v32  ;;  %v222_v60 = vld [vmem:[#allocation5 + $0x2e0] sm:$0xff]  ;;  %v98_v62 = vrot.slane %v97_v50, 1  ;;  %v87_v9 = vmax.f32 %v85_v49, %v86_v61  ;;  %v5150_v14 = vcombine.high %v179_v5, %v183_v6  ;;  %v199_v30 = vld [vmem:[#allocation5 + $0x228] sm:$0xff] }
  0x64   :  { %991 = vmatprep.subr.bf16.mxu0 %v5148_v54  ;;  %v5134_v54 = vcombine.high %v163_v45, %v167_v46  ;;  %v5188_v3 = vcombine.high %v218_v59, %v222_v60  ;;  %v110_v4 = vrot.slane %v109_v56, 1  ;;  %v230_v8 = vld [vmem:[#allocation5 + $0x320] sm:$0xff]  ;;  %v5187_v12 = vcombine.low %v218_v59, %v222_v60  ;;  %v203_v42 = vld [vmem:[#allocation5 + $0x248] sm:$0xff] }
  0x65   :  { %1027 = vmatpush1.bf16.msra.mxu1 %v5125_v51  ;;  %v99_v10 = vmax.f32 %v97_v50, %v98_v62  ;;  %v234_v19 = vld [vmem:[#allocation5 + $0x340] sm:$0xff]  ;;  %v258_v21 = vpack.c.bf16 %v87_v9, %v87_v9  ;;  %v123_v25 = vmax.f32 %v121_v1, %v122_v13  ;;  %v5158_v26 = vcombine.high %v187_v17, %v191_v18  ;;  %v211_v53 = vld [vmem:[#allocation5 + $0x288] sm:$0xff]  ;;  %v144_v1 = vld [vmem:[#allocation5 + $0x70] sm:$0xff] }
  0x66   :  { %1028 = vmatprep.subr.bf16.mxu1 %v5134_v54  ;;  %v111_v16 = vmax.f32 %v109_v56, %v110_v4  ;;  %v242_v31 = vld [vmem:[#allocation5 + $0x380] sm:$0xff]  ;;  %v5157_v35 = vcombine.low %v187_v17, %v191_v18  ;;  %v5166_v39 = vcombine.high %v195_v29, %v199_v30  ;;  %v5165_v47 = vcombine.low %v195_v29, %v199_v30  ;;  %v215_v54 = vld [vmem:[#allocation5 + $0x2a8] sm:$0xff]  ;;  %v136_v56 = vld [vmem:[#allocation5 + $0x30] sm:$0xff] }
  0x67   :  { %992 = vmatpush1.bf16.msra.mxu0 %v5147_v2  ;;  %v5142_v2 = vcombine.high %v171_v57, %v175_v58  ;;  %v260_v22 = vpack.c.bf16 %v99_v10, %v99_v10  ;;  %v246_v32 = vld [vmem:[#allocation5 + $0x3a0] sm:$0xff]  ;;  %v318_v33 = vunpack.c.l.b16 %v258_v21  ;;  %v264_v37 = vpack.c.bf16 %v123_v25, %v123_v25  ;;  %v219_v61 = vld [vmem:[#allocation5 + $0x2c8] sm:$0xff]  ;;  %v148_v9 = vld [vmem:[#allocation5 + $0x90] sm:$0xff] }
  0x68   :  { %993 = vmatprep.subr.bf16.mxu0 %v5156_v7  ;;  %v226_v7 = vld [vmem:[#allocation5 + $0x300] sm:$0xff]  ;;  %v262_v28 = vpack.c.bf16 %v111_v16, %v111_v16  ;;  %v5211_v48 = vcombine.low %v242_v31, %v246_v32  ;;  %v5182_v60 = vcombine.high %v211_v53, %v215_v54  ;;  %v223_v62 = vld [vmem:[#allocation5 + $0x2e8] sm:$0xff]  ;;  %v152_v10 = vld [vmem:[#allocation5 + $0xb0] sm:$0xff] }
  0x69   :  { %1029 = vmatpush1.bf16.msra.mxu1 %v5133_v63  ;;  %v5196_v15 = vcombine.high %v226_v7, %v230_v8  ;;  %v5195_v24 = vcombine.low %v226_v7, %v230_v8  ;;  %v320_v34 = vunpack.c.l.b16 %v260_v22  ;;  %v250_v44 = vld [vmem:[#allocation5 + $0x3c0] sm:$0xff]  ;;  %v324_v49 = vunpack.c.l.b16 %v264_v37  ;;  %v231_v7 = vld [vmem:[#allocation5 + $0x328] sm:$0xff]  ;;  %v156_v17 = vld [vmem:[#allocation5 + $0xd0] sm:$0xff] }
  0x6a   :  { %1030 = vmatprep.subr.bf16.mxu1 %v5142_v2  ;;  %v322_v41 = vunpack.c.l.b16 %v262_v28  ;;  %v254_v45 = vld [vmem:[#allocation5 + $0x3e0] sm:$0xff]  ;;  %v5190_v4 = vcombine.high %v219_v61, %v223_v62  ;;  %v5120_v16 = vcombine.high %v148_v9, %v152_v10  ;;  %v160_v18 = vld [vmem:[#allocation5 + $0xf0] sm:$0xff]  ;;  %v5119_v21 = vcombine.low %v148_v9, %v152_v10  ;;  %v243_v22 = vld [vmem:[#allocation5 + $0x388] sm:$0xff] }
  0x6b   :  { %994 = vmatpush1.bf16.msra.mxu0 %v5155_v20  ;;  %v238_v20 = vld [vmem:[#allocation5 + $0x360] sm:$0xff]  ;;  %v327_v46 = vsel %vm326_vm0, %v320_v34, %v318_v33  ;;  %v5220_v51 = vcombine.high %v250_v44, %v254_v45  ;;  %v5219_v58 = vcombine.low %v250_v44, %v254_v45  ;;  %v164_v25 = vld [vmem:[#allocation5 + $0x110] sm:$0xff]  ;;  %v5127_v29 = vcombine.low %v156_v17, %v160_v18  ;;  %v251_v30 = vld [vmem:[#allocation5 + $0x3c8] sm:$0xff] }
  0x6c   :  { %995 = vmatprep.subr.bf16.mxu0 %v5164_v23  ;;  %v5149_v23 = vcombine.low %v179_v5, %v183_v6  ;;  %v5204_v27 = vcombine.high %v234_v19, %v238_v20  ;;  %v5203_v36 = vcombine.low %v234_v19, %v238_v20  ;;  %v227_v6 = vld [vmem:[#allocation5 + $0x308] sm:$0xff]  ;;  %v172_v33 = vld [vmem:[#allocation5 + $0x150] sm:$0xff]  ;;  %v165_v9 = vld [vmem:[#allocation5 + $0x118] sm:$0xff] }
  0x6d   :  { %1031 = vmatpush1.bf16.msra.mxu1 %v5141_v11  ;;  %v5189_v11 = vcombine.low %v219_v61, %v223_v62  ;;  %v5197_v19 = vcombine.low %v227_v6, %v231_v7  ;;  %v176_v34 = vld [vmem:[#allocation5 + $0x170] sm:$0xff] }
  0x6e   :  { %1032 = vmatprep.subr.bf16.mxu1 %v5150_v14  ;;  %v235_v14 = vld [vmem:[#allocation5 + $0x348] sm:$0xff]  ;;  %v5143_v45 = vcombine.low %v172_v33, %v176_v34  ;;  %v212_v10 = vld [vmem:[#allocation5 + $0x290] sm:$0xff] }
  0x6f   :  { %996 = vmatpush1.bf16.msra.mxu0 %v5163_v40  ;;  %v5212_v40 = vcombine.high %v242_v31, %v246_v32  ;;  %v255_v31 = vld [vmem:[#allocation5 + $0x3e8] sm:$0xff] }
  0x70   :  { %997 = vmatprep.subr.bf16.mxu0 %v5172_v43  ;;  %v207_v43 = vld [vmem:[#allocation5 + $0x268] sm:$0xff]  ;;  %v5221_v44 = vcombine.low %v251_v30, %v255_v31 }
  0x71   :  { %1033 = vmatpush1.bf16.msra.mxu1 %v5149_v23  ;;  %v5174_v50 = vcombine.high %v203_v42, %v207_v43  ;;  %v5173_v57 = vcombine.low %v203_v42, %v207_v43  ;;  %v247_v23 = vld [vmem:[#allocation5 + $0x3a8] sm:$0xff]  ;;  %v180_v42 = vld [vmem:[#allocation5 + $0x190] sm:$0xff] }
  0x72   :  { %1034 = vmatprep.subr.bf16.mxu1 %v5158_v26  ;;  %v168_v26 = vld [vmem:[#allocation5 + $0x130] sm:$0xff]  ;;  %v5214_v28 = vcombine.high %v243_v22, %v247_v23 }
  0x73   :  { %998 = vmatpush1.bf16.msra.mxu0 %v5171_v52  ;;  %v329_v52 = vsel %vm328_vm1, %v322_v41, %v327_v46  ;;  %v5136_v32 = vcombine.high %v164_v25, %v168_v26  ;;  %v5135_v37 = vcombine.low %v164_v25, %v168_v26  ;;  %v137_v41 = vld [vmem:[#allocation5 + $0x38] sm:$0xff]  ;;  %v184_v43 = vld [vmem:[#allocation5 + $0x1b0] sm:$0xff] }
  0x74   :  { %999 = vmatprep.subr.bf16.mxu0 %v5180_v55  ;;  %v132_v55 = vld [vmem:[#allocation5 + $0x10] sm:$0xff]  ;;  %v331_v59 = vsel %vm330_vm2, %v324_v49, %v329_v52  ;;  %v145_v49 = vld [vmem:[#allocation5 + $0x78] sm:$0xff] }
  0x75   :  { %1035 = vmatpush1.bf16.msra.mxu1 %v5157_v35  ;;  %v5104_v63 = vcombine.high %v132_v55, %v136_v56  ;;  %v6037_v2 = vpack.c.b16 %v331_v59, %v331_v59  ;;  %v5103_v5 = vcombine.low %v132_v55, %v136_v56  ;;  %v5213_v35 = vcombine.low %v243_v22, %v247_v23  ;;  %v149_v56 = vld [vmem:[#allocation5 + $0x98] sm:$0xff]  ;;  %v200_v59 = vld [vmem:[#allocation5 + $0x230] sm:$0xff] }
  0x76   :  { %1036 = vmatprep.subr.bf16.mxu1 %v5166_v39  ;;  %v5144_v39 = vcombine.high %v172_v33, %v176_v34  ;;  %v185_v25 = vld [vmem:[#allocation5 + $0x1b8] sm:$0xff]  ;;  %v228_v26 = vld [vmem:[#allocation5 + $0x310] sm:$0xff] }
  0x77   :  { %1000 = vmatpush1.bf16.msra.mxu0 %v5179_v0  ;;  %v140_v0 = vld [vmem:[#allocation5 + $0x50] sm:$0xff]  ;;  %v193_v33 = vld [vmem:[#allocation5 + $0x1f8] sm:$0xff] }
  0x78   :  { %1001 = vmatprep.subr.bf16.mxu0 %v5188_v3  ;;  %v5181_v3 = vcombine.low %v211_v53, %v215_v54  ;;  %v5112_v8 = vcombine.high %v140_v0, %v144_v1  ;;  %v5111_v13 = vcombine.low %v140_v0, %v144_v1  ;;  %v5151_v53 = vcombine.low %v180_v42, %v184_v43  ;;  %v157_v0 = vld [vmem:[#allocation5 + $0xd8] sm:$0xff]  ;;  %v236_v34 = vld [vmem:[#allocation5 + $0x350] sm:$0xff] }
  0x79   :  { %1037 = vmatpush1.bf16.msra.mxu1 %v5165_v47  ;;  %v5152_v47 = vcombine.high %v180_v42, %v184_v43  ;;  %v161_v1 = vld [vmem:[#allocation5 + $0xf8] sm:$0xff]  ;;  %v244_v43 = vld [vmem:[#allocation5 + $0x390] sm:$0xff] }
  0x7a   :  { %1038 = vmatprep.subr.bf16.mxu1 %v5174_v50  ;;  %v188_v50 = vld [vmem:[#allocation5 + $0x1d0] sm:$0xff]  ;;  %v201_v42 = vld [vmem:[#allocation5 + $0x238] sm:$0xff] }
  0x7b   :  { %1002 = vmatpush1.bf16.msra.mxu0 %v5187_v12  ;;  %v5198_v12 = vcombine.high %v227_v6, %v231_v7  ;;  %v5130_v7 = vcombine.high %v157_v0, %v161_v1 }
  0x7c   :  { %1003 = vmatprep.subr.bf16.mxu0 %v5196_v15  ;;  %v239_v15 = vld [vmem:[#allocation5 + $0x368] sm:$0xff] }
  0x7d   :  { %1039 = vmatpush1.bf16.msra.mxu1 %v5173_v57  ;;  %v5206_v20 = vcombine.high %v235_v14, %v239_v15  ;;  %v153_v57 = vld [vmem:[#allocation5 + $0xb8] sm:$0xff] }
  0x7e   :  { %1040 = vmatprep.subr.bf16.mxu1 %v5182_v60  ;;  %v5122_v62 = vcombine.high %v149_v56, %v153_v57 }
  0x7f   :  { %1004 = vmatpush1.bf16.msra.mxu0 %v5195_v24  ;;  %v5128_v24 = vcombine.high %v156_v17, %v160_v18  ;;  %v177_v17 = vld [vmem:[#allocation5 + $0x178] sm:$0xff]  ;;  %v220_v18 = vld [vmem:[#allocation5 + $0x2d0] sm:$0xff] }
  0x80   :  { %1005 = vmatprep.subr.bf16.mxu0 %v5204_v27  ;;  %v5205_v27 = vcombine.low %v235_v14, %v239_v15 }
  0x81   :  { %1041 = vmatpush1.bf16.msra.mxu1 %v5181_v3  ;;  %v204_v3 = vld [vmem:[#allocation5 + $0x250] sm:$0xff] }
  0x82   :  { %1042 = vmatprep.subr.bf16.mxu1 %v5190_v4  ;;  %v208_v4 = vld [vmem:[#allocation5 + $0x270] sm:$0xff] }
  0x83   :  { %1006 = vmatpush1.bf16.msra.mxu0 %v5203_v36  ;;  %v5222_v36 = vcombine.high %v251_v30, %v255_v31 }
  0x84   :  { %1007 = vmatprep.subr.bf16.mxu0 %v5212_v40  ;;  %v133_v40 = vld [vmem:[#allocation5 + $0x18] sm:$0xff] }
  0x85   :  { %1043 = vmatpush1.bf16.msra.mxu1 %v5189_v11  ;;  %v5106_v46 = vcombine.high %v133_v40, %v137_v41  ;;  %v5105_v52 = vcombine.low %v133_v40, %v137_v41  ;;  %v216_v11 = vld [vmem:[#allocation5 + $0x2b0] sm:$0xff]  ;;  %v197_v41 = vld [vmem:[#allocation5 + $0x218] sm:$0xff] }
  0x86   :  { %1044 = vmatprep.subr.bf16.mxu1 %v5198_v12  ;;  %v5129_v12 = vcombine.low %v157_v0, %v161_v1  ;;  %v5184_v15 = vcombine.high %v212_v10, %v216_v11  ;;  %v221_v0 = vld [vmem:[#allocation5 + $0x2d8] sm:$0xff] }
  0x87   :  { %1008 = vmatpush1.bf16.msra.mxu0 %v5211_v48  ;;  %v141_v48 = vld [vmem:[#allocation5 + $0x58] sm:$0xff] }
  0x88   :  { %1009 = vmatprep.subr.bf16.mxu0 %v5220_v51  ;;  %v192_v51 = vld [vmem:[#allocation5 + $0x1f0] sm:$0xff]  ;;  %v5114_v54 = vcombine.high %v141_v48, %v145_v49  ;;  %v5113_v60 = vcombine.low %v141_v48, %v145_v49  ;;  %v205_v49 = vld [vmem:[#allocation5 + $0x258] sm:$0xff] }
  0x89   :  { %1045 = vmatpush1.bf16.msra.mxu1 %v5197_v19  ;;  %v5160_v55 = vcombine.high %v188_v50, %v192_v51  ;;  %v5159_v61 = vcombine.low %v188_v50, %v192_v51  ;;  %v224_v19 = vld [vmem:[#allocation5 + $0x2f0] sm:$0xff]  ;;  %v209_v50 = vld [vmem:[#allocation5 + $0x278] sm:$0xff] }
  0x8a   :  { %1046 = vmatprep.subr.bf16.mxu1 %v5206_v20  ;;  %v5192_v23 = vcombine.high %v220_v18, %v224_v19  ;;  %v252_v51 = vld [vmem:[#allocation5 + $0x3d0] sm:$0xff]  ;;  %v225_v1 = vld [vmem:[#allocation5 + $0x2f8] sm:$0xff] }
  0x8b   :  { %1010 = vmatpush1.bf16.msra.mxu0 %v5219_v58  ;;  %v196_v58 = vld [vmem:[#allocation5 + $0x210] sm:$0xff] }
  0x8c   :  { %1061 = vmatprep.subr.bf16.mxu0 %v5104_v63  ;;  %v5168_v63 = vcombine.high %v196_v58, %v200_v59  ;;  %v5167_v6 = vcombine.low %v196_v58, %v200_v59  ;;  %v217_v58 = vld [vmem:[#allocation5 + $0x2b8] sm:$0xff]  ;;  %v1167_v59 = vld [vmem:[#allocation7] sm:$0xff] }
  0x8d   :  { %1047 = vmatpush1.bf16.msra.mxu1 %v5205_v27  ;;  %v232_v27 = vld [vmem:[#allocation5 + $0x330] sm:$0xff] }
  0x8e   :  { %1012 = vmatmul.mubr.bf16.vlgmr.msra.gmra.mrb[0].mxu0 %v6037_v2  ;;  %1048 = vmatprep.subr.bf16.mxu1 %v5214_v28  ;;  %v5200_v31 = vcombine.high %v228_v26, %v232_v27 }
  0x8f   :  { %1062 = vmatpush1.bf16.msra.mxu0 %v5103_v5  ;;  %1093 = vmatprep.mubr.bf16.mxu0 %v6030_v38  ;;  %v5121_v5 = vcombine.low %v149_v56, %v153_v57  ;;  %v213_v57 = vld [vmem:[#allocation5 + $0x298] sm:$0xff] }
  0x90   :  { %1063 = vmatprep.subr.bf16.mxu0 %v5112_v8  ;;  %v5176_v8 = vcombine.high %v204_v3, %v208_v4 }
  0x91   :  { %1049 = vmatpush1.bf16.msra.mxu1 %v5213_v35  ;;  %v240_v35 = vld [vmem:[#allocation5 + $0x370] sm:$0xff] }
  0x92   :  { %1050 = vmatprep.subr.bf16.mxu1 %v5222_v36  ;;  %v5208_v40 = vcombine.high %v236_v34, %v240_v35 }
  0x93   :  { %1064 = vmatpush1.bf16.msra.mxu0 %v5111_v13  ;;  %v5175_v13 = vcombine.low %v204_v3, %v208_v4  ;;  %v1175_v4 = vld [vmem:[#allocation7 + $0x40] sm:$0xff] }
  0x94   :  { %1065 = vmatprep.subr.bf16.mxu0 %v5120_v16  ;;  %v173_v16 = vld [vmem:[#allocation5 + $0x158] sm:$0xff] }
  0x95   :  { %1051 = vmatpush1.bf16.msra.mxu1 %v5221_v44  ;;  %v5146_v22 = vcombine.high %v173_v16, %v177_v17  ;;  %v5145_v28 = vcombine.low %v173_v16, %v177_v17  ;;  %v248_v44 = vld [vmem:[#allocation5 + $0x3b0] sm:$0xff]  ;;  %v237_v16 = vld [vmem:[#allocation5 + $0x358] sm:$0xff] }
  0x96   :  { %1102 = vmatprep.subr.bf16.mxu1 %v5106_v46  ;;  %v5207_v46 = vcombine.low %v236_v34, %v240_v35  ;;  %v5216_v48 = vcombine.high %v244_v43, %v248_v44  ;;  %v241_v17 = vld [vmem:[#allocation5 + $0x378] sm:$0xff]  ;;  %v1207_v35 = vld [vmem:[#allocation7 + $0x140] sm:$0xff] }
  0x97   :  { %1066 = vmatpush1.bf16.msra.mxu0 %v5119_v21  ;;  %v5183_v21 = vcombine.low %v212_v10, %v216_v11  ;;  %v1183_v11 = vld [vmem:[#allocation7 + $0x80] sm:$0xff] }
  0x98   :  { %1067 = vmatprep.subr.bf16.mxu0 %v5128_v24  ;;  %1053 = vmatmul.mubr.bf16.vlgmr.msra.gmra.mrb[0].mxu1 %v6037_v2  ;;  %v181_v24 = vld [vmem:[#allocation5 + $0x198] sm:$0xff] }
  0x99   :  { %1103 = vmatpush1.bf16.msra.mxu1 %v5105_v52  ;;  %1134 = vmatprep.mubr.bf16.mxu1 %v6030_v38  ;;  %v169_v38 = vld [vmem:[#allocation5 + $0x138] sm:$0xff]  ;;  %v5154_v30 = vcombine.high %v181_v24, %v185_v25  ;;  %v5153_v36 = vcombine.low %v181_v24, %v185_v25  ;;  %v256_v52 = vld [vmem:[#allocation5 + $0x3f0] sm:$0xff] }
  0x9a   :  { %1104 = vmatprep.subr.bf16.mxu1 %v5114_v54  ;;  %v5138_v14 = vcombine.high %v165_v9, %v169_v38  ;;  %v5137_v20 = vcombine.low %v165_v9, %v169_v38  ;;  %v5215_v54 = vcombine.low %v244_v43, %v248_v44  ;;  %v5224_v56 = vcombine.high %v252_v51, %v256_v52  ;;  %v229_v9 = vld [vmem:[#allocation5 + $0x318] sm:$0xff]  ;;  %v1215_v44 = vld [vmem:[#allocation7 + $0x180] sm:$0xff] }
  0x9b   :  { %1068 = vmatpush1.bf16.msra.mxu0 %v5127_v29  ;;  %v5191_v29 = vcombine.low %v220_v18, %v224_v19  ;;  %v233_v38 = vld [vmem:[#allocation5 + $0x338] sm:$0xff]  ;;  %v1191_v19 = vld [vmem:[#allocation7 + $0xc0] sm:$0xff] }
  0x9c   :  { %1069 = vmatprep.subr.bf16.mxu0 %v5136_v32  ;;  %v189_v32 = vld [vmem:[#allocation5 + $0x1d8] sm:$0xff] }
  0x9d   :  { %1105 = vmatpush1.bf16.msra.mxu1 %v5113_v60  ;;  %v1171_v60 = vld [vmem:[#allocation7 + $0x20] sm:$0xff]  ;;  %v245_v24 = vld [vmem:[#allocation5 + $0x398] sm:$0xff] }
  0x9e   :  { %1106 = vmatprep.subr.bf16.mxu1 %v5122_v62  ;;  %v5223_v62 = vcombine.low %v252_v51, %v256_v52  ;;  %v5228_v3 = vcombine.high %v1167_v59, %v1171_v60  ;;  %v249_v25 = vld [vmem:[#allocation5 + $0x3b8] sm:$0xff]  ;;  %v1223_v52 = vld [vmem:[#allocation7 + $0x1c0] sm:$0xff] }
  0x9f   :  { %1070 = vmatpush1.bf16.msra.mxu0 %v5135_v37  ;;  %v5199_v37 = vcombine.low %v228_v26, %v232_v27  ;;  %v1199_v27 = vld [vmem:[#allocation7 + $0x100] sm:$0xff] }
  0xa0   :  { %1071 = vmatprep.subr.bf16.mxu0 %v5144_v39  ;;  %v5162_v39 = vcombine.high %v189_v32, %v193_v33 }
  0xa1   :  { %1107 = vmatpush1.bf16.msra.mxu1 %v5121_v5  ;;  %v1179_v5 = vld [vmem:[#allocation7 + $0x60] sm:$0xff] }
  0xa2   :  { %1108 = vmatprep.subr.bf16.mxu1 %v5130_v7  ;;  %v5194_v7 = vcombine.high %v221_v0, %v225_v1  ;;  %v5236_v10 = vcombine.high %v1175_v4, %v1179_v5 }
  0xa3   :  { %1072 = vmatpush1.bf16.msra.mxu0 %v5143_v45  ;;  %v5161_v45 = vcombine.low %v189_v32, %v193_v33  ;;  %v253_v32 = vld [vmem:[#allocation5 + $0x3d8] sm:$0xff] }
  0xa4   :  { %1073 = vmatprep.subr.bf16.mxu0 %v5152_v47  ;;  %v5170_v47 = vcombine.high %v197_v41, %v201_v42  ;;  %v257_v33 = vld [vmem:[#allocation5 + $0x3f8] sm:$0xff] }
  0xa5   :  { %1109 = vmatpush1.bf16.msra.mxu1 %v5129_v12  ;;  %v1187_v12 = vld [vmem:[#allocation7 + $0xa0] sm:$0xff] }
  0xa6   :  { %1110 = vmatprep.subr.bf16.mxu1 %v5138_v14  ;;  %v5202_v14 = vcombine.high %v229_v9, %v233_v38  ;;  %v5244_v18 = vcombine.high %v1183_v11, %v1187_v12 }
  0xa7   :  { %1074 = vmatpush1.bf16.msra.mxu0 %v5151_v53  ;;  %v5169_v53 = vcombine.low %v197_v41, %v201_v42  ;;  %v1168_v41 = vld [vmem:[#allocation7 + $0x8] sm:$0xff] }
  0xa8   :  { %1075 = vmatprep.subr.bf16.mxu0 %v5160_v55  ;;  %v5178_v55 = vcombine.high %v205_v49, %v209_v50  ;;  %v1172_v42 = vld [vmem:[#allocation7 + $0x28] sm:$0xff] }
  0xa9   :  { %1111 = vmatpush1.bf16.msra.mxu1 %v5137_v20  ;;  %v1195_v20 = vld [vmem:[#allocation7 + $0xe0] sm:$0xff] }
  0xaa   :  { %1112 = vmatprep.subr.bf16.mxu1 %v5146_v22  ;;  %v5210_v22 = vcombine.high %v237_v16, %v241_v17  ;;  %v5252_v26 = vcombine.high %v1191_v19, %v1195_v20 }
  0xab   :  { %1076 = vmatpush1.bf16.msra.mxu0 %v5159_v61  ;;  %v5177_v61 = vcombine.low %v205_v49, %v209_v50  ;;  %v1176_v49 = vld [vmem:[#allocation7 + $0x48] sm:$0xff] }
  0xac   :  { %1077 = vmatprep.subr.bf16.mxu0 %v5168_v63  ;;  %v5186_v63 = vcombine.high %v213_v57, %v217_v58  ;;  %v1180_v50 = vld [vmem:[#allocation7 + $0x68] sm:$0xff] }
  0xad   :  { %1113 = vmatpush1.bf16.msra.mxu1 %v5145_v28  ;;  %v1203_v28 = vld [vmem:[#allocation7 + $0x120] sm:$0xff] }
  0xae   :  { %1114 = vmatprep.subr.bf16.mxu1 %v5154_v30  ;;  %v5218_v30 = vcombine.high %v245_v24, %v249_v25  ;;  %v5260_v34 = vcombine.high %v1199_v27, %v1203_v28 }
  0xaf   :  { %1078 = vmatpush1.bf16.msra.mxu0 %v5167_v6  ;;  %v5185_v6 = vcombine.low %v213_v57, %v217_v58  ;;  %v1184_v57 = vld [vmem:[#allocation7 + $0x88] sm:$0xff] }
  0xb0   :  { %1079 = vmatprep.subr.bf16.mxu0 %v5176_v8  ;;  %v5227_v8 = vcombine.low %v1167_v59, %v1171_v60  ;;  %v1188_v58 = vld [vmem:[#allocation7 + $0xa8] sm:$0xff]  ;;  %v1231_v60 = vld [vmem:[#allocation7 + $0x200] sm:$0xff] }
  0xb1   :  { %1115 = vmatpush1.bf16.msra.mxu1 %v5153_v36  ;;  %v1211_v36 = vld [vmem:[#allocation7 + $0x160] sm:$0xff] }
  0xb2   :  { %1116 = vmatprep.subr.bf16.mxu1 %v5162_v39  ;;  %v5226_v39 = vcombine.high %v253_v32, %v257_v33  ;;  %v5268_v43 = vcombine.high %v1207_v35, %v1211_v36 }
  0xb3   :  { %1080 = vmatpush1.bf16.msra.mxu0 %v5175_v13  ;;  %v5193_v13 = vcombine.low %v221_v0, %v225_v1  ;;  %v6045_v1 = vld [vmem:[#allocation7 + $0x400] sm:$0xff] }
  0xb4   :  { %1081 = vmatprep.subr.bf16.mxu0 %v5184_v15  ;;  %v5235_v15 = vcombine.low %v1175_v4, %v1179_v5  ;;  %v6049_v4 = vld [vmem:[#allocation7 + $0x408] sm:$0xff] }
  0xb5   :  { %1117 = vmatpush1.bf16.msra.mxu1 %v5161_v45  ;;  %v1219_v45 = vld [vmem:[#allocation7 + $0x1a0] sm:$0xff]  ;;  %v1192_v5 = vld [vmem:[#allocation7 + $0xc8] sm:$0xff] }
  0xb6   :  { %1118 = vmatprep.subr.bf16.mxu1 %v5170_v47  ;;  %v5230_v47 = vcombine.high %v1168_v41, %v1172_v42  ;;  %v5276_v51 = vcombine.high %v1215_v44, %v1219_v45 }
  0xb7   :  { %1082 = vmatpush1.bf16.msra.mxu0 %v5183_v21  ;;  %v5201_v21 = vcombine.low %v229_v9, %v233_v38  ;;  %v1243_v9 = vld [vmem:[#allocation7 + $0x260] sm:$0xff] }
  0xb8   :  { %1083 = vmatprep.subr.bf16.mxu0 %v5192_v23  ;;  %v5243_v23 = vcombine.low %v1183_v11, %v1187_v12  ;;  %v5245_v11 = vcombine.low %v1184_v57, %v1188_v58 }
  0xb9   :  { %1119 = vmatpush1.bf16.msra.mxu1 %v5169_v53  ;;  %v1227_v53 = vld [vmem:[#allocation7 + $0x1e0] sm:$0xff] }
  0xba   :  { %1120 = vmatprep.subr.bf16.mxu1 %v5178_v55  ;;  %v5238_v55 = vcombine.high %v1176_v49, %v1180_v50  ;;  %v5284_v59 = vcombine.high %v1223_v52, %v1227_v53  ;;  %v5283_v0 = vcombine.low %v1223_v52, %v1227_v53 }
  0xbb   :  { %1084 = vmatpush1.bf16.msra.mxu0 %v5191_v29  ;;  %v5209_v29 = vcombine.low %v237_v16, %v241_v17  ;;  %v1247_v17 = vld [vmem:[#allocation7 + $0x280] sm:$0xff] }
  0xbc   :  { %1085 = vmatprep.subr.bf16.mxu0 %v5200_v31  ;;  %v5251_v31 = vcombine.low %v1191_v19, %v1195_v20 }
  0xbd   :  { %1121 = vmatpush1.bf16.msra.mxu1 %v5177_v61  ;;  %v1235_v61 = vld [vmem:[#allocation7 + $0x220] sm:$0xff] }
  0xbe   :  { %1122 = vmatprep.subr.bf16.mxu1 %v5186_v63  ;;  %v5246_v63 = vcombine.high %v1184_v57, %v1188_v58  ;;  %v1287_v58 = vld [vmem:[#allocation7 + $0x3c0] sm:$0xff] }
  0xbf   :  { %1086 = vmatpush1.bf16.msra.mxu0 %v5199_v37  ;;  %v5217_v37 = vcombine.low %v245_v24, %v249_v25  ;;  %v1255_v25 = vld [vmem:[#allocation7 + $0x2c0] sm:$0xff] }
  0xc0   :  { %1087 = vmatprep.subr.bf16.mxu0 %v5208_v40  ;;  %v5259_v40 = vcombine.low %v1199_v27, %v1203_v28 }
  0xc1   :  { %1123 = vmatpush1.bf16.msra.mxu1 %v5185_v6  ;;  %v1196_v6 = vld [vmem:[#allocation7 + $0xe8] sm:$0xff] }
  0xc2   :  { %1124 = vmatprep.subr.bf16.mxu1 %v5194_v7  ;;  %v5292_v7 = vcombine.high %v1231_v60, %v1235_v61  ;;  %v5254_v12 = vcombine.high %v1192_v5, %v1196_v6  ;;  %v5253_v19 = vcombine.low %v1192_v5, %v1196_v6 }
  0xc3   :  { %1088 = vmatpush1.bf16.msra.mxu0 %v5207_v46  ;;  %v5225_v46 = vcombine.low %v253_v32, %v257_v33  ;;  %v1263_v33 = vld [vmem:[#allocation7 + $0x300] sm:$0xff] }
  0xc4   :  { %1089 = vmatprep.subr.bf16.mxu0 %v5216_v48  ;;  %v5267_v48 = vcombine.low %v1207_v35, %v1211_v36 }
  0xc5   :  { %1125 = vmatpush1.bf16.msra.mxu1 %v5193_v13  ;;  %v5291_v13 = vcombine.low %v1231_v60, %v1235_v61 }
  0xc6   :  { %1126 = vmatprep.subr.bf16.mxu1 %v5202_v14  ;;  %v1200_v14 = vld [vmem:[#allocation7 + $0x108] sm:$0xff] }
  0xc7   :  { %1090 = vmatpush1.bf16.msra.mxu0 %v5215_v54  ;;  %v5229_v54 = vcombine.low %v1168_v41, %v1172_v42  ;;  %v1271_v42 = vld [vmem:[#allocation7 + $0x340] sm:$0xff] }
  0xc8   :  { %1091 = vmatprep.subr.bf16.mxu0 %v5224_v56  ;;  %v5275_v56 = vcombine.low %v1215_v44, %v1219_v45 }
  0xc9   :  { %1127 = vmatpush1.bf16.msra.mxu1 %v5201_v21 }
  0xca   :  { %1128 = vmatprep.subr.bf16.mxu1 %v5210_v22  ;;  %v1208_v22 = vld [vmem:[#allocation7 + $0x148] sm:$0xff] }
  0xcb   :  { %1092 = vmatpush1.bf16.msra.mxu0 %v5223_v62  ;;  %v5237_v62 = vcombine.low %v1176_v49, %v1180_v50  ;;  %v1279_v50 = vld [vmem:[#allocation7 + $0x380] sm:$0xff] }
  0xcc   :  { %4292 = vmatprep.subr.bf16.mxu0 %v5228_v3  ;;  %v6047_v3 = vld [vmem:[#allocation7 + $0x420] sm:$0xff] }
  0xcd   :  { %1129 = vmatpush1.bf16.msra.mxu1 %v5209_v29  ;;  %v5355_v38 = vcombine.low %v6045_v1, %v6047_v3 }
  0xce   :  { %1094 = vmatmul.mubr.bf16.vlgmr.msra.gmra.mrb[4].mxu0 %v6037_v2  ;;  %1130 = vmatprep.subr.bf16.mxu1 %v5218_v30  ;;  %v1216_v30 = vld [vmem:[#allocation7 + $0x188] sm:$0xff] }
  0xcf   :  { %4293 = vmatpush1.bf16.msra.mxu0 %v5227_v8  ;;  %v6051_v8 = vld [vmem:[#allocation7 + $0x428] sm:$0xff] }
  0xd0   :  { %4294 = vmatprep.subr.bf16.mxu0 %v5236_v10  ;;  %v5357_v10 = vcombine.low %v6049_v4, %v6051_v8 }
  0xd1   :  { %1131 = vmatpush1.bf16.msra.mxu1 %v5217_v37 }
  0xd2   :  { %1132 = vmatprep.subr.bf16.mxu1 %v5226_v39  ;;  %v1224_v39 = vld [vmem:[#allocation7 + $0x1c8] sm:$0xff] }
  0xd3   :  { %4295 = vmatpush1.bf16.msra.mxu0 %v5235_v15  ;;  %v1204_v15 = vld [vmem:[#allocation7 + $0x128] sm:$0xff] }
  0xd4   :  { %4296 = vmatprep.subr.bf16.mxu0 %v5244_v18  ;;  %v1251_v18 = vld [vmem:[#allocation7 + $0x2a0] sm:$0xff]  ;;  %v5262_v20 = vcombine.high %v1200_v14, %v1204_v15  ;;  %v5261_v27 = vcombine.low %v1200_v14, %v1204_v15  ;;  %v1264_v15 = vld [vmem:[#allocation7 + $0x308] sm:$0xff] }
  0xd5   :  { %1133 = vmatpush1.bf16.msra.mxu1 %v5225_v46  ;;  %v5308_v24 = vcombine.high %v1247_v17, %v1251_v18  ;;  %v5307_v29 = vcombine.low %v1247_v17, %v1251_v18 }
  0xd6   :  { %4456 = vmatprep.subr.bf16.mxu1 %v5230_v47  ;;  %v1232_v47 = vld [vmem:[#allocation7 + $0x208] sm:$0xff] }
  0xd7   :  { %4297 = vmatpush1.bf16.msra.mxu0 %v5243_v23  ;;  %v1212_v23 = vld [vmem:[#allocation7 + $0x168] sm:$0xff] }
  0xd8   :  { %4298 = vmatprep.subr.bf16.mxu0 %v5252_v26  ;;  %1135 = vmatmul.mubr.bf16.vlgmr.msra.gmra.mrb[4].mxu1 %v6037_v2  ;;  %v1239_v2 = vld [vmem:[#allocation7 + $0x240] sm:$0xff]  ;;  %v5270_v28 = vcombine.high %v1208_v22, %v1212_v23  ;;  %v5269_v35 = vcombine.low %v1208_v22, %v1212_v23  ;;  %v1280_v23 = vld [vmem:[#allocation7 + $0x388] sm:$0xff] }
  0xd9   :  { %4457 = vmatpush1.bf16.msra.mxu1 %v5229_v54  ;;  %v5300_v16 = vcombine.high %v1239_v2, %v1243_v9  ;;  %v5299_v21 = vcombine.low %v1239_v2, %v1243_v9  ;;  %v1259_v26 = vld [vmem:[#allocation7 + $0x2e0] sm:$0xff]  ;;  %v1256_v9 = vld [vmem:[#allocation7 + $0x2c8] sm:$0xff] }
  0xda   :  { %4458 = vmatprep.subr.bf16.mxu1 %v5238_v55  ;;  %v5316_v32 = vcombine.high %v1255_v25, %v1259_v26  ;;  %v5315_v37 = vcombine.low %v1255_v25, %v1259_v26  ;;  %v1240_v55 = vld [vmem:[#allocation7 + $0x248] sm:$0xff] }
  0xdb   :  { %4299 = vmatpush1.bf16.msra.mxu0 %v5251_v31  ;;  %v1220_v31 = vld [vmem:[#allocation7 + $0x1a8] sm:$0xff] }
  0xdc   :  { %4300 = vmatprep.subr.bf16.mxu0 %v5260_v34  ;;  %v1267_v34 = vld [vmem:[#allocation7 + $0x320] sm:$0xff]  ;;  %v5278_v36 = vcombine.high %v1216_v30, %v1220_v31  ;;  %v5277_v44 = vcombine.low %v1216_v30, %v1220_v31 }
  0xdd   :  { %4459 = vmatpush1.bf16.msra.mxu1 %v5237_v62  ;;  %v5324_v41 = vcombine.high %v1263_v33, %v1267_v34  ;;  %v5323_v46 = vcombine.low %v1263_v33, %v1267_v34  ;;  %v270_v33 = vlaneseq }
  0xde   :  { %4460 = vmatprep.subr.bf16.mxu1 %v5246_v63  ;;  %v1248_v63 = vld [vmem:[#allocation7 + $0x288] sm:$0xff] }
  0xdf   :  { %4301 = vmatpush1.bf16.msra.mxu0 %v5259_v40  ;;  %v1228_v40 = vld [vmem:[#allocation7 + $0x1e8] sm:$0xff]  ;;  %v6061_v34 = vshrl.u32 %v270_v33, 7  ;;  %v1347_v33 = vld [vmem:[#allocation7 + $0x5a0] sm:$0xff] }
  0xe0   :  { %4302 = vmatprep.subr.bf16.mxu0 %v5268_v43  ;;  %v1275_v43 = vld [vmem:[#allocation7 + $0x360] sm:$0xff]  ;;  %v5286_v45 = vcombine.high %v1224_v39, %v1228_v40  ;;  %v5285_v52 = vcombine.low %v1224_v39, %v1228_v40 }
  0xe1   :  { %4461 = vmatpush1.bf16.msra.mxu1 %v5245_v11  ;;  %v5332_v49 = vcombine.high %v1271_v42, %v1275_v43  ;;  %v5331_v54 = vcombine.low %v1271_v42, %v1275_v43  ;;  %v1260_v11 = vld [vmem:[#allocation7 + $0x2e8] sm:$0xff]  ;;  %v6066_v39 = vsub.s32 0, %v6061_v34  ;;  %v6069_v40 = vsub.s32 1, %v6061_v34 }
  0xe2   :  { %4462 = vmatprep.subr.bf16.mxu1 %v5254_v12  ;;  %v5356_v12 = vcombine.high %v6045_v1, %v6047_v3  ;;  %v5318_v14 = vcombine.high %v1256_v9, %v1260_v11  ;;  %v5317_v17 = vcombine.low %v1256_v9, %v1260_v11  ;;  %v1319_v9 = vld [vmem:[#allocation7 + $0x4c0] sm:$0xff] }
  0xe3   :  { %4303 = vmatpush1.bf16.msra.mxu0 %v5267_v48  ;;  %v1236_v48 = vld [vmem:[#allocation7 + $0x228] sm:$0xff]  ;;  %v1323_v11 = vld [vmem:[#allocation7 + $0x4e0] sm:$0xff] }
  0xe4   :  { %4304 = vmatprep.subr.bf16.mxu0 %v5276_v51  ;;  %v1283_v51 = vld [vmem:[#allocation7 + $0x3a0] sm:$0xff]  ;;  %v5294_v53 = vcombine.high %v1232_v47, %v1236_v48  ;;  %v5293_v60 = vcombine.low %v1232_v47, %v1236_v48  ;;  %v5380_v1 = vcombine.high %v1319_v9, %v1323_v11 }
  0xe5   :  { %4463 = vmatpush1.bf16.msra.mxu1 %v5253_v19  ;;  %v5340_v57 = vcombine.high %v1279_v50, %v1283_v51  ;;  %v5339_v62 = vcombine.low %v1279_v50, %v1283_v51  ;;  %v1272_v19 = vld [vmem:[#allocation7 + $0x348] sm:$0xff]  ;;  %v1303_v51 = vld [vmem:[#allocation7 + $0x440] sm:$0xff] }
  0xe6   :  { %4464 = vmatprep.subr.bf16.mxu1 %v5262_v20  ;;  %v1276_v20 = vld [vmem:[#allocation7 + $0x368] sm:$0xff] }
  0xe7   :  { %4305 = vmatpush1.bf16.msra.mxu0 %v5275_v56  ;;  %v1244_v56 = vld [vmem:[#allocation7 + $0x268] sm:$0xff]  ;;  %v5334_v22 = vcombine.high %v1272_v19, %v1276_v20  ;;  %v5333_v25 = vcombine.low %v1272_v19, %v1276_v20 }
  0xe8   :  { %4306 = vmatprep.subr.bf16.mxu0 %v5284_v59  ;;  %v1291_v59 = vld [vmem:[#allocation7 + $0x3e0] sm:$0xff]  ;;  %v5302_v61 = vcombine.high %v1240_v55, %v1244_v56  ;;  %v5301_v6 = vcombine.low %v1240_v55, %v1244_v56  ;;  %v1308_v55 = vld [vmem:[#allocation7 + $0x468] sm:$0xff] }
  0xe9   :  { %4465 = vmatpush1.bf16.msra.mxu1 %v5261_v27  ;;  %v5348_v5 = vcombine.high %v1287_v58, %v1291_v59  ;;  %v5347_v2 = vcombine.low %v1287_v58, %v1291_v59  ;;  %v1288_v27 = vld [vmem:[#allocation7 + $0x3c8] sm:$0xff] }
  0xea   :  { %4466 = vmatprep.subr.bf16.mxu1 %v5270_v28  ;;  %v1292_v28 = vld [vmem:[#allocation7 + $0x3e8] sm:$0xff] }
  0xeb   :  { %4307 = vmatpush1.bf16.msra.mxu0 %v5283_v0  ;;  %v1252_v0 = vld [vmem:[#allocation7 + $0x2a8] sm:$0xff]  ;;  %v5350_v30 = vcombine.high %v1288_v27, %v1292_v28  ;;  %v5349_v31 = vcombine.low %v1288_v27, %v1292_v28 }
  0xec   :  { %4308 = vmatprep.subr.bf16.mxu0 %v5292_v7  ;;  %v5310_v7 = vcombine.high %v1248_v63, %v1252_v0 }
  0xed   :  { %4467 = vmatpush1.bf16.msra.mxu1 %v5269_v35  ;;  %v266_v35 = vld [vmem:[#allocation8] ss:$8 sm:$0xf] }
  0xee   :  { %4468 = vmatprep.subr.bf16.mxu1 %v5278_v36  ;;  %v267_v36 = vld [vmem:[#allocation8] ss:$8 sm:$0xf0] }
  0xef   :  { %4309 = vmatpush1.bf16.msra.mxu0 %v5291_v13  ;;  %v5309_v13 = vcombine.low %v1248_v63, %v1252_v0  ;;  %v1312_v63 = vld [vmem:[#allocation7 + $0x488] sm:$0xff] }
  0xf0   :  { %4310 = vmatprep.subr.bf16.mxu0 %v5300_v16  ;;  %v1268_v16 = vld [vmem:[#allocation7 + $0x328] sm:$0xff] }
  0xf1   :  { %4469 = vmatpush1.bf16.msra.mxu1 %v5277_v44  ;;  %v5326_v18 = vcombine.high %v1264_v15, %v1268_v16  ;;  %v1316_v0 = vld [vmem:[#allocation7 + $0x4a8] sm:$0xff] }
  0xf2   :  { %4470 = vmatprep.subr.bf16.mxu1 %v5286_v45 }
  0xf3   :  { %4311 = vmatpush1.bf16.msra.mxu0 %v5299_v21  ;;  %v5325_v21 = vcombine.low %v1264_v15, %v1268_v16  ;;  %v5373_v15 = vcombine.low %v1312_v63, %v1316_v0  ;;  %v6090_v16 = vsub.s32 3, %v6061_v34 }
  0xf4   :  { %4312 = vmatprep.subr.bf16.mxu0 %v5308_v24  ;;  %v1284_v24 = vld [vmem:[#allocation7 + $0x3a8] sm:$0xff] }
  0xf5   :  { %4471 = vmatpush1.bf16.msra.mxu1 %v5285_v52  ;;  %v5342_v26 = vcombine.high %v1280_v23, %v1284_v24 }
  0xf6   :  { %4472 = vmatprep.subr.bf16.mxu1 %v5294_v53  ;;  %v1307_v53 = vld [vmem:[#allocation7 + $0x460] sm:$0xff] }
  0xf7   :  { %4313 = vmatpush1.bf16.msra.mxu0 %v5307_v29  ;;  %v5341_v29 = vcombine.low %v1280_v23, %v1284_v24  ;;  %v5364_v59 = vcombine.high %v1303_v51, %v1307_v53  ;;  %v1336_v23 = vld [vmem:[#allocation7 + $0x548] sm:$0xff] }
  0xf8   :  { %4314 = vmatprep.subr.bf16.mxu0 %v5316_v32  ;;  %v5358_v32 = vcombine.high %v6049_v4, %v6051_v8  ;;  %v1327_v4 = vld [vmem:[#allocation7 + $0x500] sm:$0xff]  ;;  %v1340_v24 = vld [vmem:[#allocation7 + $0x568] sm:$0xff] }
  0xf9   :  { %4473 = vmatpush1.bf16.msra.mxu1 %v5293_v60  ;;  %v1331_v8 = vld [vmem:[#allocation7 + $0x520] sm:$0xff] }
  0xfa   :  { %4474 = vmatprep.subr.bf16.mxu1 %v5302_v61  ;;  %v1311_v61 = vld [vmem:[#allocation7 + $0x480] sm:$0xff]  ;;  %v5388_v19 = vcombine.high %v1327_v4, %v1331_v8 }
  0xfb   :  { %4315 = vmatpush1.bf16.msra.mxu0 %v5315_v37  ;;  %v6063_v37 = vor.u32 %v267_v36, %v266_v35  ;;  %v1344_v35 = vld [vmem:[#allocation7 + $0x588] sm:$0xff] }
  0xfc   :  { %4316 = vmatprep.subr.bf16.mxu0 %v5324_v41  ;;  %v1348_v36 = vld [vmem:[#allocation7 + $0x5a8] sm:$0xff] }
  0xfd   :  { %4475 = vmatpush1.bf16.msra.mxu1 %v5301_v6  ;;  %v273_v41 = vrot.slane %v6063_v37, %v6066_v39  ;;  %v277_v42 = vrot.slane %v6063_v37, %v6069_v40 }
  0xfe   :  { %4476 = vmatprep.subr.bf16.mxu1 %v5310_v7 }
  0xff   :  { %4317 = vmatpush1.bf16.msra.mxu0 %v5323_v46 }
 0x100   :  { %4318 = vmatprep.subr.bf16.mxu0 %v5332_v49 }
 0x101   :  { %4477 = vmatpush1.bf16.msra.mxu1 %v5309_v13  ;;  %v1324_v13 = vld [vmem:[#allocation7 + $0x4e8] sm:$0xff] }
 0x102   :  { %4478 = vmatprep.subr.bf16.mxu1 %v5318_v14 }
 0x103   :  { %4319 = vmatpush1.bf16.msra.mxu0 %v5331_v54  ;;  %v1304_v54 = vld [vmem:[#allocation7 + $0x448] sm:$0xff] }
 0x104   :  { %4320 = vmatprep.subr.bf16.mxu0 %v5340_v57  ;;  %v5366_v60 = vcombine.high %v1304_v54, %v1308_v55  ;;  %v5365_v6 = vcombine.low %v1304_v54, %v1308_v55 }
 0x105   :  { %4479 = vmatpush1.bf16.msra.mxu1 %v5317_v17  ;;  %v5379_v17 = vcombine.low %v1319_v9, %v1323_v11  ;;  %v1367_v9 = vld [vmem:[#allocation7 + $0x640] sm:$0xff] }
 0x106   :  { %4480 = vmatprep.subr.bf16.mxu1 %v5326_v18  ;;  %v1371_v11 = vld [vmem:[#allocation7 + $0x660] sm:$0xff] }
 0x107   :  { %4321 = vmatpush1.bf16.msra.mxu0 %v5339_v62  ;;  %v1315_v62 = vld [vmem:[#allocation7 + $0x4a0] sm:$0xff] }
 0x108   :  { %4322 = vmatprep.subr.bf16.mxu0 %v5348_v5  ;;  %v5363_v5 = vcombine.low %v1303_v51, %v1307_v53  ;;  %v5372_v7 = vcombine.high %v1311_v61, %v1315_v62  ;;  %v5371_v14 = vcombine.low %v1311_v61, %v1315_v62  ;;  %v1352_v51 = vld [vmem:[#allocation7 + $0x5c8] sm:$0xff]  ;;  %v1359_v61 = vld [vmem:[#allocation7 + $0x600] sm:$0xff] }
 0x109   :  { %4481 = vmatpush1.bf16.msra.mxu1 %v5325_v21  ;;  %v1335_v21 = vld [vmem:[#allocation7 + $0x540] sm:$0xff] }
 0x10a   :  { %4482 = vmatprep.subr.bf16.mxu1 %v5334_v22  ;;  %v1339_v22 = vld [vmem:[#allocation7 + $0x560] sm:$0xff] }
 0x10b   :  { %4323 = vmatpush1.bf16.msra.mxu0 %v5347_v2  ;;  %v5374_v2 = vcombine.high %v1312_v63, %v1316_v0  ;;  %v1363_v62 = vld [vmem:[#allocation7 + $0x620] sm:$0xff]  ;;  %v1360_v63 = vld [vmem:[#allocation7 + $0x608] sm:$0xff] }
 0x10c   :  { %4333 = vmatprep.subr.bf16.mxu0 %v5356_v12  ;;  %v1320_v12 = vld [vmem:[#allocation7 + $0x4c8] sm:$0xff] }
 0x10d   :  { %4483 = vmatpush1.bf16.msra.mxu1 %v5333_v25  ;;  %v5382_v3 = vcombine.high %v1320_v12, %v1324_v13  ;;  %v5381_v18 = vcombine.low %v1320_v12, %v1324_v13  ;;  %v285_v25 = vrot.slane %v6063_v37, %v6090_v16  ;;  %v1364_v0 = vld [vmem:[#allocation7 + $0x628] sm:$0xff] }
 0x10e   :  { %4484 = vmatprep.subr.bf16.mxu1 %v5342_v26  ;;  %v5387_v26 = vcombine.low %v1327_v4, %v1331_v8  ;;  %v1368_v12 = vld [vmem:[#allocation7 + $0x648] sm:$0xff]  ;;  %v1375_v4 = vld [vmem:[#allocation7 + $0x680] sm:$0xff] }
 0x10f   :  { %v1372_v13 = vld [vmem:[#allocation7 + $0x668] sm:$0xff]  ;;  %v1379_v8 = vld [vmem:[#allocation7 + $0x6a0] sm:$0xff] }
 0x111   :  { %4485 = vmatpush1.bf16.msra.mxu1 %v5341_v29  ;;  %v5396_v29 = vcombine.high %v1335_v21, %v1339_v22 }
 0x112   :  { %4486 = vmatprep.subr.bf16.mxu1 %v5350_v30  ;;  %v5398_v30 = vcombine.high %v1336_v23, %v1340_v24 }
 0x115   :  { %4487 = vmatpush1.bf16.msra.mxu1 %v5349_v31  ;;  %v1343_v31 = vld [vmem:[#allocation7 + $0x580] sm:$0xff] }
 0x116   :  { %4497 = vmatprep.subr.bf16.mxu1 %v5358_v32  ;;  %v5403_v55 = vcombine.low %v1343_v31, %v1347_v33 }
 0x161   :  { %v1013_v43 = vpop.f32.mrb[0].mxu0 }
 0x162   :  { %v1014_v44 = vadd.f32 %v1013_v43, %v273_v41  ;;  %v1015_v45 = vpop.f32.mrb[1].mxu0 }
 0x163   :  { %v1016_v46 = vadd.f32 %v1015_v45, %v277_v42  ;;  %v1017_v47 = vpop.f32.mrb[2].mxu0  ;;  %v5397_v45 = vcombine.low %v1336_v23, %v1340_v24  ;;  %v1384_v23 = vld [vmem:[#allocation7 + $0x6c8] sm:$0xff] }
 0x164   :  { %vm1143_vm3 = vcmp.gt.f32.partialorder %v1014_v44, 0.0  ;;  %v1151_v48 = vmul.f32 0.01, %v1014_v44  ;;  %v1018_v49 = vpop.f32.mrb[3].mxu0  ;;  %v5404_v47 = vcombine.high %v1343_v31, %v1347_v33  ;;  %v1388_v24 = vld [vmem:[#allocation7 + $0x6e8] sm:$0xff]  ;;  %v1395_v31 = vld [vmem:[#allocation7 + $0x720] sm:$0xff] }
 0x165   :  { %vm1144_vm4 = vcmp.gt.f32.partialorder %v1016_v46, 0.0  ;;  %v1152_v50 = vmul.f32 0.01, %v1016_v46  ;;  %v1351_v49 = vld [vmem:[#allocation7 + $0x5c0] sm:$0xff]  ;;  %v1396_v33 = vld [vmem:[#allocation7 + $0x728] sm:$0xff] }
 0x166   :  { %v1159_v52 = vsel %vm1143_vm3, %v1014_v44, %v1151_v48  ;;  %v5395_v44 = vcombine.low %v1335_v21, %v1339_v22  ;;  %v5406_v48 = vcombine.high %v1344_v35, %v1348_v36  ;;  %v1383_v21 = vld [vmem:[#allocation7 + $0x6c0] sm:$0xff] }
 0x167   :  { %v1160_v56 = vsel %vm1144_vm4, %v1016_v46, %v1152_v50  ;;  %v6077_v58 = vpack.c.bf16 %v1159_v52, %v1159_v52  ;;  %v1355_v50 = vld [vmem:[#allocation7 + $0x5e0] sm:$0xff]  ;;  %v1356_v52 = vld [vmem:[#allocation7 + $0x5e8] sm:$0xff]  ;;  %vm5065_vm4 = vcmask 3072  }
 0x168   :  { %v6075_v57 = vpack.c.bf16 %v1160_v56, %v1160_v56  ;;  %v5405_v56 = vcombine.low %v1344_v35, %v1348_v36  ;;  %v1387_v22 = vld [vmem:[#allocation7 + $0x6e0] sm:$0xff]  ;;  %v5445_v36 = vcombine.low %v1384_v23, %v1388_v24 }
 0x169   :  { %v5443_v35 = vcombine.low %v1383_v21, %v1387_v22 }
 0x16a   :  { %4324 = vmatprep.mubr.bf16.mxu0 %v6075_v57  ;;  %4488 = vmatprep.mubr.bf16.mxu1 %v6075_v57 }
 0x16b   :  { %4325 = vmatmul.mubr.bf16.vlgmr.msra.gmra.mrb[8].mxu0 %v6077_v58  ;;  %4489 = vmatmul.mubr.bf16.vlgmr.msra.gmra.mrb[8].mxu1 %v6077_v58  ;;  %v6094_v28 = vpop.f32.mrb[0].mxu1 }
 0x16c   :  { %4334 = vmatpush1.bf16.msra.mxu0 %v5355_v38  ;;  %4498 = vmatpush1.bf16.msra.mxu1 %v5357_v10  ;;  %v1328_v38 = vld [vmem:[#allocation7 + $0x508] sm:$0xff]  ;;  %v1056_v32 = vpop.f32.mrb[1].mxu1 }
 0x16d   :  { %4335 = vmatprep.subr.bf16.mxu0 %v5364_v59  ;;  %4499 = vmatprep.subr.bf16.mxu1 %v5366_v60  ;;  %v1332_v10 = vld [vmem:[#allocation7 + $0x528] sm:$0xff]  ;;  %v1057_v41 = vadd.f32 %v1056_v32, %v285_v25  ;;  %v1058_v42 = vpop.f32.mrb[2].mxu1  ;;  %v5412_v59 = vcombine.high %v1351_v49, %v1355_v50  ;;  %v5414_v60 = vcombine.high %v1352_v51, %v1356_v52 }
 0x16e   :  { %v5390_v20 = vcombine.high %v1328_v38, %v1332_v10  ;;  %v5389_v27 = vcombine.low %v1328_v38, %v1332_v10  ;;  %v1059_v43 = vpop.f32.mrb[3].mxu1  ;;  %v1376_v38 = vld [vmem:[#allocation7 + $0x688] sm:$0xff]  ;;  %v5435_v25 = vcombine.low %v1375_v4, %v1379_v8 }
 0x16f   :  { %vm1146_vm5 = vcmp.gt.f32.partialorder %v1057_v41, 0.0  ;;  %v1154_v46 = vmul.f32 0.01, %v1057_v41  ;;  %v1380_v10 = vld [vmem:[#allocation7 + $0x6a8] sm:$0xff]  ;;  %v1399_v43 = vld [vmem:[#allocation7 + $0x740] sm:$0xff] }
 0x170   :  { %4336 = vmatpush1.bf16.msra.mxu0 %v5363_v5  ;;  %4500 = vmatpush1.bf16.msra.mxu1 %v5365_v6  ;;  %v5411_v5 = vcombine.low %v1351_v49, %v1355_v50  ;;  %v5413_v6 = vcombine.low %v1352_v51, %v1356_v52  ;;  %v1392_v32 = vld [vmem:[#allocation7 + $0x708] sm:$0xff]  ;;  %v1407_v52 = vld [vmem:[#allocation7 + $0x780] sm:$0xff] }
 0x171   :  { %4337 = vmatprep.subr.bf16.mxu0 %v5372_v7  ;;  %4501 = vmatprep.subr.bf16.mxu1 %v5374_v2  ;;  %v1162_v53 = vsel %vm1146_vm5, %v1057_v41, %v1154_v46  ;;  %v5420_v7 = vcombine.high %v1359_v61, %v1363_v62  ;;  %v5422_v2 = vcombine.high %v1360_v63, %v1364_v0  ;;  %v1400_v46 = vld [vmem:[#allocation7 + $0x748] sm:$0xff] }
 0x172   :  { %v6096_v54 = vpack.c.bf16 %v1162_v53, %v1162_v53  ;;  %v5454_v42 = vcombine.high %v1392_v32, %v1396_v33  ;;  %v5453_v49 = vcombine.low %v1392_v32, %v1396_v33 }
 0x174   :  { %4338 = vmatpush1.bf16.msra.mxu0 %v5371_v14  ;;  %4502 = vmatpush1.bf16.msra.mxu1 %v5373_v15  ;;  %v5419_v14 = vcombine.low %v1359_v61, %v1363_v62  ;;  %v5421_v15 = vcombine.low %v1360_v63, %v1364_v0 }
 0x175   :  { %4339 = vmatprep.subr.bf16.mxu0 %v5380_v1  ;;  %4503 = vmatprep.subr.bf16.mxu1 %v5382_v3  ;;  %v5428_v1 = vcombine.high %v1367_v9, %v1371_v11  ;;  %v5430_v3 = vcombine.high %v1368_v12, %v1372_v13 }
 0x176   :  { %4365 = vmatprep.mubr.bf16.mxu0 %v6096_v54  ;;  %4529 = vmatprep.mubr.bf16.mxu1 %v6096_v54 }
 0x178   :  { %4340 = vmatpush1.bf16.msra.mxu0 %v5379_v17  ;;  %4504 = vmatpush1.bf16.msra.mxu1 %v5381_v18  ;;  %v5427_v17 = vcombine.low %v1367_v9, %v1371_v11  ;;  %v5429_v18 = vcombine.low %v1368_v12, %v1372_v13  ;;  %v1420_v9 = vld [vmem:[#allocation7 + $0x7e8] sm:$0xff] }
 0x179   :  { %4341 = vmatprep.subr.bf16.mxu0 %v5388_v19  ;;  %4505 = vmatprep.subr.bf16.mxu1 %v5390_v20  ;;  %v5436_v19 = vcombine.high %v1375_v4, %v1379_v8  ;;  %v5438_v20 = vcombine.high %v1376_v38, %v1380_v10  ;;  %v1427_v8 = vld [vmem:[#allocation7 + $0x820] sm:$0xff] }
 0x17c   :  { %4342 = vmatpush1.bf16.msra.mxu0 %v5387_v26  ;;  %4506 = vmatpush1.bf16.msra.mxu1 %v5389_v27  ;;  %v5437_v26 = vcombine.low %v1376_v38, %v1380_v10  ;;  %v5444_v27 = vcombine.high %v1383_v21, %v1387_v22  ;;  %v1428_v38 = vld [vmem:[#allocation7 + $0x828] sm:$0xff] }
 0x17d   :  { %4343 = vmatprep.subr.bf16.mxu0 %v5396_v29  ;;  %4507 = vmatprep.subr.bf16.mxu1 %v5398_v30  ;;  %v5446_v29 = vcombine.high %v1384_v23, %v1388_v24  ;;  %v1391_v30 = vld [vmem:[#allocation7 + $0x700] sm:$0xff] }
 0x17e   :  { %v5452_v41 = vcombine.high %v1391_v30, %v1395_v31  ;;  %v1431_v24 = vld [vmem:[#allocation7 + $0x840] sm:$0xff] }
 0x180   :  { %4344 = vmatpush1.bf16.msra.mxu0 %v5395_v44  ;;  %4508 = vmatpush1.bf16.msra.mxu1 %v5397_v45  ;;  %v6101_v44 = vsub.s32 2, %v6061_v34  ;;  %v1403_v45 = vld [vmem:[#allocation7 + $0x760] sm:$0xff] }
 0x181   :  { %4345 = vmatprep.subr.bf16.mxu0 %v5404_v47  ;;  %4509 = vmatprep.subr.bf16.mxu1 %v5406_v48  ;;  %v1404_v47 = vld [vmem:[#allocation7 + $0x768] sm:$0xff]  ;;  %v5451_v48 = vcombine.low %v1391_v30, %v1395_v31  ;;  %v5460_v50 = vcombine.high %v1399_v43, %v1403_v45  ;;  %v5459_v61 = vcombine.low %v1399_v43, %v1403_v45  ;;  %v1443_v43 = vld [vmem:[#allocation7 + $0x8a0] sm:$0xff] }
 0x182   :  { %v5462_v51 = vcombine.high %v1400_v46, %v1404_v47  ;;  %v281_v53 = vrot.slane %v6063_v37, %v6101_v44  ;;  %v5461_v62 = vcombine.low %v1400_v46, %v1404_v47  ;;  %v1436_v30 = vld [vmem:[#allocation7 + $0x868] sm:$0xff] }
 0x183   :  { %v1440_v45 = vld [vmem:[#allocation7 + $0x888] sm:$0xff] }
 0x184   :  { %4346 = vmatpush1.bf16.msra.mxu0 %v5403_v55  ;;  %4510 = vmatpush1.bf16.msra.mxu1 %v5405_v56  ;;  %v1411_v55 = vld [vmem:[#allocation7 + $0x7a0] sm:$0xff]  ;;  %v1408_v56 = vld [vmem:[#allocation7 + $0x788] sm:$0xff] }
 0x185   :  { %4347 = vmatprep.subr.bf16.mxu0 %v5412_v59  ;;  %4511 = vmatprep.subr.bf16.mxu1 %v5414_v60  ;;  %v1412_v59 = vld [vmem:[#allocation7 + $0x7a8] sm:$0xff]  ;;  %v6106_v60 = vsub.s32 5, %v6061_v34  ;;  %v5468_v63 = vcombine.high %v1407_v52, %v1411_v55  ;;  %v5467_v12 = vcombine.low %v1407_v52, %v1411_v55  ;;  %v1447_v52 = vld [vmem:[#allocation7 + $0x8c0] sm:$0xff] }
 0x186   :  { %v5470_v0 = vcombine.high %v1408_v56, %v1412_v59  ;;  %v5469_v13 = vcombine.low %v1408_v56, %v1412_v59  ;;  %v1444_v46 = vld [vmem:[#allocation7 + $0x8a8] sm:$0xff] }
 0x187   :  { %v293_v11 = vrot.slane %v6063_v37, %v6106_v60  ;;  %v1448_v55 = vld [vmem:[#allocation7 + $0x8c8] sm:$0xff] }
 0x188   :  { %4348 = vmatpush1.bf16.msra.mxu0 %v5411_v5  ;;  %4512 = vmatpush1.bf16.msra.mxu1 %v5413_v6  ;;  %v1415_v5 = vld [vmem:[#allocation7 + $0x7c0] sm:$0xff]  ;;  %v1055_v6 = vadd.f32 %v6094_v28, %v281_v53  ;;  %v1424_v28 = vld [vmem:[#allocation7 + $0x808] sm:$0xff] }
 0x189   :  { %4349 = vmatprep.subr.bf16.mxu0 %v5420_v7  ;;  %4513 = vmatprep.subr.bf16.mxu1 %v5422_v2  ;;  %v1419_v7 = vld [vmem:[#allocation7 + $0x7e0] sm:$0xff]  ;;  %v1416_v2 = vld [vmem:[#allocation7 + $0x7c8] sm:$0xff]  ;;  %v5486_v23 = vcombine.high %v1424_v28, %v1428_v38  ;;  %v5485_v33 = vcombine.low %v1424_v28, %v1428_v38 }
 0x18a   :  { %v1153_v4 = vmul.f32 0.01, %v1055_v6  ;;  %vm1145_vm6 = vcmp.gt.f32.partialorder %v1055_v6, 0.0  ;;  %v1451_v53 = vld [vmem:[#allocation7 + $0x8e0] sm:$0xff]  ;;  %v1452_v56 = vld [vmem:[#allocation7 + $0x8e8] sm:$0xff] }
 0x18c   :  { %4350 = vmatpush1.bf16.msra.mxu0 %v5419_v14  ;;  %4514 = vmatpush1.bf16.msra.mxu1 %v5421_v15  ;;  %v5476_v14 = vcombine.high %v1415_v5, %v1419_v7  ;;  %v5478_v15 = vcombine.high %v1416_v2, %v1420_v9 }
 0x18d   :  { %4351 = vmatprep.subr.bf16.mxu0 %v5428_v1  ;;  %4515 = vmatprep.subr.bf16.mxu1 %v5430_v3  ;;  %v1423_v1 = vld [vmem:[#allocation7 + $0x800] sm:$0xff] }
 0x18e   :  { %v5484_v22 = vcombine.high %v1423_v1, %v1427_v8  ;;  %v5483_v32 = vcombine.low %v1423_v1, %v1427_v8  ;;  %v1468_v1 = vld [vmem:[#allocation7 + $0x968] sm:$0xff] }
 0x190   :  { %4352 = vmatpush1.bf16.msra.mxu0 %v5427_v17  ;;  %4516 = vmatpush1.bf16.msra.mxu1 %v5429_v18 }
 0x191   :  { %4353 = vmatprep.subr.bf16.mxu0 %v5436_v19  ;;  %4517 = vmatprep.subr.bf16.mxu1 %v5438_v20  ;;  %v5475_v19 = vcombine.low %v1415_v5, %v1419_v7  ;;  %v5477_v20 = vcombine.low %v1416_v2, %v1420_v9  ;;  %v1459_v5 = vld [vmem:[#allocation7 + $0x920] sm:$0xff]  ;;  %v1460_v7 = vld [vmem:[#allocation7 + $0x928] sm:$0xff]  ;;  %v5507_v2 = vcombine.low %v1447_v52, %v1451_v53 }
 0x192   :  { %v5509_v9 = vcombine.low %v1448_v55, %v1452_v56 }
 0x194   :  { %4354 = vmatpush1.bf16.msra.mxu0 %v5435_v25  ;;  %4518 = vmatpush1.bf16.msra.mxu1 %v5437_v26  ;;  %v1161_v26 = vsel %vm1145_vm6, %v1055_v6, %v1153_v4  ;;  %v1456_v6 = vld [vmem:[#allocation7 + $0x908] sm:$0xff] }
 0x195   :  { %4355 = vmatprep.subr.bf16.mxu0 %v5444_v27  ;;  %4519 = vmatprep.subr.bf16.mxu1 %v5446_v29  ;;  %v1435_v27 = vld [vmem:[#allocation7 + $0x860] sm:$0xff]  ;;  %v1432_v29 = vld [vmem:[#allocation7 + $0x848] sm:$0xff]  ;;  %v5517_v8 = vcombine.low %v1456_v6, %v1460_v7 }
 0x198   :  { %4356 = vmatpush1.bf16.msra.mxu0 %v5443_v35  ;;  %4520 = vmatpush1.bf16.msra.mxu1 %v5445_v36  ;;  %v6113_v35 = vpack.c.bf16 %v1161_v26, %v1161_v26  ;;  %v5492_v36 = vcombine.high %v1431_v24, %v1435_v27 }
 0x199   :  { %4357 = vmatprep.subr.bf16.mxu0 %v5452_v41  ;;  %4521 = vmatprep.subr.bf16.mxu1 %v5454_v42  ;;  %v5494_v41 = vcombine.high %v1432_v29, %v1436_v30  ;;  %v1439_v42 = vld [vmem:[#allocation7 + $0x880] sm:$0xff] }
 0x19a   :  { %v5499_v59 = vcombine.low %v1439_v42, %v1443_v43 }
 0x19c   :  { %4358 = vmatpush1.bf16.msra.mxu0 %v5451_v48  ;;  %4522 = vmatpush1.bf16.msra.mxu1 %v5453_v49  ;;  %v5491_v48 = vcombine.low %v1431_v24, %v1435_v27  ;;  %v5493_v49 = vcombine.low %v1432_v29, %v1436_v30  ;;  %v1479_v29 = vld [vmem:[#allocation7 + $0x9c0] sm:$0xff] }
 0x19d   :  { %4359 = vmatprep.subr.bf16.mxu0 %v5460_v50  ;;  %4523 = vmatprep.subr.bf16.mxu1 %v5462_v51  ;;  %v5500_v50 = vcombine.high %v1439_v42, %v1443_v43  ;;  %v5502_v51 = vcombine.high %v1440_v45, %v1444_v46  ;;  %v1483_v30 = vld [vmem:[#allocation7 + $0x9e0] sm:$0xff] }
 0x19e   :  { %v1487_v43 = vld [vmem:[#allocation7 + $0xa00] sm:$0xff] }
 0x1a0   :  { %4360 = vmatpush1.bf16.msra.mxu0 %v5459_v61  ;;  %4524 = vmatpush1.bf16.msra.mxu1 %v5461_v62  ;;  %v5501_v61 = vcombine.low %v1440_v45, %v1444_v46  ;;  %v5508_v62 = vcombine.high %v1447_v52, %v1451_v53  ;;  %v1491_v45 = vld [vmem:[#allocation7 + $0xa20] sm:$0xff]  ;;  %v1488_v46 = vld [vmem:[#allocation7 + $0xa08] sm:$0xff] }
 0x1a1   :  { %4361 = vmatprep.subr.bf16.mxu0 %v5468_v63  ;;  %4525 = vmatprep.subr.bf16.mxu1 %v5470_v0  ;;  %v6111_v3 = vpop.f32.mrb[4].mxu0  ;;  %v5510_v63 = vcombine.high %v1448_v55, %v1452_v56  ;;  %v1455_v0 = vld [vmem:[#allocation7 + $0x900] sm:$0xff]  ;;  %v1496_v56 = vld [vmem:[#allocation7 + $0xa48] sm:$0xff] }
 0x1a2   :  { %v1097_v10 = vpop.f32.mrb[5].mxu0  ;;  %v5515_v4 = vcombine.low %v1455_v0, %v1459_v5  ;;  %v1495_v53 = vld [vmem:[#allocation7 + $0xa40] sm:$0xff] }
 0x1a3   :  { %v1098_v17 = vadd.f32 %v1097_v10, %v293_v11  ;;  %v1099_v18 = vpop.f32.mrb[6].mxu0  ;;  %v5516_v11 = vcombine.high %v1455_v0, %v1459_v5  ;;  %v1499_v55 = vld [vmem:[#allocation7 + $0xa60] sm:$0xff] }
 0x1a4   :  { %4362 = vmatpush1.bf16.msra.mxu0 %v5467_v12  ;;  %4526 = vmatpush1.bf16.msra.mxu1 %v5469_v13  ;;  %v1100_v21 = vpop.f32.mrb[7].mxu0  ;;  %v5518_v12 = vcombine.high %v1456_v6, %v1460_v7  ;;  %v1463_v13 = vld [vmem:[#allocation7 + $0x940] sm:$0xff]  ;;  %v1504_v7 = vld [vmem:[#allocation7 + $0xa88] sm:$0xff] }
 0x1a5   :  { %4363 = vmatprep.subr.bf16.mxu0 %v5476_v14  ;;  %4527 = vmatprep.subr.bf16.mxu1 %v5478_v15  ;;  %vm1148_vm7 = vcmp.gt.f32.partialorder %v1098_v17, 0.0  ;;  %v1156_v25 = vmul.f32 0.01, %v1098_v17  ;;  %v1467_v14 = vld [vmem:[#allocation7 + $0x960] sm:$0xff]  ;;  %v1464_v15 = vld [vmem:[#allocation7 + $0x948] sm:$0xff] }
 0x1a6   :  { %v5524_v38 = vcombine.high %v1463_v13, %v1467_v14  ;;  %v5526_v10 = vcombine.high %v1464_v15, %v1468_v1  ;;  %v1476_v21 = vld [vmem:[#allocation7 + $0x9a8] sm:$0xff]  ;;  %v5523_v24 = vcombine.low %v1463_v13, %v1467_v14  ;;  %v1503_v5 = vld [vmem:[#allocation7 + $0xa80] sm:$0xff] }
 0x1a7   :  { %v1164_v31 = vsel %vm1148_vm7, %v1098_v17, %v1156_v25  ;;  %v1471_v17 = vld [vmem:[#allocation7 + $0x980] sm:$0xff]  ;;  %v5525_v25 = vcombine.low %v1464_v15, %v1468_v1  ;;  %v1512_v1 = vld [vmem:[#allocation7 + $0xac8] sm:$0xff] }
 0x1a8   :  { %4364 = vmatpush1.bf16.msra.mxu0 %v5475_v19  ;;  %4528 = vmatpush1.bf16.msra.mxu1 %v5477_v20  ;;  %v6115_v47 = vpack.c.bf16 %v1164_v31, %v1164_v31  ;;  %v1475_v19 = vld [vmem:[#allocation7 + $0x9a0] sm:$0xff]  ;;  %v1472_v20 = vld [vmem:[#allocation7 + $0x988] sm:$0xff] }
 0x1a9   :  { %4374 = vmatprep.subr.bf16.mxu0 %v5484_v22  ;;  %4538 = vmatprep.subr.bf16.mxu1 %v5486_v23  ;;  %v5532_v26 = vcombine.high %v1471_v17, %v1475_v19  ;;  %v5534_v27 = vcombine.high %v1472_v20, %v1476_v21  ;;  %v1480_v31 = vld [vmem:[#allocation7 + $0x9c8] sm:$0xff]  ;;  %v1507_v6 = vld [vmem:[#allocation7 + $0xaa0] sm:$0xff] }
 0x1aa   :  { %v1511_v14 = vld [vmem:[#allocation7 + $0xac0] sm:$0xff] }
 0x1ab   :  { %4366 = vmatmul.mubr.bf16.vlgmr.msra.gmra.mrb[8].mxu0 %v6113_v35  ;;  %4530 = vmatmul.mubr.bf16.vlgmr.msra.gmra.mrb[8].mxu1 %v6113_v35  ;;  %v6121_v28 = vpop.f32.mrb[4].mxu1  ;;  %v1515_v15 = vld [vmem:[#allocation7 + $0xae0] sm:$0xff] }
 0x1ac   :  { %4375 = vmatpush1.bf16.msra.mxu0 %v5483_v32  ;;  %4539 = vmatpush1.bf16.msra.mxu1 %v5485_v33  ;;  %v6123_v18 = vpop.f32.mrb[5].mxu1  ;;  %v1484_v32 = vld [vmem:[#allocation7 + $0x9e8] sm:$0xff]  ;;  %v5531_v33 = vcombine.low %v1471_v17, %v1475_v19  ;;  %v1519_v19 = vld [vmem:[#allocation7 + $0xb00] sm:$0xff] }
 0x1ad   :  { %4376 = vmatprep.subr.bf16.mxu0 %v5492_v36  ;;  %4540 = vmatprep.subr.bf16.mxu1 %v5494_v41  ;;  %v1140_v22 = vpop.f32.mrb[6].mxu1  ;;  %v5533_v36 = vcombine.low %v1472_v20, %v1476_v21  ;;  %v5540_v41 = vcombine.high %v1479_v29, %v1483_v30  ;;  %v5542_v42 = vcombine.high %v1480_v31, %v1484_v32  ;;  %v1523_v20 = vld [vmem:[#allocation7 + $0xb20] sm:$0xff]  ;;  %v1520_v21 = vld [vmem:[#allocation7 + $0xb08] sm:$0xff] }
 0x1ae   :  { %4406 = vmatprep.mubr.bf16.mxu0 %v6115_v47  ;;  %4570 = vmatprep.mubr.bf16.mxu1 %v6115_v47  ;;  %v1141_v23 = vpop.f32.mrb[7].mxu1  ;;  %v1524_v22 = vld [vmem:[#allocation7 + $0xb28] sm:$0xff] }
 0x1af   :  { %v5571_v23 = vcombine.low %v1511_v14, %v1515_v15 }
 0x1b0   :  { %4377 = vmatpush1.bf16.msra.mxu0 %v5491_v48  ;;  %4541 = vmatpush1.bf16.msra.mxu1 %v5493_v49  ;;  %v1492_v48 = vld [vmem:[#allocation7 + $0xa28] sm:$0xff]  ;;  %v5539_v49 = vcombine.low %v1479_v29, %v1483_v30  ;;  %v6126_v29 = vsub.s32 4, %v6061_v34  ;;  %v1531_v30 = vld [vmem:[#allocation7 + $0xb60] sm:$0xff] }
 0x1b1   :  { %4378 = vmatprep.subr.bf16.mxu0 %v5500_v50  ;;  %4542 = vmatprep.subr.bf16.mxu1 %v5502_v51  ;;  %v5541_v50 = vcombine.low %v1480_v31, %v1484_v32  ;;  %v5548_v51 = vcombine.high %v1487_v43, %v1491_v45  ;;  %v5550_v52 = vcombine.high %v1488_v46, %v1492_v48  ;;  %v1528_v31 = vld [vmem:[#allocation7 + $0xb48] sm:$0xff] }
 0x1b2   :  { %v1532_v32 = vld [vmem:[#allocation7 + $0xb68] sm:$0xff] }
 0x1b4   :  { %4379 = vmatpush1.bf16.msra.mxu0 %v5499_v59  ;;  %4543 = vmatpush1.bf16.msra.mxu1 %v5501_v61  ;;  %v1500_v59 = vld [vmem:[#allocation7 + $0xa68] sm:$0xff]  ;;  %v5547_v61 = vcombine.low %v1487_v43, %v1491_v45  ;;  %v5590_v43 = vcombine.high %v1528_v31, %v1532_v32  ;;  %v1535_v45 = vld [vmem:[#allocation7 + $0xb80] sm:$0xff] }
 0x1b5   :  { %4380 = vmatprep.subr.bf16.mxu0 %v5508_v62  ;;  %4544 = vmatprep.subr.bf16.mxu1 %v5510_v63  ;;  %v5549_v62 = vcombine.low %v1488_v46, %v1492_v48  ;;  %v5556_v63 = vcombine.high %v1495_v53, %v1499_v55  ;;  %v5558_v0 = vcombine.high %v1496_v56, %v1500_v59  ;;  %v1539_v48 = vld [vmem:[#allocation7 + $0xba0] sm:$0xff] }
 0x1b6   :  { %v289_v46 = vrot.slane %v6063_v37, %v6126_v29 }
 0x1b8   :  { %4381 = vmatpush1.bf16.msra.mxu0 %v5507_v2  ;;  %4545 = vmatpush1.bf16.msra.mxu1 %v5509_v9  ;;  %v1508_v2 = vld [vmem:[#allocation7 + $0xaa8] sm:$0xff]  ;;  %v5555_v9 = vcombine.low %v1495_v53, %v1499_v55  ;;  %v5589_v53 = vcombine.low %v1528_v31, %v1532_v32  ;;  %v5596_v55 = vcombine.high %v1535_v45, %v1539_v48 }
 0x1b9   :  { %4382 = vmatprep.subr.bf16.mxu0 %v5516_v11  ;;  %4546 = vmatprep.subr.bf16.mxu1 %v5518_v12  ;;  %v5557_v11 = vcombine.low %v1496_v56, %v1500_v59  ;;  %v5564_v12 = vcombine.high %v1503_v5, %v1507_v6  ;;  %v5566_v13 = vcombine.high %v1504_v7, %v1508_v2  ;;  %v1543_v59 = vld [vmem:[#allocation7 + $0xbc0] sm:$0xff]  ;;  %v1568_v31 = vld [vmem:[#allocation7 + $0xc88] sm:$0xff] }
 0x1ba   :  { %v1572_v32 = vld [vmem:[#allocation7 + $0xca8] sm:$0xff] }
 0x1bc   :  { %4383 = vmatpush1.bf16.msra.mxu0 %v5515_v4  ;;  %4547 = vmatpush1.bf16.msra.mxu1 %v5517_v8  ;;  %v1516_v4 = vld [vmem:[#allocation7 + $0xae8] sm:$0xff]  ;;  %v5563_v8 = vcombine.low %v1503_v5, %v1507_v6  ;;  %v5595_v6 = vcombine.low %v1535_v45, %v1539_v48  ;;  %v5630_v45 = vcombine.high %v1568_v31, %v1572_v32  ;;  %v1579_v48 = vld [vmem:[#allocation7 + $0xce0] sm:$0xff] }
 0x1bd   :  { %4384 = vmatprep.subr.bf16.mxu0 %v5524_v38  ;;  %4548 = vmatprep.subr.bf16.mxu1 %v5526_v10  ;;  %v5565_v38 = vcombine.low %v1504_v7, %v1508_v2  ;;  %v5572_v10 = vcombine.high %v1511_v14, %v1515_v15  ;;  %v5574_v17 = vcombine.high %v1512_v1, %v1516_v4  ;;  %v1552_v14 = vld [vmem:[#allocation7 + $0xc08] sm:$0xff] }
 0x1be   :  { %v1556_v15 = vld [vmem:[#allocation7 + $0xc28] sm:$0xff] }
 0x1c0   :  { %4385 = vmatpush1.bf16.msra.mxu0 %v5523_v24  ;;  %4549 = vmatpush1.bf16.msra.mxu1 %v5525_v25  ;;  %v5573_v24 = vcombine.low %v1512_v1, %v1516_v4  ;;  %v5580_v25 = vcombine.high %v1519_v19, %v1523_v20 }
 0x1c1   :  { %4386 = vmatprep.subr.bf16.mxu0 %v5532_v26  ;;  %4550 = vmatprep.subr.bf16.mxu1 %v5534_v27  ;;  %v5582_v26 = vcombine.high %v1520_v21, %v1524_v22  ;;  %v1527_v27 = vld [vmem:[#allocation7 + $0xb40] sm:$0xff] }
 0x1c4   :  { %4387 = vmatpush1.bf16.msra.mxu0 %v5531_v33  ;;  %4551 = vmatpush1.bf16.msra.mxu1 %v5533_v36  ;;  %v6129_v33 = vsub.s32 7, %v6061_v34  ;;  %v5579_v36 = vcombine.low %v1519_v19, %v1523_v20  ;;  %v1560_v19 = vld [vmem:[#allocation7 + $0xc48] sm:$0xff] }
 0x1c5   :  { %4388 = vmatprep.subr.bf16.mxu0 %v5540_v41  ;;  %4552 = vmatprep.subr.bf16.mxu1 %v5542_v42  ;;  %v5581_v41 = vcombine.low %v1520_v21, %v1524_v22  ;;  %v5588_v42 = vcombine.high %v1527_v27, %v1531_v30  ;;  %v1564_v20 = vld [vmem:[#allocation7 + $0xc68] sm:$0xff] }
 0x1c8   :  { %4389 = vmatpush1.bf16.msra.mxu0 %v5539_v49  ;;  %4553 = vmatpush1.bf16.msra.mxu1 %v5541_v50  ;;  %v1536_v49 = vld [vmem:[#allocation7 + $0xb88] sm:$0xff] }
 0x1c9   :  { %4390 = vmatprep.subr.bf16.mxu0 %v5548_v51  ;;  %4554 = vmatprep.subr.bf16.mxu1 %v5550_v52  ;;  %v1540_v50 = vld [vmem:[#allocation7 + $0xba8] sm:$0xff]  ;;  %v301_v51 = vrot.slane %v6063_v37, %v6129_v33  ;;  %v5587_v52 = vcombine.low %v1527_v27, %v1531_v30  ;;  %v1567_v27 = vld [vmem:[#allocation7 + $0xc80] sm:$0xff] }
 0x1ca   :  { %v5598_v56 = vcombine.high %v1536_v49, %v1540_v50  ;;  %v5597_v7 = vcombine.low %v1536_v49, %v1540_v50  ;;  %v1571_v30 = vld [vmem:[#allocation7 + $0xca0] sm:$0xff]  ;;  %v1576_v49 = vld [vmem:[#allocation7 + $0xcc8] sm:$0xff] }
 0x1cb   :  { %v1139_v5 = vadd.f32 %v6123_v18, %v301_v51  ;;  %v1580_v50 = vld [vmem:[#allocation7 + $0xce8] sm:$0xff]  ;;  %v5627_v51 = vcombine.low %v1567_v27, %v1571_v30 }
 0x1cc   :  { %4391 = vmatpush1.bf16.msra.mxu0 %v5547_v61  ;;  %4555 = vmatpush1.bf16.msra.mxu1 %v5549_v62  ;;  %v1096_v61 = vadd.f32 %v6111_v3, %v289_v46  ;;  %v1547_v62 = vld [vmem:[#allocation7 + $0xbe0] sm:$0xff] }
 0x1cd   :  { %4392 = vmatprep.subr.bf16.mxu0 %v5556_v63  ;;  %4556 = vmatprep.subr.bf16.mxu1 %v5558_v0  ;;  %v1544_v63 = vld [vmem:[#allocation7 + $0xbc8] sm:$0xff]  ;;  %v5604_v2 = vcombine.high %v1543_v59, %v1547_v62  ;;  %v1158_v3 = vmul.f32 0.01, %v1139_v5  ;;  %v5603_v1 = vcombine.low %v1543_v59, %v1547_v62  ;;  %vm1150_vm9 = vcmp.gt.f32.partialorder %v1139_v5, 0.0  ;;  %v1575_v46 = vld [vmem:[#allocation7 + $0xcc0] sm:$0xff] }
 0x1ce   :  { %v1548_v0 = vld [vmem:[#allocation7 + $0xbe8] sm:$0xff]  ;;  %vm1147_vm8 = vcmp.gt.f32.partialorder %v1096_v61, 0.0  ;;  %v1587_v59 = vld [vmem:[#allocation7 + $0xd20] sm:$0xff] }
 0x1cf   :  { %v5605_v4 = vcombine.low %v1544_v63, %v1548_v0  ;;  %v1166_v21 = vsel %vm1150_vm9, %v1139_v5, %v1158_v3  ;;  %v1588_v62 = vld [vmem:[#allocation7 + $0xd28] sm:$0xff]  ;;  %v1599_v3 = vld [vmem:[#allocation7 + $0xd80] sm:$0xff] }
 0x1d0   :  { %4393 = vmatpush1.bf16.msra.mxu0 %v5555_v9  ;;  %4557 = vmatpush1.bf16.msra.mxu1 %v5557_v11  ;;  %v5606_v9 = vcombine.high %v1544_v63, %v1548_v0  ;;  %v1551_v11 = vld [vmem:[#allocation7 + $0xc00] sm:$0xff]  ;;  %v5635_v63 = vcombine.low %v1575_v46, %v1579_v48  ;;  %v5637_v0 = vcombine.low %v1576_v49, %v1580_v50 }
 0x1d1   :  { %4394 = vmatprep.subr.bf16.mxu0 %v5564_v12  ;;  %4558 = vmatprep.subr.bf16.mxu1 %v5566_v13  ;;  %v1155_v12 = vmul.f32 0.01, %v1096_v61  ;;  %v1555_v13 = vld [vmem:[#allocation7 + $0xc20] sm:$0xff] }
 0x1d2   :  { %v5612_v18 = vcombine.high %v1551_v11, %v1555_v13  ;;  %v5611_v22 = vcombine.low %v1551_v11, %v1555_v13  ;;  %v1596_v11 = vld [vmem:[#allocation7 + $0xd68] sm:$0xff] }
 0x1d4   :  { %4395 = vmatpush1.bf16.msra.mxu0 %v5563_v8  ;;  %4559 = vmatpush1.bf16.msra.mxu1 %v5565_v38  ;;  %v5614_v8 = vcombine.high %v1552_v14, %v1556_v15  ;;  %v1559_v38 = vld [vmem:[#allocation7 + $0xc40] sm:$0xff] }
 0x1d5   :  { %4396 = vmatprep.subr.bf16.mxu0 %v5572_v10  ;;  %4560 = vmatprep.subr.bf16.mxu1 %v5574_v17  ;;  %v1163_v10 = vsel %vm1147_vm8, %v1096_v61, %v1155_v12  ;;  %v1563_v17 = vld [vmem:[#allocation7 + $0xc60] sm:$0xff]  ;;  %v1584_v61 = vld [vmem:[#allocation7 + $0xd08] sm:$0xff] }
 0x1d6   :  { %v5645_v13 = vcombine.low %v1584_v61, %v1588_v62 }
 0x1d8   :  { %4397 = vmatpush1.bf16.msra.mxu0 %v5571_v23  ;;  %4561 = vmatpush1.bf16.msra.mxu1 %v5573_v24  ;;  %v5613_v23 = vcombine.low %v1552_v14, %v1556_v15  ;;  %v6137_v24 = vpack.c.bf16 %v1163_v10, %v1163_v10 }
 0x1d9   :  { %4398 = vmatprep.subr.bf16.mxu0 %v5580_v25  ;;  %4562 = vmatprep.subr.bf16.mxu1 %v5582_v26  ;;  %v5620_v25 = vcombine.high %v1559_v38, %v1563_v17  ;;  %v5622_v26 = vcombine.high %v1560_v19, %v1564_v20 }
 0x1dc   :  { %4399 = vmatpush1.bf16.msra.mxu0 %v5579_v36  ;;  %4563 = vmatpush1.bf16.msra.mxu1 %v5581_v41  ;;  %v6139_v36 = vpack.c.bf16 %v1166_v21, %v1166_v21  ;;  %v5619_v41 = vcombine.low %v1559_v38, %v1563_v17  ;;  %v1608_v21 = vld [vmem:[#allocation7 + $0xdc8] sm:$0xff] }
 0x1dd   :  { %4400 = vmatprep.subr.bf16.mxu0 %v5588_v42  ;;  %4564 = vmatprep.subr.bf16.mxu1 %v5590_v43  ;;  %v5621_v42 = vcombine.low %v1560_v19, %v1564_v20  ;;  %v5628_v43 = vcombine.high %v1567_v27, %v1571_v30  ;;  %v1607_v19 = vld [vmem:[#allocation7 + $0xdc0] sm:$0xff] }
 0x1de   :  { %v1611_v20 = vld [vmem:[#allocation7 + $0xde0] sm:$0xff] }
 0x1df   :  { %v1615_v30 = vld [vmem:[#allocation7 + $0xe00] sm:$0xff] }
 0x1e0   :  { %4401 = vmatpush1.bf16.msra.mxu0 %v5587_v52  ;;  %4565 = vmatpush1.bf16.msra.mxu1 %v5589_v53  ;;  %v5629_v52 = vcombine.low %v1568_v31, %v1572_v32  ;;  %v5636_v53 = vcombine.high %v1575_v46, %v1579_v48  ;;  %v1619_v31 = vld [vmem:[#allocation7 + $0xe20] sm:$0xff]  ;;  %v1616_v32 = vld [vmem:[#allocation7 + $0xe08] sm:$0xff] }
 0x1e1   :  { %4402 = vmatprep.subr.bf16.mxu0 %v5596_v55  ;;  %4566 = vmatprep.subr.bf16.mxu1 %v5598_v56  ;;  %v5638_v55 = vcombine.high %v1576_v49, %v1580_v50  ;;  %v1583_v56 = vld [vmem:[#allocation7 + $0xd00] sm:$0xff]  ;;  %v1624_v50 = vld [vmem:[#allocation7 + $0xe48] sm:$0xff] }
 0x1e2   :  { %v5644_v5 = vcombine.high %v1583_v56, %v1587_v59  ;;  %v5643_v12 = vcombine.low %v1583_v56, %v1587_v59  ;;  %v1623_v48 = vld [vmem:[#allocation7 + $0xe40] sm:$0xff] }
 0x1e3   :  { %v1627_v49 = vld [vmem:[#allocation7 + $0xe60] sm:$0xff] }
 0x1e4   :  { %4403 = vmatpush1.bf16.msra.mxu0 %v5595_v6  ;;  %4567 = vmatpush1.bf16.msra.mxu1 %v5597_v7  ;;  %v5646_v6 = vcombine.high %v1584_v61, %v1588_v62  ;;  %v1591_v7 = vld [vmem:[#allocation7 + $0xd40] sm:$0xff]  ;;  %v1632_v62 = vld [vmem:[#allocation7 + $0xe88] sm:$0xff] }
 0x1e5   :  { %4404 = vmatprep.subr.bf16.mxu0 %v5604_v2  ;;  %4568 = vmatprep.subr.bf16.mxu1 %v5606_v9  ;;  %v1595_v2 = vld [vmem:[#allocation7 + $0xd60] sm:$0xff]  ;;  %v1592_v9 = vld [vmem:[#allocation7 + $0xd48] sm:$0xff] }
 0x1e6   :  { %v5652_v14 = vcombine.high %v1591_v7, %v1595_v2  ;;  %v5654_v15 = vcombine.high %v1592_v9, %v1596_v11  ;;  %v5653_v38 = vcombine.low %v1592_v9, %v1596_v11  ;;  %v1631_v59 = vld [vmem:[#allocation7 + $0xe80] sm:$0xff]  ;;  %v1640_v11 = vld [vmem:[#allocation7 + $0xec8] sm:$0xff] }
 0x1e7   :  { %v1635_v61 = vld [vmem:[#allocation7 + $0xea0] sm:$0xff] }
 0x1e8   :  { %4405 = vmatpush1.bf16.msra.mxu0 %v5603_v1  ;;  %4569 = vmatpush1.bf16.msra.mxu1 %v5605_v4  ;;  %v1603_v1 = vld [vmem:[#allocation7 + $0xda0] sm:$0xff]  ;;  %v1600_v4 = vld [vmem:[#allocation7 + $0xd88] sm:$0xff] }
 0x1e9   :  { %4415 = vmatprep.subr.bf16.mxu0 %v5612_v18  ;;  %4579 = vmatprep.subr.bf16.mxu1 %v5614_v8  ;;  %v1604_v18 = vld [vmem:[#allocation7 + $0xda8] sm:$0xff]  ;;  %v5651_v8 = vcombine.low %v1591_v7, %v1595_v2  ;;  %v5660_v10 = vcombine.high %v1599_v3, %v1603_v1  ;;  %v1639_v2 = vld [vmem:[#allocation7 + $0xec0] sm:$0xff] }
 0x1ea   :  { %v5662_v17 = vcombine.high %v1600_v4, %v1604_v18  ;;  %v1643_v9 = vld [vmem:[#allocation7 + $0xee0] sm:$0xff] }
 0x1eb   :  { %4407 = vmatmul.mubr.bf16.vlgmr.msra.gmra.mrb[8].mxu0 %v6137_v24  ;;  %4571 = vmatmul.mubr.bf16.vlgmr.msra.gmra.mrb[8].mxu1 %v6137_v24 }
 0x1ec   :  { %4416 = vmatpush1.bf16.msra.mxu0 %v5611_v22  ;;  %4580 = vmatpush1.bf16.msra.mxu1 %v5613_v23  ;;  %v1612_v22 = vld [vmem:[#allocation7 + $0xde8] sm:$0xff]  ;;  %v5659_v23 = vcombine.low %v1599_v3, %v1603_v1  ;;  %v1647_v1 = vld [vmem:[#allocation7 + $0xf00] sm:$0xff] }
 0x1ed   :  { %4417 = vmatprep.subr.bf16.mxu0 %v5620_v25  ;;  %4581 = vmatprep.subr.bf16.mxu1 %v5622_v26  ;;  %v5661_v25 = vcombine.low %v1600_v4, %v1604_v18  ;;  %v5668_v26 = vcombine.high %v1607_v19, %v1611_v20  ;;  %v5670_v27 = vcombine.high %v1608_v21, %v1612_v22  ;;  %v1651_v4 = vld [vmem:[#allocation7 + $0xf20] sm:$0xff]  ;;  %v1648_v18 = vld [vmem:[#allocation7 + $0xf08] sm:$0xff] }
 0x1ee   :  { %4447 = vmatprep.mubr.bf16.mxu0 %v6139_v36  ;;  %4611 = vmatprep.mubr.bf16.mxu1 %v6139_v36 }
 0x1f0   :  { %4418 = vmatpush1.bf16.msra.mxu0 %v5619_v41  ;;  %4582 = vmatpush1.bf16.msra.mxu1 %v5621_v42  ;;  %v1620_v41 = vld [vmem:[#allocation7 + $0xe28] sm:$0xff]  ;;  %v5667_v42 = vcombine.low %v1607_v19, %v1611_v20  ;;  %v1655_v20 = vld [vmem:[#allocation7 + $0xf40] sm:$0xff] }
 0x1f1   :  { %4419 = vmatprep.subr.bf16.mxu0 %v5628_v43  ;;  %4583 = vmatprep.subr.bf16.mxu1 %v5630_v45  ;;  %v5669_v43 = vcombine.low %v1608_v21, %v1612_v22  ;;  %v5676_v45 = vcombine.high %v1615_v30, %v1619_v31  ;;  %v5678_v46 = vcombine.high %v1616_v32, %v1620_v41  ;;  %v6146_v21 = vsub.s32 6, %v6061_v34  ;;  %v1659_v22 = vld [vmem:[#allocation7 + $0xf60] sm:$0xff] }
 0x1f2   :  { %v5715_v34 = vcombine.low %v1655_v20, %v1659_v22 }
 0x1f4   :  { %4420 = vmatpush1.bf16.msra.mxu0 %v5627_v51  ;;  %4584 = vmatpush1.bf16.msra.mxu1 %v5629_v52  ;;  %v1628_v51 = vld [vmem:[#allocation7 + $0xe68] sm:$0xff]  ;;  %v5675_v52 = vcombine.low %v1615_v30, %v1619_v31  ;;  %v5716_v30 = vcombine.high %v1655_v20, %v1659_v22 }
 0x1f5   :  { %4421 = vmatprep.subr.bf16.mxu0 %v5636_v53  ;;  %4585 = vmatprep.subr.bf16.mxu1 %v5638_v55  ;;  %v5677_v53 = vcombine.low %v1616_v32, %v1620_v41  ;;  %v5684_v55 = vcombine.high %v1623_v48, %v1627_v49  ;;  %v5686_v56 = vcombine.high %v1624_v50, %v1628_v51  ;;  %v1663_v32 = vld [vmem:[#allocation7 + $0xf80] sm:$0xff] }
 0x1f6   :  { %v297_v41 = vrot.slane %v6063_v37, %v6146_v21 }
 0x1f8   :  { %4422 = vmatpush1.bf16.msra.mxu0 %v5635_v63  ;;  %4586 = vmatpush1.bf16.msra.mxu1 %v5637_v0  ;;  %v1636_v63 = vld [vmem:[#allocation7 + $0xea8] sm:$0xff]  ;;  %v5683_v0 = vcombine.low %v1623_v48, %v1627_v49 }
 0x1f9   :  { %4423 = vmatprep.subr.bf16.mxu0 %v5644_v5  ;;  %4587 = vmatprep.subr.bf16.mxu1 %v5646_v6  ;;  %v5685_v5 = vcombine.low %v1624_v50, %v1628_v51  ;;  %v5692_v6 = vcombine.high %v1631_v59, %v1635_v61  ;;  %v5694_v7 = vcombine.high %v1632_v62, %v1636_v63  ;;  %v1671_v50 = vld [vmem:[#allocation7 + $0xfc0] sm:$0xff] }
 0x1fa   :  { %v1137_v51 = vadd.f32 %v6121_v28, %v297_v41 }
 0x1fc   :  { %4424 = vmatpush1.bf16.msra.mxu0 %v5643_v12  ;;  %4588 = vmatpush1.bf16.msra.mxu1 %v5645_v13  ;;  %v1644_v12 = vld [vmem:[#allocation7 + $0xee8] sm:$0xff]  ;;  %v5691_v13 = vcombine.low %v1631_v59, %v1635_v61  ;;  %vm1149_vm10 = vcmp.gt.f32.partialorder %v1137_v51, 0.0 }
 0x1fd   :  { %4425 = vmatprep.subr.bf16.mxu0 %v5652_v14  ;;  %4589 = vmatprep.subr.bf16.mxu1 %v5654_v15  ;;  %v5693_v14 = vcombine.low %v1632_v62, %v1636_v63  ;;  %v5700_v15 = vcombine.high %v1639_v2, %v1643_v9  ;;  %v5702_v3 = vcombine.high %v1640_v11, %v1644_v12  ;;  %v1169_v62 = vld [vmem:[#allocation7 + $0x10] sm:$0xff]  ;;  %v1157_v63 = vmul.f32 0.01, %v1137_v51 }
 0x200   :  { %4426 = vmatpush1.bf16.msra.mxu0 %v5651_v8  ;;  %4590 = vmatpush1.bf16.msra.mxu1 %v5653_v38  ;;  %v1652_v8 = vld [vmem:[#allocation7 + $0xf28] sm:$0xff]  ;;  %v5699_v38 = vcombine.low %v1639_v2, %v1643_v9 }
 0x201   :  { %4427 = vmatprep.subr.bf16.mxu0 %v5660_v10  ;;  %4591 = vmatprep.subr.bf16.mxu1 %v5662_v17  ;;  %v5701_v10 = vcombine.low %v1640_v11, %v1644_v12  ;;  %v5708_v17 = vcombine.high %v1647_v1, %v1651_v4  ;;  %v5710_v19 = vcombine.high %v1648_v18, %v1652_v8  ;;  %v1177_v12 = vld [vmem:[#allocation7 + $0x50] sm:$0xff] }
 0x202   :  { %v1165_v11 = vsel %vm1149_vm10, %v1137_v51, %v1157_v63  ;;  %v1217_v63 = vld [vmem:[#allocation7 + $0x190] sm:$0xff] }
 0x204   :  { %4428 = vmatpush1.bf16.msra.mxu0 %v5659_v23  ;;  %4592 = vmatpush1.bf16.msra.mxu1 %v5661_v25  ;;  %v1656_v23 = vld [vmem:[#allocation7 + $0xf48] sm:$0xff] }
 0x205   :  { %4429 = vmatprep.subr.bf16.mxu0 %v5668_v26  ;;  %4593 = vmatprep.subr.bf16.mxu1 %v5670_v27  ;;  %v1660_v25 = vld [vmem:[#allocation7 + $0xf68] sm:$0xff]  ;;  %v5707_v26 = vcombine.low %v1647_v1, %v1651_v4  ;;  %v5709_v27 = vcombine.low %v1648_v18, %v1652_v8  ;;  %v6151_v1 = vpack.c.bf16 %v1165_v11, %v1165_v11  ;;  %v1225_v11 = vld [vmem:[#allocation7 + $0x1d0] sm:$0xff] }
 0x206   :  { %v5718_v31 = vcombine.high %v1656_v23, %v1660_v25 }
 0x208   :  { %4430 = vmatpush1.bf16.msra.mxu0 %v5667_v42  ;;  %4594 = vmatpush1.bf16.msra.mxu1 %v5669_v43  ;;  %v1667_v42 = vld [vmem:[#allocation7 + $0xfa0] sm:$0xff]  ;;  %v1664_v43 = vld [vmem:[#allocation7 + $0xf88] sm:$0xff] }
 0x209   :  { %4431 = vmatprep.subr.bf16.mxu0 %v5676_v45  ;;  %4595 = vmatprep.subr.bf16.mxu1 %v5678_v46  ;;  %v1668_v45 = vld [vmem:[#allocation7 + $0xfa8] sm:$0xff]  ;;  %v5717_v46 = vcombine.low %v1656_v23, %v1660_v25  ;;  %v5724_v48 = vcombine.high %v1663_v32, %v1667_v42  ;;  %v5723_v37 = vcombine.low %v1663_v32, %v1667_v42 }
 0x20a   :  { %v5726_v49 = vcombine.high %v1664_v43, %v1668_v45 }
 0x20c   :  { %4432 = vmatpush1.bf16.msra.mxu0 %v5675_v52  ;;  %4596 = vmatpush1.bf16.msra.mxu1 %v5677_v53  ;;  %v1675_v52 = vld [vmem:[#allocation7 + $0xfe0] sm:$0xff]  ;;  %v1672_v53 = vld [vmem:[#allocation7 + $0xfc8] sm:$0xff] }
 0x20d   :  { %4433 = vmatprep.subr.bf16.mxu0 %v5684_v55  ;;  %4597 = vmatprep.subr.bf16.mxu1 %v5686_v56  ;;  %v1676_v55 = vld [vmem:[#allocation7 + $0xfe8] sm:$0xff]  ;;  %v5725_v56 = vcombine.low %v1664_v43, %v1668_v45  ;;  %v5732_v59 = vcombine.high %v1671_v50, %v1675_v52  ;;  %v5731_v28 = vcombine.low %v1671_v50, %v1675_v52  ;;  %v1201_v45 = vld [vmem:[#allocation7 + $0x110] sm:$0xff] }
 0x20e   :  { %v5734_v61 = vcombine.high %v1672_v53, %v1676_v55  ;;  %v1209_v52 = vld [vmem:[#allocation7 + $0x150] sm:$0xff] }
 0x210   :  { %4434 = vmatpush1.bf16.msra.mxu0 %v5683_v0  ;;  %4598 = vmatpush1.bf16.msra.mxu1 %v5685_v5  ;;  %v1173_v0 = vld [vmem:[#allocation7 + $0x30] sm:$0xff]  ;;  %v1170_v5 = vld [vmem:[#allocation7 + $0x18] sm:$0xff] }
 0x211   :  { %4435 = vmatprep.subr.bf16.mxu0 %v5692_v6  ;;  %4599 = vmatprep.subr.bf16.mxu1 %v5694_v7  ;;  %v1174_v6 = vld [vmem:[#allocation7 + $0x38] sm:$0xff]  ;;  %v5733_v7 = vcombine.low %v1672_v53, %v1676_v55  ;;  %v5232_v2 = vcombine.high %v1169_v62, %v1173_v0  ;;  %v1213_v53 = vld [vmem:[#allocation7 + $0x170] sm:$0xff] }
 0x212   :  { %v5234_v9 = vcombine.high %v1170_v5, %v1174_v6  ;;  %v5233_v4 = vcombine.low %v1170_v5, %v1174_v6  ;;  %v1210_v55 = vld [vmem:[#allocation7 + $0x158] sm:$0xff] }
 0x213   :  { %v1218_v5 = vld [vmem:[#allocation7 + $0x198] sm:$0xff] }
 0x214   :  { %4436 = vmatpush1.bf16.msra.mxu0 %v5691_v13  ;;  %4600 = vmatpush1.bf16.msra.mxu1 %v5693_v14  ;;  %v1181_v13 = vld [vmem:[#allocation7 + $0x70] sm:$0xff]  ;;  %v1178_v14 = vld [vmem:[#allocation7 + $0x58] sm:$0xff] }
 0x215   :  { %4437 = vmatprep.subr.bf16.mxu0 %v5700_v15  ;;  %4601 = vmatprep.subr.bf16.mxu1 %v5702_v3  ;;  %v1182_v15 = vld [vmem:[#allocation7 + $0x78] sm:$0xff]  ;;  %v5231_v3 = vcombine.low %v1169_v62, %v1173_v0  ;;  %v5240_v18 = vcombine.high %v1177_v12, %v1181_v13  ;;  %v5239_v20 = vcombine.low %v1177_v12, %v1181_v13  ;;  %v1221_v0 = vld [vmem:[#allocation7 + $0x1b0] sm:$0xff] }
 0x216   :  { %v5242_v8 = vcombine.high %v1178_v14, %v1182_v15  ;;  %v5241_v22 = vcombine.low %v1178_v14, %v1182_v15  ;;  %v1222_v6 = vld [vmem:[#allocation7 + $0x1b8] sm:$0xff]  ;;  %v1229_v12 = vld [vmem:[#allocation7 + $0x1f0] sm:$0xff]  ;;  %v5279_v15 = vcombine.low %v1217_v63, %v1221_v0 }
 0x217   :  { %v1226_v13 = vld [vmem:[#allocation7 + $0x1d8] sm:$0xff] }
 0x218   :  { %4438 = vmatpush1.bf16.msra.mxu0 %v5699_v38  ;;  %4602 = vmatpush1.bf16.msra.mxu1 %v5701_v10  ;;  %v1185_v38 = vld [vmem:[#allocation7 + $0x90] sm:$0xff]  ;;  %v1230_v14 = vld [vmem:[#allocation7 + $0x1f8] sm:$0xff] }
 0x219   :  { %4439 = vmatprep.subr.bf16.mxu0 %v5708_v17  ;;  %4603 = vmatprep.subr.bf16.mxu1 %v5710_v19  ;;  %v1189_v10 = vld [vmem:[#allocation7 + $0xb0] sm:$0xff]  ;;  %v1186_v17 = vld [vmem:[#allocation7 + $0x98] sm:$0xff] }
 0x21a   :  { %v1190_v19 = vld [vmem:[#allocation7 + $0xb8] sm:$0xff]  ;;  %v5248_v23 = vcombine.high %v1185_v38, %v1189_v10  ;;  %v5247_v32 = vcombine.low %v1185_v38, %v1189_v10  ;;  %v1237_v38 = vld [vmem:[#allocation7 + $0x230] sm:$0xff] }
 0x21b   :  { %v5250_v25 = vcombine.high %v1186_v17, %v1190_v19  ;;  %v5249_v41 = vcombine.low %v1186_v17, %v1190_v19  ;;  %v1234_v10 = vld [vmem:[#allocation7 + $0x218] sm:$0xff]  ;;  %v5287_v19 = vcombine.low %v1225_v11, %v1229_v12 }
 0x21c   :  { %4440 = vmatpush1.bf16.msra.mxu0 %v5707_v26  ;;  %4604 = vmatpush1.bf16.msra.mxu1 %v5709_v27  ;;  %v1193_v26 = vld [vmem:[#allocation7 + $0xd0] sm:$0xff]  ;;  %v1238_v17 = vld [vmem:[#allocation7 + $0x238] sm:$0xff] }
 0x21d   :  { %4441 = vmatprep.subr.bf16.mxu0 %v5716_v30  ;;  %4605 = vmatprep.subr.bf16.mxu1 %v5718_v31  ;;  %v1197_v27 = vld [vmem:[#allocation7 + $0xf0] sm:$0xff]  ;;  %v1194_v30 = vld [vmem:[#allocation7 + $0xd8] sm:$0xff] }
 0x21e   :  { %v1198_v31 = vld [vmem:[#allocation7 + $0xf8] sm:$0xff]  ;;  %v5256_v42 = vcombine.high %v1193_v26, %v1197_v27 }
 0x21f   :  { %v5258_v43 = vcombine.high %v1194_v30, %v1198_v31 }
 0x220   :  { %4442 = vmatpush1.bf16.msra.mxu0 %v5715_v34  ;;  %4606 = vmatpush1.bf16.msra.mxu1 %v5717_v46  ;;  %v1205_v34 = vld [vmem:[#allocation7 + $0x130] sm:$0xff]  ;;  %v1206_v46 = vld [vmem:[#allocation7 + $0x138] sm:$0xff] }
 0x221   :  { %4443 = vmatprep.subr.bf16.mxu0 %v5724_v48  ;;  %4607 = vmatprep.subr.bf16.mxu1 %v5726_v49  ;;  %v5255_v48 = vcombine.low %v1193_v26, %v1197_v27  ;;  %v5257_v49 = vcombine.low %v1194_v30, %v1198_v31  ;;  %v5264_v50 = vcombine.high %v1201_v45, %v1205_v34  ;;  %v1245_v26 = vld [vmem:[#allocation7 + $0x270] sm:$0xff]  ;;  %v1242_v27 = vld [vmem:[#allocation7 + $0x258] sm:$0xff] }
 0x222   :  { %v1246_v30 = vld [vmem:[#allocation7 + $0x278] sm:$0xff] }
 0x224   :  { %4444 = vmatpush1.bf16.msra.mxu0 %v5723_v37  ;;  %4608 = vmatpush1.bf16.msra.mxu1 %v5725_v56  ;;  %v1214_v37 = vld [vmem:[#allocation7 + $0x178] sm:$0xff]  ;;  %v5263_v56 = vcombine.low %v1201_v45, %v1205_v34  ;;  %v1253_v45 = vld [vmem:[#allocation7 + $0x2b0] sm:$0xff] }
 0x225   :  { %4445 = vmatprep.subr.bf16.mxu0 %v5732_v59  ;;  %4609 = vmatprep.subr.bf16.mxu1 %v5734_v61  ;;  %v5272_v61 = vcombine.high %v1209_v52, %v1213_v53  ;;  %v5274_v62 = vcombine.high %v1210_v55, %v1214_v37  ;;  %v1250_v34 = vld [vmem:[#allocation7 + $0x298] sm:$0xff] }
 0x228   :  { %4446 = vmatpush1.bf16.msra.mxu0 %v5731_v28  ;;  %4610 = vmatpush1.bf16.msra.mxu1 %v5733_v7  ;;  %v5271_v28 = vcombine.low %v1209_v52, %v1213_v53  ;;  %v5273_v7 = vcombine.low %v1210_v55, %v1214_v37  ;;  %v1261_v52 = vld [vmem:[#allocation7 + $0x2f0] sm:$0xff]  ;;  %v1258_v53 = vld [vmem:[#allocation7 + $0x2d8] sm:$0xff] }
 0x229   :  { %4620 = vmatprep.subr.bf16.mxu0 %v5232_v2  ;;  %4784 = vmatprep.subr.bf16.mxu1 %v5234_v9  ;;  %v5280_v2 = vcombine.high %v1217_v63, %v1221_v0  ;;  %v5282_v9 = vcombine.high %v1218_v5, %v1222_v6  ;;  %v1262_v55 = vld [vmem:[#allocation7 + $0x2f8] sm:$0xff]  ;;  %v1269_v63 = vld [vmem:[#allocation7 + $0x330] sm:$0xff] }
 0x22a   :  { %v1266_v0 = vld [vmem:[#allocation7 + $0x318] sm:$0xff] }
 0x22b   :  { %4448 = vmatmul.mubr.bf16.vlgmr.msra.gmra.mrb[8].mxu0 %v6151_v1  ;;  %4612 = vmatmul.mubr.bf16.vlgmr.msra.gmra.mrb[8].mxu1 %v6151_v1 }
 0x22c   :  { %4621 = vmatpush1.bf16.msra.mxu0 %v5231_v3  ;;  %4652 = vmatprep.mubr.bf16.mxu0 %v6075_v57  ;;  %v5281_v3 = vcombine.low %v1218_v5, %v1222_v6  ;;  %v1270_v5 = vld [vmem:[#allocation7 + $0x338] sm:$0xff] }
 0x22d   :  { %4785 = vmatpush1.bf16.msra.mxu1 %v5233_v4  ;;  %4816 = vmatprep.mubr.bf16.mxu1 %v6075_v57  ;;  %v1202_v57 = vld [vmem:[#allocation7 + $0x118] sm:$0xff]  ;;  %v5288_v4 = vcombine.high %v1225_v11, %v1229_v12  ;;  %v1277_v11 = vld [vmem:[#allocation7 + $0x370] sm:$0xff] }
 0x22e   :  { %4622 = vmatprep.subr.bf16.mxu0 %v5240_v18  ;;  %4786 = vmatprep.subr.bf16.mxu1 %v5242_v8  ;;  %v5266_v51 = vcombine.high %v1202_v57, %v1206_v46  ;;  %v5265_v59 = vcombine.low %v1202_v57, %v1206_v46  ;;  %v5290_v18 = vcombine.high %v1226_v13, %v1230_v14  ;;  %v1233_v8 = vld [vmem:[#allocation7 + $0x210] sm:$0xff]  ;;  %v1254_v57 = vld [vmem:[#allocation7 + $0x2b8] sm:$0xff] }
 0x22f   :  { %v5295_v31 = vcombine.low %v1233_v8, %v1237_v38  ;;  %v1274_v12 = vld [vmem:[#allocation7 + $0x358] sm:$0xff] }
 0x230   :  { %4623 = vmatpush1.bf16.msra.mxu0 %v5239_v20  ;;  %v5289_v20 = vcombine.low %v1226_v13, %v1230_v14  ;;  %v1278_v13 = vld [vmem:[#allocation7 + $0x378] sm:$0xff] }
 0x231   :  { %4787 = vmatpush1.bf16.msra.mxu1 %v5241_v22  ;;  %4624 = vmatprep.subr.bf16.mxu0 %v5248_v23  ;;  %v5296_v22 = vcombine.high %v1233_v8, %v1237_v38  ;;  %v5298_v23 = vcombine.high %v1234_v10, %v1238_v17  ;;  %v1285_v8 = vld [vmem:[#allocation7 + $0x3b0] sm:$0xff]  ;;  %v1282_v38 = vld [vmem:[#allocation7 + $0x398] sm:$0xff] }
 0x232   :  { %4788 = vmatprep.subr.bf16.mxu1 %v5250_v25  ;;  %v1241_v25 = vld [vmem:[#allocation7 + $0x250] sm:$0xff] }
 0x233   :  { %v5303_v46 = vcombine.low %v1241_v25, %v1245_v26 }
 0x234   :  { %4625 = vmatpush1.bf16.msra.mxu0 %v5247_v32  ;;  %v5297_v32 = vcombine.low %v1234_v10, %v1238_v17  ;;  %v1286_v10 = vld [vmem:[#allocation7 + $0x3b8] sm:$0xff] }
 0x235   :  { %4789 = vmatpush1.bf16.msra.mxu1 %v5249_v41  ;;  %4626 = vmatprep.subr.bf16.mxu0 %v5256_v42  ;;  %v5304_v41 = vcombine.high %v1241_v25, %v1245_v26  ;;  %v5306_v42 = vcombine.high %v1242_v27, %v1246_v30  ;;  %v1293_v25 = vld [vmem:[#allocation7 + $0x3f0] sm:$0xff]  ;;  %v1290_v26 = vld [vmem:[#allocation7 + $0x3d8] sm:$0xff] }
 0x236   :  { %4790 = vmatprep.subr.bf16.mxu1 %v5258_v43  ;;  %v1249_v43 = vld [vmem:[#allocation7 + $0x290] sm:$0xff] }
 0x237   :  { %v5311_v37 = vcombine.low %v1249_v43, %v1253_v45 }
 0x238   :  { %4627 = vmatpush1.bf16.msra.mxu0 %v5255_v48  ;;  %v5305_v48 = vcombine.low %v1242_v27, %v1246_v30  ;;  %v1294_v27 = vld [vmem:[#allocation7 + $0x3f8] sm:$0xff] }
 0x239   :  { %4791 = vmatpush1.bf16.msra.mxu1 %v5257_v49  ;;  %4628 = vmatprep.subr.bf16.mxu0 %v5264_v50  ;;  %v5312_v49 = vcombine.high %v1249_v43, %v1253_v45  ;;  %v5314_v50 = vcombine.high %v1250_v34, %v1254_v57  ;;  %v1301_v43 = vld [vmem:[#allocation7 + $0x430] sm:$0xff]  ;;  %v1298_v45 = vld [vmem:[#allocation7 + $0x418] sm:$0xff] }
 0x23a   :  { %4792 = vmatprep.subr.bf16.mxu1 %v5266_v51  ;;  %v1257_v51 = vld [vmem:[#allocation7 + $0x2d0] sm:$0xff] }
 0x23b   :  { %v5319_v6 = vcombine.low %v1257_v51, %v1261_v52 }
 0x23c   :  { %4629 = vmatpush1.bf16.msra.mxu0 %v5263_v56  ;;  %v5313_v56 = vcombine.low %v1250_v34, %v1254_v57  ;;  %v1302_v34 = vld [vmem:[#allocation7 + $0x438] sm:$0xff] }
 0x23d   :  { %4793 = vmatpush1.bf16.msra.mxu1 %v5265_v59  ;;  %4630 = vmatprep.subr.bf16.mxu0 %v5272_v61  ;;  %v5320_v59 = vcombine.high %v1257_v51, %v1261_v52  ;;  %v5322_v61 = vcombine.high %v1258_v53, %v1262_v55  ;;  %v1309_v51 = vld [vmem:[#allocation7 + $0x470] sm:$0xff] }
 0x23e   :  { %4794 = vmatprep.subr.bf16.mxu1 %v5274_v62  ;;  %v1265_v62 = vld [vmem:[#allocation7 + $0x310] sm:$0xff] }
 0x23f   :  { %v5327_v14 = vcombine.low %v1265_v62, %v1269_v63 }
 0x240   :  { %4631 = vmatpush1.bf16.msra.mxu0 %v5271_v28  ;;  %v5321_v28 = vcombine.low %v1258_v53, %v1262_v55  ;;  %v1306_v53 = vld [vmem:[#allocation7 + $0x458] sm:$0xff] }
 0x241   :  { %4795 = vmatpush1.bf16.msra.mxu1 %v5273_v7  ;;  %4632 = vmatprep.subr.bf16.mxu0 %v5280_v2  ;;  %v5328_v7 = vcombine.high %v1265_v62, %v1269_v63  ;;  %v5330_v2 = vcombine.high %v1266_v0, %v1270_v5  ;;  %v1310_v55 = vld [vmem:[#allocation7 + $0x478] sm:$0xff] }
 0x242   :  { %4796 = vmatprep.subr.bf16.mxu1 %v5282_v9  ;;  %v1273_v9 = vld [vmem:[#allocation7 + $0x350] sm:$0xff]  ;;  %v5370_v62 = vcombine.high %v1306_v53, %v1310_v55  ;;  %v1314_v63 = vld [vmem:[#allocation7 + $0x498] sm:$0xff] }
 0x243   :  { %v5335_v17 = vcombine.low %v1273_v9, %v1277_v11 }
 0x244   :  { %4633 = vmatpush1.bf16.msra.mxu0 %v5279_v15  ;;  %v5329_v15 = vcombine.low %v1266_v0, %v1270_v5  ;;  %v1318_v0 = vld [vmem:[#allocation7 + $0x4b8] sm:$0xff] }
 0x245   :  { %4797 = vmatpush1.bf16.msra.mxu1 %v5281_v3  ;;  %4634 = vmatprep.subr.bf16.mxu0 %v5288_v4  ;;  %v5336_v3 = vcombine.high %v1273_v9, %v1277_v11  ;;  %v5338_v4 = vcombine.high %v1274_v12, %v1278_v13  ;;  %v1325_v9 = vld [vmem:[#allocation7 + $0x4f0] sm:$0xff]  ;;  %v1322_v11 = vld [vmem:[#allocation7 + $0x4d8] sm:$0xff] }
 0x246   :  { %4798 = vmatprep.subr.bf16.mxu1 %v5290_v18  ;;  %v1281_v18 = vld [vmem:[#allocation7 + $0x390] sm:$0xff] }
 0x247   :  { %v5343_v30 = vcombine.low %v1281_v18, %v1285_v8 }
 0x248   :  { %4635 = vmatpush1.bf16.msra.mxu0 %v5287_v19  ;;  %v5337_v19 = vcombine.low %v1274_v12, %v1278_v13  ;;  %v1326_v12 = vld [vmem:[#allocation7 + $0x4f8] sm:$0xff] }
 0x249   :  { %4799 = vmatpush1.bf16.msra.mxu1 %v5289_v20  ;;  %4636 = vmatprep.subr.bf16.mxu0 %v5296_v22  ;;  %v5344_v20 = vcombine.high %v1281_v18, %v1285_v8  ;;  %v5346_v22 = vcombine.high %v1282_v38, %v1286_v10  ;;  %v1330_v18 = vld [vmem:[#allocation7 + $0x518] sm:$0xff] }
 0x24a   :  { %4800 = vmatprep.subr.bf16.mxu1 %v5298_v23  ;;  %v1289_v23 = vld [vmem:[#allocation7 + $0x3d0] sm:$0xff]  ;;  %v1334_v8 = vld [vmem:[#allocation7 + $0x538] sm:$0xff] }
 0x24b   :  { %v5351_v57 = vcombine.low %v1289_v23, %v1293_v25 }
 0x24c   :  { %4637 = vmatpush1.bf16.msra.mxu0 %v5295_v31  ;;  %v5345_v31 = vcombine.low %v1282_v38, %v1286_v10  ;;  %v5385_v38 = vcombine.low %v1322_v11, %v1326_v12 }
 0x24d   :  { %4801 = vmatpush1.bf16.msra.mxu1 %v5297_v32  ;;  %4638 = vmatprep.subr.bf16.mxu0 %v5304_v41  ;;  %v5352_v32 = vcombine.high %v1289_v23, %v1293_v25  ;;  %v5354_v41 = vcombine.high %v1290_v26, %v1294_v27  ;;  %v1342_v23 = vld [vmem:[#allocation7 + $0x578] sm:$0xff] }
 0x24e   :  { %4802 = vmatprep.subr.bf16.mxu1 %v5306_v42  ;;  %v1297_v42 = vld [vmem:[#allocation7 + $0x410] sm:$0xff] }
 0x24f   :  { %v5359_v52 = vcombine.low %v1297_v42, %v1301_v43 }
 0x250   :  { %4639 = vmatpush1.bf16.msra.mxu0 %v5303_v46  ;;  %v5353_v46 = vcombine.low %v1290_v26, %v1294_v27  ;;  %v5393_v26 = vcombine.low %v1330_v18, %v1334_v8 }
 0x251   :  { %4803 = vmatpush1.bf16.msra.mxu1 %v5305_v48  ;;  %4640 = vmatprep.subr.bf16.mxu0 %v5312_v49  ;;  %v5360_v48 = vcombine.high %v1297_v42, %v1301_v43  ;;  %v5362_v49 = vcombine.high %v1298_v45, %v1302_v34  ;;  %v1350_v42 = vld [vmem:[#allocation7 + $0x5b8] sm:$0xff] }
 0x252   :  { %4804 = vmatprep.subr.bf16.mxu1 %v5314_v50  ;;  %v1305_v50 = vld [vmem:[#allocation7 + $0x450] sm:$0xff] }
 0x253   :  { %v5367_v5 = vcombine.low %v1305_v50, %v1309_v51 }
 0x254   :  { %4641 = vmatpush1.bf16.msra.mxu0 %v5311_v37  ;;  %v5361_v37 = vcombine.low %v1298_v45, %v1302_v34 }
 0x255   :  { %4805 = vmatpush1.bf16.msra.mxu1 %v5313_v56  ;;  %4642 = vmatprep.subr.bf16.mxu0 %v5320_v59  ;;  %v5368_v56 = vcombine.high %v1305_v50, %v1309_v51  ;;  %v1313_v59 = vld [vmem:[#allocation7 + $0x490] sm:$0xff]  ;;  %v1358_v50 = vld [vmem:[#allocation7 + $0x5f8] sm:$0xff] }
 0x256   :  { %4806 = vmatprep.subr.bf16.mxu1 %v5322_v61  ;;  %v1317_v61 = vld [vmem:[#allocation7 + $0x4b0] sm:$0xff] }
 0x257   :  { %v5375_v13 = vcombine.low %v1313_v59, %v1317_v61 }
 0x258   :  { %4643 = vmatpush1.bf16.msra.mxu0 %v5319_v6  ;;  %v5369_v6 = vcombine.low %v1306_v53, %v1310_v55 }
 0x259   :  { %4807 = vmatpush1.bf16.msra.mxu1 %v5321_v28  ;;  %4644 = vmatprep.subr.bf16.mxu0 %v5328_v7  ;;  %v5376_v28 = vcombine.high %v1313_v59, %v1317_v61  ;;  %v5378_v7 = vcombine.high %v1314_v63, %v1318_v0  ;;  %v1362_v59 = vld [vmem:[#allocation7 + $0x618] sm:$0xff] }
 0x25a   :  { %4808 = vmatprep.subr.bf16.mxu1 %v5330_v2  ;;  %v1321_v2 = vld [vmem:[#allocation7 + $0x4d0] sm:$0xff]  ;;  %v1366_v61 = vld [vmem:[#allocation7 + $0x638] sm:$0xff] }
 0x25c   :  { %4645 = vmatpush1.bf16.msra.mxu0 %v5327_v14  ;;  %v5384_v14 = vcombine.high %v1321_v2, %v1325_v9 }
 0x25d   :  { %4809 = vmatpush1.bf16.msra.mxu1 %v5329_v15  ;;  %4646 = vmatprep.subr.bf16.mxu0 %v5336_v3  ;;  %v5386_v15 = vcombine.high %v1322_v11, %v1326_v12  ;;  %v1329_v3 = vld [vmem:[#allocation7 + $0x510] sm:$0xff]  ;;  %v5425_v11 = vcombine.low %v1362_v59, %v1366_v61 }
 0x25e   :  { %4810 = vmatprep.subr.bf16.mxu1 %v5338_v4  ;;  %v1333_v4 = vld [vmem:[#allocation7 + $0x530] sm:$0xff] }
 0x25f   :  { %v5392_v10 = vcombine.high %v1329_v3, %v1333_v4  ;;  %v5391_v25 = vcombine.low %v1329_v3, %v1333_v4  ;;  %v1382_v3 = vld [vmem:[#allocation7 + $0x6b8] sm:$0xff] }
 0x260   :  { %4647 = vmatpush1.bf16.msra.mxu0 %v5335_v17  ;;  %v5394_v17 = vcombine.high %v1330_v18, %v1334_v8 }
 0x261   :  { %4811 = vmatpush1.bf16.msra.mxu1 %v5337_v19  ;;  %4648 = vmatprep.subr.bf16.mxu0 %v5344_v20  ;;  %v1337_v19 = vld [vmem:[#allocation7 + $0x550] sm:$0xff] }
 0x262   :  { %4812 = vmatprep.subr.bf16.mxu1 %v5346_v22  ;;  %v1341_v20 = vld [vmem:[#allocation7 + $0x570] sm:$0xff]  ;;  %v1338_v22 = vld [vmem:[#allocation7 + $0x558] sm:$0xff] }
 0x263   :  { %v5400_v27 = vcombine.high %v1337_v19, %v1341_v20  ;;  %v5399_v43 = vcombine.low %v1337_v19, %v1341_v20  ;;  %v5401_v45 = vcombine.low %v1338_v22, %v1342_v23  ;;  %v1390_v19 = vld [vmem:[#allocation7 + $0x6f8] sm:$0xff] }
 0x264   :  { %4649 = vmatpush1.bf16.msra.mxu0 %v5343_v30  ;;  %v5402_v30 = vcombine.high %v1338_v22, %v1342_v23 }
 0x265   :  { %4813 = vmatpush1.bf16.msra.mxu1 %v5345_v31  ;;  %4650 = vmatprep.subr.bf16.mxu0 %v5352_v32  ;;  %v1345_v31 = vld [vmem:[#allocation7 + $0x590] sm:$0xff] }
 0x266   :  { %4814 = vmatprep.subr.bf16.mxu1 %v5354_v41  ;;  %v1349_v32 = vld [vmem:[#allocation7 + $0x5b0] sm:$0xff]  ;;  %v1346_v41 = vld [vmem:[#allocation7 + $0x598] sm:$0xff] }
 0x267   :  { %v5408_v34 = vcombine.high %v1345_v31, %v1349_v32  ;;  %v5407_v51 = vcombine.low %v1345_v31, %v1349_v32  ;;  %v1398_v31 = vld [vmem:[#allocation7 + $0x738] sm:$0xff] }
 0x268   :  { %4651 = vmatpush1.bf16.msra.mxu0 %v5351_v57  ;;  %v5410_v57 = vcombine.high %v1346_v41, %v1350_v42 }
 0x269   :  { %4815 = vmatpush1.bf16.msra.mxu1 %v5353_v46  ;;  %4661 = vmatprep.subr.bf16.mxu0 %v5360_v48  ;;  %v1353_v46 = vld [vmem:[#allocation7 + $0x5d0] sm:$0xff] }
 0x26a   :  { %4825 = vmatprep.subr.bf16.mxu1 %v5362_v49  ;;  %v1357_v48 = vld [vmem:[#allocation7 + $0x5f0] sm:$0xff]  ;;  %v1354_v49 = vld [vmem:[#allocation7 + $0x5d8] sm:$0xff] }
 0x26b   :  { %4653 = vmatmul.mubr.bf16.vlgmr.msra.gmra.mrb[12].mxu0 %v6077_v58  ;;  %v5416_v53 = vcombine.high %v1353_v46, %v1357_v48  ;;  %v5418_v55 = vcombine.high %v1354_v49, %v1358_v50 }
 0x26c   :  { %4817 = vmatmul.mubr.bf16.vlgmr.msra.gmra.mrb[12].mxu1 %v6077_v58  ;;  %4662 = vmatpush1.bf16.msra.mxu0 %v5359_v52  ;;  %v5377_v58 = vcombine.low %v1314_v63, %v1318_v0  ;;  %v5409_v52 = vcombine.low %v1346_v41, %v1350_v42  ;;  %v5417_v63 = vcombine.low %v1354_v49, %v1358_v50 }
 0x26d   :  { %4693 = vmatprep.mubr.bf16.mxu0 %v6096_v54  ;;  %4826 = vmatpush1.bf16.msra.mxu1 %v5361_v37  ;;  %v1361_v37 = vld [vmem:[#allocation7 + $0x610] sm:$0xff] }
 0x26e   :  { %4857 = vmatprep.mubr.bf16.mxu1 %v6096_v54  ;;  %4663 = vmatprep.subr.bf16.mxu0 %v5368_v56  ;;  %v5383_v54 = vcombine.low %v1321_v2, %v1325_v9  ;;  %v1365_v56 = vld [vmem:[#allocation7 + $0x630] sm:$0xff]  ;;  %v1374_v2 = vld [vmem:[#allocation7 + $0x678] sm:$0xff] }
 0x26f   :  { %4827 = vmatprep.subr.bf16.mxu1 %v5370_v62  ;;  %v5415_v62 = vcombine.low %v1353_v46, %v1357_v48  ;;  %v5424_v0 = vcombine.high %v1361_v37, %v1365_v56  ;;  %v5423_v9 = vcombine.low %v1361_v37, %v1365_v56  ;;  %v1406_v46 = vld [vmem:[#allocation7 + $0x778] sm:$0xff] }
 0x270   :  { %4664 = vmatpush1.bf16.msra.mxu0 %v5367_v5  ;;  %v5426_v5 = vcombine.high %v1362_v59, %v1366_v61  ;;  %v1414_v37 = vld [vmem:[#allocation7 + $0x7b8] sm:$0xff] }
 0x271   :  { %4828 = vmatpush1.bf16.msra.mxu1 %v5369_v6  ;;  %4665 = vmatprep.subr.bf16.mxu0 %v5376_v28  ;;  %v1369_v6 = vld [vmem:[#allocation7 + $0x650] sm:$0xff] }
 0x272   :  { %4829 = vmatprep.subr.bf16.mxu1 %v5378_v7  ;;  %v1373_v28 = vld [vmem:[#allocation7 + $0x670] sm:$0xff]  ;;  %v1370_v7 = vld [vmem:[#allocation7 + $0x658] sm:$0xff] }
 0x273   :  { %v5432_v12 = vcombine.high %v1369_v6, %v1373_v28  ;;  %v5431_v4 = vcombine.low %v1369_v6, %v1373_v28  ;;  %v5433_v18 = vcombine.low %v1370_v7, %v1374_v2  ;;  %v1422_v6 = vld [vmem:[#allocation7 + $0x7f8] sm:$0xff] }
 0x274   :  { %4666 = vmatpush1.bf16.msra.mxu0 %v5375_v13  ;;  %v5434_v13 = vcombine.high %v1370_v7, %v1374_v2 }
 0x275   :  { %4830 = vmatpush1.bf16.msra.mxu1 %v5377_v58  ;;  %4667 = vmatprep.subr.bf16.mxu0 %v5384_v14  ;;  %v1377_v58 = vld [vmem:[#allocation7 + $0x690] sm:$0xff] }
 0x276   :  { %4831 = vmatprep.subr.bf16.mxu1 %v5386_v15  ;;  %v1381_v14 = vld [vmem:[#allocation7 + $0x6b0] sm:$0xff]  ;;  %v1378_v15 = vld [vmem:[#allocation7 + $0x698] sm:$0xff] }
 0x277   :  { %v5440_v8 = vcombine.high %v1377_v58, %v1381_v14  ;;  %v5439_v20 = vcombine.low %v1377_v58, %v1381_v14  ;;  %v5441_v22 = vcombine.low %v1378_v15, %v1382_v3  ;;  %v1430_v58 = vld [vmem:[#allocation7 + $0x838] sm:$0xff] }
 0x278   :  { %4668 = vmatpush1.bf16.msra.mxu0 %v5383_v54  ;;  %v5442_v54 = vcombine.high %v1378_v15, %v1382_v3 }
 0x279   :  { %4832 = vmatpush1.bf16.msra.mxu1 %v5385_v38  ;;  %4669 = vmatprep.subr.bf16.mxu0 %v5392_v10  ;;  %v1385_v38 = vld [vmem:[#allocation7 + $0x6d0] sm:$0xff] }
 0x27a   :  { %4833 = vmatprep.subr.bf16.mxu1 %v5394_v17  ;;  %v1389_v10 = vld [vmem:[#allocation7 + $0x6f0] sm:$0xff]  ;;  %v1386_v17 = vld [vmem:[#allocation7 + $0x6d8] sm:$0xff] }
 0x27b   :  { %v5448_v23 = vcombine.high %v1385_v38, %v1389_v10  ;;  %v5447_v32 = vcombine.low %v1385_v38, %v1389_v10  ;;  %v5449_v41 = vcombine.low %v1386_v17, %v1390_v19  ;;  %v1434_v38 = vld [vmem:[#allocation7 + $0x858] sm:$0xff] }
 0x27c   :  { %4670 = vmatpush1.bf16.msra.mxu0 %v5391_v25  ;;  %v5450_v25 = vcombine.high %v1386_v17, %v1390_v19  ;;  %v1438_v10 = vld [vmem:[#allocation7 + $0x878] sm:$0xff] }
 0x27d   :  { %4834 = vmatpush1.bf16.msra.mxu1 %v5393_v26  ;;  %4671 = vmatprep.subr.bf16.mxu0 %v5400_v27  ;;  %v1393_v26 = vld [vmem:[#allocation7 + $0x710] sm:$0xff] }
 0x27e   :  { %4835 = vmatprep.subr.bf16.mxu1 %v5402_v30  ;;  %v1397_v27 = vld [vmem:[#allocation7 + $0x730] sm:$0xff]  ;;  %v1394_v30 = vld [vmem:[#allocation7 + $0x718] sm:$0xff] }
 0x27f   :  { %v5456_v42 = vcombine.high %v1393_v26, %v1397_v27  ;;  %v5455_v48 = vcombine.low %v1393_v26, %v1397_v27  ;;  %v5457_v49 = vcombine.low %v1394_v30, %v1398_v31  ;;  %v1446_v26 = vld [vmem:[#allocation7 + $0x8b8] sm:$0xff] }
 0x280   :  { %4672 = vmatpush1.bf16.msra.mxu0 %v5399_v43  ;;  %v5458_v43 = vcombine.high %v1394_v30, %v1398_v31  ;;  %v5497_v30 = vcombine.low %v1434_v38, %v1438_v10 }
 0x281   :  { %4836 = vmatpush1.bf16.msra.mxu1 %v5401_v45  ;;  %4673 = vmatprep.subr.bf16.mxu0 %v5408_v34  ;;  %v1401_v45 = vld [vmem:[#allocation7 + $0x750] sm:$0xff] }
 0x282   :  { %4837 = vmatprep.subr.bf16.mxu1 %v5410_v57  ;;  %v1405_v34 = vld [vmem:[#allocation7 + $0x770] sm:$0xff]  ;;  %v1402_v57 = vld [vmem:[#allocation7 + $0x758] sm:$0xff] }
 0x283   :  { %v5464_v50 = vcombine.high %v1401_v45, %v1405_v34  ;;  %v5463_v56 = vcombine.low %v1401_v45, %v1405_v34  ;;  %v5465_v59 = vcombine.low %v1402_v57, %v1406_v46  ;;  %v1454_v45 = vld [vmem:[#allocation7 + $0x8f8] sm:$0xff] }
 0x284   :  { %4674 = vmatpush1.bf16.msra.mxu0 %v5407_v51  ;;  %v5466_v51 = vcombine.high %v1402_v57, %v1406_v46 }
 0x285   :  { %4838 = vmatpush1.bf16.msra.mxu1 %v5409_v52  ;;  %4675 = vmatprep.subr.bf16.mxu0 %v5416_v53  ;;  %v1409_v52 = vld [vmem:[#allocation7 + $0x790] sm:$0xff] }
 0x286   :  { %4839 = vmatprep.subr.bf16.mxu1 %v5418_v55  ;;  %v1413_v53 = vld [vmem:[#allocation7 + $0x7b0] sm:$0xff]  ;;  %v1410_v55 = vld [vmem:[#allocation7 + $0x798] sm:$0xff] }
 0x287   :  { %v5472_v61 = vcombine.high %v1409_v52, %v1413_v53  ;;  %v5471_v28 = vcombine.low %v1409_v52, %v1413_v53  ;;  %v5473_v7 = vcombine.low %v1410_v55, %v1414_v37 }
 0x288   :  { %4676 = vmatpush1.bf16.msra.mxu0 %v5415_v62  ;;  %v5474_v62 = vcombine.high %v1410_v55, %v1414_v37  ;;  %v1465_v37 = vld [vmem:[#allocation7 + $0x950] sm:$0xff] }
 0x289   :  { %4840 = vmatpush1.bf16.msra.mxu1 %v5417_v63  ;;  %4677 = vmatprep.subr.bf16.mxu0 %v5424_v0  ;;  %v1417_v63 = vld [vmem:[#allocation7 + $0x7d0] sm:$0xff] }
 0x28a   :  { %4841 = vmatprep.subr.bf16.mxu1 %v5426_v5  ;;  %v1421_v0 = vld [vmem:[#allocation7 + $0x7f0] sm:$0xff]  ;;  %v1418_v5 = vld [vmem:[#allocation7 + $0x7d8] sm:$0xff] }
 0x28b   :  { %v5480_v2 = vcombine.high %v1417_v63, %v1421_v0  ;;  %v5479_v14 = vcombine.low %v1417_v63, %v1421_v0  ;;  %v5481_v15 = vcombine.low %v1418_v5, %v1422_v6 }
 0x28c   :  { %4678 = vmatpush1.bf16.msra.mxu0 %v5423_v9  ;;  %v5482_v9 = vcombine.high %v1418_v5, %v1422_v6  ;;  %v1473_v6 = vld [vmem:[#allocation7 + $0x990] sm:$0xff] }
 0x28d   :  { %4842 = vmatpush1.bf16.msra.mxu1 %v5425_v11  ;;  %4679 = vmatprep.subr.bf16.mxu0 %v5432_v12  ;;  %v1425_v11 = vld [vmem:[#allocation7 + $0x810] sm:$0xff] }
 0x28e   :  { %4843 = vmatprep.subr.bf16.mxu1 %v5434_v13  ;;  %v1429_v12 = vld [vmem:[#allocation7 + $0x830] sm:$0xff]  ;;  %v1426_v13 = vld [vmem:[#allocation7 + $0x818] sm:$0xff] }
 0x28f   :  { %v5488_v3 = vcombine.high %v1425_v11, %v1429_v12  ;;  %v5489_v17 = vcombine.low %v1426_v13, %v1430_v58 }
 0x290   :  { %4680 = vmatpush1.bf16.msra.mxu0 %v5431_v4  ;;  %v5490_v4 = vcombine.high %v1426_v13, %v1430_v58  ;;  %v1481_v58 = vld [vmem:[#allocation7 + $0x9d0] sm:$0xff] }
 0x291   :  { %4844 = vmatpush1.bf16.msra.mxu1 %v5433_v18  ;;  %4681 = vmatprep.subr.bf16.mxu0 %v5440_v8  ;;  %v1433_v18 = vld [vmem:[#allocation7 + $0x850] sm:$0xff] }
 0x292   :  { %4845 = vmatprep.subr.bf16.mxu1 %v5442_v54  ;;  %v1437_v8 = vld [vmem:[#allocation7 + $0x870] sm:$0xff]  ;;  %v5487_v54 = vcombine.low %v1425_v11, %v1429_v12 }
 0x293   :  { %v5496_v19 = vcombine.high %v1433_v18, %v1437_v8  ;;  %v5495_v27 = vcombine.low %v1433_v18, %v1437_v8 }
 0x294   :  { %4682 = vmatpush1.bf16.msra.mxu0 %v5439_v20  ;;  %v1441_v20 = vld [vmem:[#allocation7 + $0x890] sm:$0xff] }
 0x295   :  { %4846 = vmatpush1.bf16.msra.mxu1 %v5441_v22  ;;  %4683 = vmatprep.subr.bf16.mxu0 %v5448_v23  ;;  %v1445_v22 = vld [vmem:[#allocation7 + $0x8b0] sm:$0xff]  ;;  %v5498_v23 = vcombine.high %v1434_v38, %v1438_v10 }
 0x296   :  { %4847 = vmatprep.subr.bf16.mxu1 %v5450_v25  ;;  %v1442_v25 = vld [vmem:[#allocation7 + $0x898] sm:$0xff]  ;;  %v5504_v31 = vcombine.high %v1441_v20, %v1445_v22  ;;  %v5503_v34 = vcombine.low %v1441_v20, %v1445_v22  ;;  %v1489_v38 = vld [vmem:[#allocation7 + $0xa10] sm:$0xff] }
 0x297   :  { %v1493_v10 = vld [vmem:[#allocation7 + $0xa30] sm:$0xff] }
 0x298   :  { %4684 = vmatpush1.bf16.msra.mxu0 %v5447_v32  ;;  %v5506_v32 = vcombine.high %v1442_v25, %v1446_v26 }
 0x299   :  { %4848 = vmatpush1.bf16.msra.mxu1 %v5449_v41  ;;  %4685 = vmatprep.subr.bf16.mxu0 %v5456_v42  ;;  %v1449_v41 = vld [vmem:[#allocation7 + $0x8d0] sm:$0xff] }
 0x29a   :  { %4849 = vmatprep.subr.bf16.mxu1 %v5458_v43  ;;  %v1453_v42 = vld [vmem:[#allocation7 + $0x8f0] sm:$0xff]  ;;  %v1450_v43 = vld [vmem:[#allocation7 + $0x8d8] sm:$0xff] }
 0x29b   :  { %v5512_v57 = vcombine.high %v1449_v41, %v1453_v42  ;;  %v5514_v46 = vcombine.high %v1450_v43, %v1454_v45  ;;  %v5513_v52 = vcombine.low %v1450_v43, %v1454_v45  ;;  %v1505_v45 = vld [vmem:[#allocation7 + $0xa90] sm:$0xff] }
 0x29c   :  { %4686 = vmatpush1.bf16.msra.mxu0 %v5455_v48  ;;  %v1457_v48 = vld [vmem:[#allocation7 + $0x910] sm:$0xff] }
 0x29d   :  { %4850 = vmatpush1.bf16.msra.mxu1 %v5457_v49  ;;  %4687 = vmatprep.subr.bf16.mxu0 %v5464_v50  ;;  %v1461_v49 = vld [vmem:[#allocation7 + $0x930] sm:$0xff]  ;;  %v1458_v50 = vld [vmem:[#allocation7 + $0x918] sm:$0xff] }
 0x29e   :  { %4851 = vmatprep.subr.bf16.mxu1 %v5466_v51  ;;  %v1462_v51 = vld [vmem:[#allocation7 + $0x938] sm:$0xff]  ;;  %v5520_v53 = vcombine.high %v1457_v48, %v1461_v49 }
 0x29f   :  { %v5522_v55 = vcombine.high %v1458_v50, %v1462_v51  ;;  %v5521_v63 = vcombine.low %v1458_v50, %v1462_v51  ;;  %v1513_v51 = vld [vmem:[#allocation7 + $0xad0] sm:$0xff] }
 0x2a0   :  { %4688 = vmatpush1.bf16.msra.mxu0 %v5463_v56  ;;  %v1469_v56 = vld [vmem:[#allocation7 + $0x970] sm:$0xff] }
 0x2a1   :  { %4852 = vmatpush1.bf16.msra.mxu1 %v5465_v59  ;;  %4689 = vmatprep.subr.bf16.mxu0 %v5472_v61  ;;  %v1466_v59 = vld [vmem:[#allocation7 + $0x958] sm:$0xff]  ;;  %v5528_v0 = vcombine.high %v1465_v37, %v1469_v56 }
 0x2a2   :  { %4853 = vmatprep.subr.bf16.mxu1 %v5474_v62  ;;  %v1470_v61 = vld [vmem:[#allocation7 + $0x978] sm:$0xff]  ;;  %v5519_v62 = vcombine.low %v1457_v48, %v1461_v49 }
 0x2a3   :  { %v5530_v5 = vcombine.high %v1466_v59, %v1470_v61  ;;  %v5529_v11 = vcombine.low %v1466_v59, %v1470_v61  ;;  %v1521_v61 = vld [vmem:[#allocation7 + $0xb10] sm:$0xff] }
 0x2a4   :  { %4690 = vmatpush1.bf16.msra.mxu0 %v5471_v28  ;;  %v1477_v28 = vld [vmem:[#allocation7 + $0x9b0] sm:$0xff] }
 0x2a5   :  { %4854 = vmatpush1.bf16.msra.mxu1 %v5473_v7  ;;  %4691 = vmatprep.subr.bf16.mxu0 %v5480_v2  ;;  %v1474_v7 = vld [vmem:[#allocation7 + $0x998] sm:$0xff]  ;;  %v5536_v12 = vcombine.high %v1473_v6, %v1477_v28 }
 0x2a6   :  { %4855 = vmatprep.subr.bf16.mxu1 %v5482_v9  ;;  %v1478_v2 = vld [vmem:[#allocation7 + $0x9b8] sm:$0xff]  ;;  %v5527_v9 = vcombine.low %v1465_v37, %v1469_v56 }
 0x2a7   :  { %v5538_v13 = vcombine.high %v1474_v7, %v1478_v2  ;;  %v5537_v18 = vcombine.low %v1474_v7, %v1478_v2  ;;  %v1529_v2 = vld [vmem:[#allocation7 + $0xb50] sm:$0xff] }
 0x2a8   :  { %4692 = vmatpush1.bf16.msra.mxu0 %v5479_v14  ;;  %v1485_v14 = vld [vmem:[#allocation7 + $0x9f0] sm:$0xff] }
 0x2a9   :  { %4856 = vmatpush1.bf16.msra.mxu1 %v5481_v15  ;;  %4702 = vmatprep.subr.bf16.mxu0 %v5488_v3  ;;  %v1482_v15 = vld [vmem:[#allocation7 + $0x9d8] sm:$0xff]  ;;  %v5544_v8 = vcombine.high %v1481_v58, %v1485_v14  ;;  %v5543_v20 = vcombine.low %v1481_v58, %v1485_v14 }
 0x2aa   :  { %4866 = vmatprep.subr.bf16.mxu1 %v5490_v4  ;;  %v1486_v3 = vld [vmem:[#allocation7 + $0x9f8] sm:$0xff]  ;;  %v5535_v4 = vcombine.low %v1473_v6, %v1477_v28 }
 0x2ab   :  { %4694 = vmatmul.mubr.bf16.vlgmr.msra.gmra.mrb[12].mxu0 %v6113_v35  ;;  %v5545_v22 = vcombine.low %v1482_v15, %v1486_v3 }
 0x2ac   :  { %4858 = vmatmul.mubr.bf16.vlgmr.msra.gmra.mrb[12].mxu1 %v6113_v35  ;;  %4703 = vmatpush1.bf16.msra.mxu0 %v5487_v54  ;;  %v5505_v35 = vcombine.low %v1442_v25, %v1446_v26  ;;  %v5546_v54 = vcombine.high %v1482_v15, %v1486_v3  ;;  %v1497_v26 = vld [vmem:[#allocation7 + $0xa50] sm:$0xff] }
 0x2ad   :  { %4734 = vmatprep.mubr.bf16.mxu0 %v6115_v47  ;;  %4867 = vmatpush1.bf16.msra.mxu1 %v5489_v17  ;;  %v1490_v17 = vld [vmem:[#allocation7 + $0xa18] sm:$0xff]  ;;  %v1537_v3 = vld [vmem:[#allocation7 + $0xb90] sm:$0xff] }
 0x2ae   :  { %4898 = vmatprep.mubr.bf16.mxu1 %v6115_v47  ;;  %4704 = vmatprep.subr.bf16.mxu0 %v5496_v19  ;;  %v5511_v47 = vcombine.low %v1449_v41, %v1453_v42  ;;  %v1494_v19 = vld [vmem:[#allocation7 + $0xa38] sm:$0xff] }
 0x2af   :  { %4868 = vmatprep.subr.bf16.mxu1 %v5498_v23  ;;  %v5552_v23 = vcombine.high %v1489_v38, %v1493_v10  ;;  %v5554_v25 = vcombine.high %v1490_v17, %v1494_v19  ;;  %v5553_v41 = vcombine.low %v1490_v17, %v1494_v19  ;;  %v1545_v19 = vld [vmem:[#allocation7 + $0xbd0] sm:$0xff] }
 0x2b0   :  { %4705 = vmatpush1.bf16.msra.mxu0 %v5495_v27  ;;  %v1501_v27 = vld [vmem:[#allocation7 + $0xa70] sm:$0xff] }
 0x2b1   :  { %4869 = vmatpush1.bf16.msra.mxu1 %v5497_v30  ;;  %4706 = vmatprep.subr.bf16.mxu0 %v5504_v31  ;;  %v1498_v30 = vld [vmem:[#allocation7 + $0xa58] sm:$0xff]  ;;  %v5560_v42 = vcombine.high %v1497_v26, %v1501_v27 }
 0x2b2   :  { %4870 = vmatprep.subr.bf16.mxu1 %v5506_v32  ;;  %v1502_v31 = vld [vmem:[#allocation7 + $0xa78] sm:$0xff]  ;;  %v5551_v32 = vcombine.low %v1489_v38, %v1493_v10 }
 0x2b3   :  { %v5562_v43 = vcombine.high %v1498_v30, %v1502_v31  ;;  %v5561_v48 = vcombine.low %v1498_v30, %v1502_v31  ;;  %v1553_v31 = vld [vmem:[#allocation7 + $0xc10] sm:$0xff] }
 0x2b4   :  { %4707 = vmatpush1.bf16.msra.mxu0 %v5503_v34  ;;  %v1509_v34 = vld [vmem:[#allocation7 + $0xab0] sm:$0xff] }
 0x2b5   :  { %4871 = vmatpush1.bf16.msra.mxu1 %v5505_v35  ;;  %4708 = vmatprep.subr.bf16.mxu0 %v5512_v57  ;;  %v1506_v35 = vld [vmem:[#allocation7 + $0xa98] sm:$0xff]  ;;  %v5568_v49 = vcombine.high %v1505_v45, %v1509_v34 }
 0x2b6   :  { %4872 = vmatprep.subr.bf16.mxu1 %v5514_v46  ;;  %v1510_v57 = vld [vmem:[#allocation7 + $0xab8] sm:$0xff]  ;;  %v5559_v46 = vcombine.low %v1497_v26, %v1501_v27 }
 0x2b7   :  { %v5570_v50 = vcombine.high %v1506_v35, %v1510_v57  ;;  %v5569_v37 = vcombine.low %v1506_v35, %v1510_v57  ;;  %v1561_v57 = vld [vmem:[#allocation7 + $0xc50] sm:$0xff] }
 0x2b8   :  { %4709 = vmatpush1.bf16.msra.mxu0 %v5511_v47  ;;  %v1517_v47 = vld [vmem:[#allocation7 + $0xaf0] sm:$0xff] }
 0x2b9   :  { %4873 = vmatpush1.bf16.msra.mxu1 %v5513_v52  ;;  %4710 = vmatprep.subr.bf16.mxu0 %v5520_v53  ;;  %v1514_v52 = vld [vmem:[#allocation7 + $0xad8] sm:$0xff]  ;;  %v5576_v56 = vcombine.high %v1513_v51, %v1517_v47 }
 0x2ba   :  { %4874 = vmatprep.subr.bf16.mxu1 %v5522_v55  ;;  %v1518_v53 = vld [vmem:[#allocation7 + $0xaf8] sm:$0xff]  ;;  %v5567_v55 = vcombine.low %v1505_v45, %v1509_v34 }
 0x2bb   :  { %v5578_v59 = vcombine.high %v1514_v52, %v1518_v53  ;;  %v5577_v6 = vcombine.low %v1514_v52, %v1518_v53  ;;  %v1569_v52 = vld [vmem:[#allocation7 + $0xc90] sm:$0xff] }
 0x2bc   :  { %4711 = vmatpush1.bf16.msra.mxu0 %v5519_v62  ;;  %v1525_v62 = vld [vmem:[#allocation7 + $0xb30] sm:$0xff] }
 0x2bd   :  { %4875 = vmatpush1.bf16.msra.mxu1 %v5521_v63  ;;  %4712 = vmatprep.subr.bf16.mxu0 %v5528_v0  ;;  %v1522_v63 = vld [vmem:[#allocation7 + $0xb18] sm:$0xff]  ;;  %v5584_v28 = vcombine.high %v1521_v61, %v1525_v62  ;;  %v1573_v53 = vld [vmem:[#allocation7 + $0xcb0] sm:$0xff] }
 0x2be   :  { %4876 = vmatprep.subr.bf16.mxu1 %v5530_v5  ;;  %v1526_v0 = vld [vmem:[#allocation7 + $0xb38] sm:$0xff]  ;;  %v5575_v5 = vcombine.low %v1513_v51, %v1517_v47 }
 0x2bf   :  { %v5586_v7 = vcombine.high %v1522_v63, %v1526_v0  ;;  %v5585_v58 = vcombine.low %v1522_v63, %v1526_v0  ;;  %v1577_v0 = vld [vmem:[#allocation7 + $0xcd0] sm:$0xff] }
 0x2c0   :  { %4713 = vmatpush1.bf16.msra.mxu0 %v5527_v9  ;;  %v1533_v9 = vld [vmem:[#allocation7 + $0xb70] sm:$0xff] }
 0x2c1   :  { %4877 = vmatpush1.bf16.msra.mxu1 %v5529_v11  ;;  %4714 = vmatprep.subr.bf16.mxu0 %v5536_v12  ;;  %v1530_v11 = vld [vmem:[#allocation7 + $0xb58] sm:$0xff]  ;;  %v5592_v14 = vcombine.high %v1529_v2, %v1533_v9 }
 0x2c2   :  { %4878 = vmatprep.subr.bf16.mxu1 %v5538_v13  ;;  %v1534_v12 = vld [vmem:[#allocation7 + $0xb78] sm:$0xff]  ;;  %v5583_v13 = vcombine.low %v1521_v61, %v1525_v62  ;;  %v5632_v62 = vcombine.high %v1569_v52, %v1573_v53 }
 0x2c3   :  { %v5594_v15 = vcombine.high %v1530_v11, %v1534_v12  ;;  %v5593_v38 = vcombine.low %v1530_v11, %v1534_v12  ;;  %v1585_v11 = vld [vmem:[#allocation7 + $0xd10] sm:$0xff] }
 0x2c4   :  { %4715 = vmatpush1.bf16.msra.mxu0 %v5535_v4  ;;  %v1541_v4 = vld [vmem:[#allocation7 + $0xbb0] sm:$0xff] }
 0x2c5   :  { %4879 = vmatpush1.bf16.msra.mxu1 %v5537_v18  ;;  %4716 = vmatprep.subr.bf16.mxu0 %v5544_v8  ;;  %v1538_v18 = vld [vmem:[#allocation7 + $0xb98] sm:$0xff]  ;;  %v5600_v10 = vcombine.high %v1537_v3, %v1541_v4  ;;  %v1589_v12 = vld [vmem:[#allocation7 + $0xd30] sm:$0xff] }
 0x2c6   :  { %4880 = vmatprep.subr.bf16.mxu1 %v5546_v54  ;;  %v1542_v8 = vld [vmem:[#allocation7 + $0xbb8] sm:$0xff]  ;;  %v5591_v54 = vcombine.low %v1529_v2, %v1533_v9 }
 0x2c7   :  { %v5602_v17 = vcombine.high %v1538_v18, %v1542_v8  ;;  %v5601_v26 = vcombine.low %v1538_v18, %v1542_v8  ;;  %v1593_v18 = vld [vmem:[#allocation7 + $0xd50] sm:$0xff] }
 0x2c8   :  { %4717 = vmatpush1.bf16.msra.mxu0 %v5543_v20  ;;  %v1549_v20 = vld [vmem:[#allocation7 + $0xbf0] sm:$0xff] }
 0x2c9   :  { %4881 = vmatpush1.bf16.msra.mxu1 %v5545_v22  ;;  %4718 = vmatprep.subr.bf16.mxu0 %v5552_v23  ;;  %v1546_v22 = vld [vmem:[#allocation7 + $0xbd8] sm:$0xff]  ;;  %v5608_v27 = vcombine.high %v1545_v19, %v1549_v20  ;;  %v1597_v8 = vld [vmem:[#allocation7 + $0xd70] sm:$0xff] }
 0x2ca   :  { %4882 = vmatprep.subr.bf16.mxu1 %v5554_v25  ;;  %v1550_v23 = vld [vmem:[#allocation7 + $0xbf8] sm:$0xff]  ;;  %v5599_v25 = vcombine.low %v1537_v3, %v1541_v4  ;;  %v5648_v4 = vcombine.high %v1585_v11, %v1589_v12 }
 0x2cb   :  { %v5610_v30 = vcombine.high %v1546_v22, %v1550_v23  ;;  %v5609_v45 = vcombine.low %v1546_v22, %v1550_v23  ;;  %v5647_v22 = vcombine.low %v1585_v11, %v1589_v12 }
 0x2cc   :  { %4719 = vmatpush1.bf16.msra.mxu0 %v5551_v32  ;;  %v1557_v32 = vld [vmem:[#allocation7 + $0xc30] sm:$0xff] }
 0x2cd   :  { %4883 = vmatpush1.bf16.msra.mxu1 %v5553_v41  ;;  %4720 = vmatprep.subr.bf16.mxu0 %v5560_v42  ;;  %v1554_v41 = vld [vmem:[#allocation7 + $0xc18] sm:$0xff]  ;;  %v5616_v34 = vcombine.high %v1553_v31, %v1557_v32 }
 0x2ce   :  { %4884 = vmatprep.subr.bf16.mxu1 %v5562_v43  ;;  %v1558_v42 = vld [vmem:[#allocation7 + $0xc38] sm:$0xff]  ;;  %v5607_v43 = vcombine.low %v1545_v19, %v1549_v20 }
 0x2cf   :  { %v5618_v35 = vcombine.high %v1554_v41, %v1558_v42  ;;  %v5617_v51 = vcombine.low %v1554_v41, %v1558_v42  ;;  %v1594_v19 = vld [vmem:[#allocation7 + $0xd58] sm:$0xff] }
 0x2d0   :  { %4721 = vmatpush1.bf16.msra.mxu0 %v5559_v46  ;;  %v1565_v46 = vld [vmem:[#allocation7 + $0xc70] sm:$0xff]  ;;  %v1598_v20 = vld [vmem:[#allocation7 + $0xd78] sm:$0xff] }
 0x2d1   :  { %4885 = vmatpush1.bf16.msra.mxu1 %v5561_v48  ;;  %4722 = vmatprep.subr.bf16.mxu0 %v5568_v49  ;;  %v5615_v48 = vcombine.low %v1553_v31, %v1557_v32  ;;  %v1562_v49 = vld [vmem:[#allocation7 + $0xc58] sm:$0xff]  ;;  %v5624_v47 = vcombine.high %v1561_v57, %v1565_v46  ;;  %v6175_v31 = vld [vmem:[#allocation7 + $0xdb0] sm:$0xff] }
 0x2d2   :  { %4886 = vmatprep.subr.bf16.mxu1 %v5570_v50  ;;  %v1566_v50 = vld [vmem:[#allocation7 + $0xc78] sm:$0xff] }
 0x2d3   :  { %v5625_v61 = vcombine.low %v1562_v49, %v1566_v50  ;;  %v6181_v42 = vld [vmem:[#allocation7 + $0xd98] sm:$0xff] }
 0x2d4   :  { %4723 = vmatpush1.bf16.msra.mxu0 %v5567_v55  ;;  %v5626_v55 = vcombine.high %v1562_v49, %v1566_v50  ;;  %v6193_v50 = vld [vmem:[#allocation7 + $0xdf0] sm:$0xff] }
 0x2d5   :  { %4887 = vmatpush1.bf16.msra.mxu1 %v5569_v37  ;;  %4724 = vmatprep.subr.bf16.mxu0 %v5576_v56  ;;  %v1570_v37 = vld [vmem:[#allocation7 + $0xc98] sm:$0xff] }
 0x2d6   :  { %4888 = vmatprep.subr.bf16.mxu1 %v5578_v59  ;;  %v1574_v56 = vld [vmem:[#allocation7 + $0xcb8] sm:$0xff]  ;;  %v5623_v59 = vcombine.low %v1561_v57, %v1565_v46  ;;  %v6187_v57 = vld [vmem:[#allocation7 + $0xdd0] sm:$0xff] }
 0x2d7   :  { %v5634_v63 = vcombine.high %v1570_v37, %v1574_v56 }
 0x2d8   :  { %4725 = vmatpush1.bf16.msra.mxu0 %v5575_v5  ;;  %v1581_v5 = vld [vmem:[#allocation7 + $0xcf0] sm:$0xff] }
 0x2d9   :  { %4889 = vmatpush1.bf16.msra.mxu1 %v5577_v6  ;;  %4726 = vmatprep.subr.bf16.mxu0 %v5584_v28  ;;  %v1578_v6 = vld [vmem:[#allocation7 + $0xcd8] sm:$0xff]  ;;  %v5640_v2 = vcombine.high %v1577_v0, %v1581_v5 }
 0x2da   :  { %4890 = vmatprep.subr.bf16.mxu1 %v5586_v7  ;;  %v1582_v28 = vld [vmem:[#allocation7 + $0xcf8] sm:$0xff]  ;;  %v5631_v7 = vcombine.low %v1569_v52, %v1573_v53 }
 0x2db   :  { %v5642_v9 = vcombine.high %v1578_v6, %v1582_v28  ;;  %v5641_v3 = vcombine.low %v1578_v6, %v1582_v28 }
 0x2dc   :  { %4727 = vmatpush1.bf16.msra.mxu0 %v5583_v13  ;;  %v1586_v13 = vld [vmem:[#allocation7 + $0xd18] sm:$0xff] }
 0x2dd   :  { %4891 = vmatpush1.bf16.msra.mxu1 %v5585_v58  ;;  %4728 = vmatprep.subr.bf16.mxu0 %v5592_v14  ;;  %v1590_v58 = vld [vmem:[#allocation7 + $0xd38] sm:$0xff] }
 0x2de   :  { %4892 = vmatprep.subr.bf16.mxu1 %v5594_v15  ;;  %v1688_v14 = vld [vmem:[#allocation8 + $0x2] ss:$8 sm:$0xf]  ;;  %v5649_v23 = vcombine.low %v1586_v13, %v1590_v58 }
 0x2df   :  { %v1689_v15 = vld [vmem:[#allocation8 + $0x2] ss:$8 sm:$0xf0] }
 0x2e0   :  { %4729 = vmatpush1.bf16.msra.mxu0 %v5591_v54  ;;  %v5650_v54 = vcombine.high %v1586_v13, %v1590_v58 }
 0x2e1   :  { %4893 = vmatpush1.bf16.msra.mxu1 %v5593_v38  ;;  %4730 = vmatprep.subr.bf16.mxu0 %v5600_v10  ;;  %v4973_v38 = vld [vmem:[#allocation8 + $0x4] ss:$8 sm:$0xf] }
 0x2e2   :  { %4894 = vmatprep.subr.bf16.mxu1 %v5602_v17  ;;  %v4974_v10 = vld [vmem:[#allocation8 + $0x4] ss:$8 sm:$0xf0]  ;;  %v6169_v17 = vor.u32 %v1689_v15, %v1688_v14 }
 0x2e4   :  { %4731 = vmatpush1.bf16.msra.mxu0 %v5599_v25  ;;  %v6171_v25 = vor.u32 %v4974_v10, %v4973_v38  ;;  %v1695_v32 = vrot.slane %v6169_v17, %v6066_v39  ;;  %v1703_v41 = vrot.slane %v6169_v17, %v6101_v44 }
 0x2e5   :  { %4895 = vmatpush1.bf16.msra.mxu1 %v5601_v26  ;;  %4732 = vmatprep.subr.bf16.mxu0 %v5608_v27  ;;  %v5656_v26 = vcombine.high %v1593_v18, %v1597_v8  ;;  %v5658_v27 = vcombine.high %v1594_v19, %v1598_v20 }
 0x2e6   :  { %4896 = vmatprep.subr.bf16.mxu1 %v5610_v30  ;;  %v6173_v30 = vld [vmem:[#allocation7 + $0xd90] sm:$0xff]  ;;  %v4981_v46 = vrot.slane %v6171_v25, %v6066_v39  ;;  %v4993_v14 = vrot.slane %v6171_v25, %v6090_v16 }
 0x2e7   :  { %v5664_v49 = vcombine.high %v6173_v30, %v6175_v31  ;;  %v5663_v39 = vcombine.low %v6173_v30, %v6175_v31  ;;  %v1629_v30 = vld [vmem:[#allocation7 + $0xe70] sm:$0xff] }
 0x2e8   :  { %4733 = vmatpush1.bf16.msra.mxu0 %v5607_v43  ;;  %v1606_v43 = vld [vmem:[#allocation7 + $0xdb8] sm:$0xff] }
 0x2e9   :  { %4897 = vmatpush1.bf16.msra.mxu1 %v5609_v45  ;;  %4743 = vmatprep.subr.bf16.mxu0 %v5616_v34  ;;  %v1699_v45 = vrot.slane %v6169_v17, %v6069_v40  ;;  %v1707_v34 = vrot.slane %v6169_v17, %v6090_v16 }
 0x2ea   :  { %4907 = vmatprep.subr.bf16.mxu1 %v5618_v35  ;;  %v5655_v35 = vcombine.low %v1593_v18, %v1597_v8  ;;  %v1618_v18 = vld [vmem:[#allocation7 + $0xe18] sm:$0xff] }
 0x2eb   :  { %4735 = vmatmul.mubr.bf16.vlgmr.msra.gmra.mrb[12].mxu0 %v6137_v24  ;;  %v1622_v8 = vld [vmem:[#allocation7 + $0xe38] sm:$0xff] }
 0x2ec   :  { %4899 = vmatmul.mubr.bf16.vlgmr.msra.gmra.mrb[12].mxu1 %v6137_v24  ;;  %4744 = vmatpush1.bf16.msra.mxu0 %v5615_v48  ;;  %v5633_v24 = vcombine.low %v1570_v37, %v1574_v56  ;;  %v5657_v48 = vcombine.low %v1594_v19, %v1598_v20  ;;  %v5666_v37 = vcombine.high %v6181_v42, %v1606_v43 }
 0x2ed   :  { %4775 = vmatprep.mubr.bf16.mxu0 %v6139_v36  ;;  %4908 = vmatpush1.bf16.msra.mxu1 %v5617_v51  ;;  %v6195_v51 = vld [vmem:[#allocation7 + $0xdd8] sm:$0xff] }
 0x2ee   :  { %4939 = vmatprep.mubr.bf16.mxu1 %v6139_v36  ;;  %4745 = vmatprep.subr.bf16.mxu0 %v5624_v47  ;;  %v5639_v36 = vcombine.low %v1577_v0, %v1581_v5  ;;  %v6197_v47 = vld [vmem:[#allocation7 + $0xdf8] sm:$0xff]  ;;  %v5665_v0 = vcombine.low %v6181_v42, %v1606_v43 }
 0x2ef   :  { %4909 = vmatprep.subr.bf16.mxu1 %v5626_v55  ;;  %v4989_v55 = vrot.slane %v6171_v25, %v6101_v44  ;;  %v5672_v44 = vcombine.high %v6187_v57, %v6193_v50  ;;  %v5673_v19 = vcombine.low %v6195_v51, %v6197_v47  ;;  %v1630_v42 = vld [vmem:[#allocation7 + $0xe78] sm:$0xff] }
 0x2f0   :  { %4746 = vmatpush1.bf16.msra.mxu0 %v5623_v59 }
 0x2f1   :  { %4910 = vmatpush1.bf16.msra.mxu1 %v5625_v61  ;;  %4747 = vmatprep.subr.bf16.mxu0 %v5632_v62  ;;  %v4985_v62 = vrot.slane %v6171_v25, %v6069_v40 }
 0x2f2   :  { %4911 = vmatprep.subr.bf16.mxu1 %v5634_v63 }
 0x2f4   :  { %4748 = vmatpush1.bf16.msra.mxu0 %v5631_v7 }
 0x2f5   :  { %4912 = vmatpush1.bf16.msra.mxu1 %v5633_v24  ;;  %4749 = vmatprep.subr.bf16.mxu0 %v5640_v2  ;;  %v5674_v24 = vcombine.high %v6195_v51, %v6197_v47  ;;  %v1617_v2 = vld [vmem:[#allocation7 + $0xe10] sm:$0xff]  ;;  %v1634_v47 = vld [vmem:[#allocation7 + $0xe98] sm:$0xff] }
 0x2f6   :  { %4913 = vmatprep.subr.bf16.mxu1 %v5642_v9  ;;  %v1621_v9 = vld [vmem:[#allocation7 + $0xe30] sm:$0xff] }
 0x2f8   :  { %4750 = vmatpush1.bf16.msra.mxu0 %v5639_v36 }
 0x2f9   :  { %4914 = vmatpush1.bf16.msra.mxu1 %v5641_v3  ;;  %4751 = vmatprep.subr.bf16.mxu0 %v5648_v4  ;;  %v5671_v4 = vcombine.low %v6187_v57, %v6193_v50 }
 0x2fa   :  { %4915 = vmatprep.subr.bf16.mxu1 %v5650_v54 }
 0x2fc   :  { %4752 = vmatpush1.bf16.msra.mxu0 %v5647_v22 }
 0x2fd   :  { %4916 = vmatpush1.bf16.msra.mxu1 %v5649_v23  ;;  %4753 = vmatprep.subr.bf16.mxu0 %v5656_v26  ;;  %v5680_v23 = vcombine.high %v1617_v2, %v1621_v9  ;;  %v5682_v26 = vcombine.high %v1618_v18, %v1622_v8 }
 0x2fe   :  { %v4449_v52 = vpop.f32.mrb[8].mxu0  ;;  %v4613_v53 = vpop.f32.mrb[8].mxu1  ;;  %4917 = vmatprep.subr.bf16.mxu1 %v5658_v27  ;;  %v1625_v27 = vld [vmem:[#allocation7 + $0xe50] sm:$0xff] }
 0x2ff   :  { %v5740_v56 = vadd.f32 %v4449_v52, %v1695_v32  ;;  %v5742_v59 = vadd.f32 %v4613_v53, %v1703_v41  ;;  %v4451_v61 = vpop.f32.mrb[9].mxu0  ;;  %v4615_v63 = vpop.f32.mrb[9].mxu1  ;;  %v1626_v41 = vld [vmem:[#allocation7 + $0xe58] sm:$0xff]  ;;  %v5688_v57 = vcombine.high %v1625_v27, %v1629_v30  ;;  %v5687_v53 = vcombine.low %v1625_v27, %v1629_v30 }
 0x300   :  { %v5741_v5 = vadd.f32 %v4451_v61, %v1699_v45  ;;  %v5743_v6 = vadd.f32 %v4615_v63, %v1707_v34  ;;  %v4453_v28 = vpop.f32.mrb[10].mxu0  ;;  %v4617_v7 = vpop.f32.mrb[10].mxu1  ;;  %4754 = vmatpush1.bf16.msra.mxu0 %v5655_v35  ;;  %v5679_v45 = vcombine.low %v1617_v2, %v1621_v9  ;;  %v5681_v35 = vcombine.low %v1618_v18, %v1622_v8  ;;  %v1638_v52 = vld [vmem:[#allocation7 + $0xeb8] sm:$0xff]  ;;  %v1645_v61 = vld [vmem:[#allocation7 + $0xef0] sm:$0xff] }
 0x301   :  { %vm4948_vm12 = vcmp.gt.f32.partialorder %v5740_v56, 0.0  ;;  %v4956_v11 = vmul.f32 0.01, %v5740_v56  ;;  %vm4950_vm13 = vcmp.gt.f32.partialorder %v5742_v59, 0.0  ;;  %v4958_v40 = vmul.f32 0.01, %v5742_v59  ;;  %4918 = vmatpush1.bf16.msra.mxu1 %v5657_v48  ;;  %4755 = vmatprep.subr.bf16.mxu0 %v5664_v49 }
 0x302   :  { %vm4949_vm14 = vcmp.gt.f32.partialorder %v5741_v5, 0.0  ;;  %v4957_v12 = vmul.f32 0.01, %v5741_v5  ;;  %vm4951_vm15 = vcmp.gt.f32.partialorder %v5743_v6, 0.0  ;;  %v4959_v13 = vmul.f32 0.01, %v5743_v6  ;;  %4919 = vmatprep.subr.bf16.mxu1 %v5666_v37 }
 0x303   :  { %v4964_v58 = vsel %vm4948_vm12, %v5740_v56, %v4956_v11  ;;  %v4966_v36 = vsel %vm4950_vm13, %v5742_v59, %v4958_v40  ;;  %v4454_v15 = vpop.f32.mrb[11].mxu0  ;;  %v4618_v3 = vpop.f32.mrb[11].mxu1  ;;  %v1633_v48 = vld [vmem:[#allocation7 + $0xe90] sm:$0xff]  ;;  %v5698_v56 = vcombine.high %v1634_v47, %v1638_v52  ;;  %v1646_v63 = vld [vmem:[#allocation7 + $0xef8] sm:$0xff] }
 0x304   :  { %v5018_v54 = vmul.f32 %v4981_v46, %v4964_v58  ;;  %v4965_v38 = vsel %vm4949_vm14, %v5741_v5, %v4957_v12  ;;  %v4967_v10 = vsel %vm4951_vm15, %v5743_v6, %v4959_v13  ;;  %4756 = vmatpush1.bf16.msra.mxu0 %v5663_v39  ;;  %v5020_v20 = vmul.f32 %v4989_v55, %v4966_v36  ;;  %v1637_v49 = vld [vmem:[#allocation7 + $0xeb0] sm:$0xff]  ;;  %v1654_v2 = vld [vmem:[#allocation7 + $0xf38] sm:$0xff] }
 0x305   :  { %v5019_v22 = vmul.f32 %v4985_v62, %v4965_v38  ;;  %4920 = vmatpush1.bf16.msra.mxu1 %v5665_v0  ;;  %4757 = vmatprep.subr.bf16.mxu0 %v5672_v44  ;;  %v5021_v32 = vmul.f32 %v4993_v14, %v4967_v10  ;;  %v5690_v46 = vcombine.high %v1626_v41, %v1630_v42  ;;  %v1641_v59 = vld [vmem:[#allocation7 + $0xed0] sm:$0xff]  ;;  %v1642_v62 = vld [vmem:[#allocation7 + $0xed8] sm:$0xff] }
 0x306   :  { %v5027_v16 = vsel %vm5026_vm11, %v5018_v54, 0.0  ;;  %4921 = vmatprep.subr.bf16.mxu1 %v5674_v24  ;;  %v5030_v34 = vsel %vm5026_vm11, %v5020_v20, 0.0  ;;  %v5689_v39 = vcombine.low %v1626_v41, %v1630_v42  ;;  %v5696_v37 = vcombine.high %v1633_v48, %v1637_v49  ;;  %v1649_v7 = vld [vmem:[#allocation7 + $0xf10] sm:$0xff]  ;;  %v1650_v24 = vld [vmem:[#allocation7 + $0xf18] sm:$0xff] }
 0x307   :  { %v5028_v31 = vsel %vm5026_vm11, %v5019_v22, 0.0  ;;  %v5032_v51 = vsel %vm5026_vm11, %v5021_v32, 0.0  ;;  %v5695_v0 = vcombine.low %v1633_v48, %v1637_v49  ;;  %v5697_v5 = vcombine.low %v1634_v47, %v1638_v52  ;;  %v1653_v44 = vld [vmem:[#allocation7 + $0xf30] sm:$0xff]  ;;  %v1658_v36 = vld [vmem:[#allocation7 + $0xf58] sm:$0xff] }
 0x308   :  { %v5029_v43 = vadd.f32 %v5028_v31, %v5027_v16  ;;  %4758 = vmatpush1.bf16.msra.mxu0 %v5671_v4  ;;  %v5704_v6 = vcombine.high %v1641_v59, %v1645_v61  ;;  %v5706_v28 = vcombine.high %v1642_v62, %v1646_v63  ;;  %v5703_v9 = vcombine.low %v1641_v59, %v1645_v61  ;;  %v1657_v13 = vld [vmem:[#allocation7 + $0xf50] sm:$0xff]  ;;  %v1662_v14 = vld [vmem:[#allocation7 + $0xf78] sm:$0xff] }
 0x309   :  { %4922 = vmatpush1.bf16.msra.mxu1 %v5673_v19  ;;  %4759 = vmatprep.subr.bf16.mxu0 %v5680_v23  ;;  %v5705_v11 = vcombine.low %v1642_v62, %v1646_v63  ;;  %v5712_v40 = vcombine.high %v1649_v7, %v1653_v44  ;;  %v5714_v12 = vcombine.high %v1650_v24, %v1654_v2  ;;  %v1661_v58 = vld [vmem:[#allocation7 + $0xf70] sm:$0xff]  ;;  %v1666_v38 = vld [vmem:[#allocation7 + $0xf98] sm:$0xff] }
 0x30a   :  { %4923 = vmatprep.subr.bf16.mxu1 %v5682_v26  ;;  %v5031_v50 = vadd.f32 %v5030_v34, %v5029_v43  ;;  %v5711_v15 = vcombine.low %v1649_v7, %v1653_v44  ;;  %v5713_v3 = vcombine.low %v1650_v24, %v1654_v2  ;;  %v5720_v4 = vcombine.high %v1657_v13, %v1661_v58  ;;  %v1665_v8 = vld [vmem:[#allocation7 + $0xf90] sm:$0xff]  ;;  %v1670_v10 = vld [vmem:[#allocation7 + $0xfb8] sm:$0xff] }
 0x30b   :  { %v5722_v18 = vcombine.high %v1658_v36, %v1662_v14  ;;  %v1669_v54 = vld [vmem:[#allocation7 + $0xfb0] sm:$0xff]  ;;  %v5719_v19 = vcombine.low %v1657_v13, %v1661_v58  ;;  %v5721_v20 = vcombine.low %v1658_v36, %v1662_v14  ;;  %v5730_v23 = vcombine.high %v1666_v38, %v1670_v10  ;;  %v1674_v27 = vld [vmem:[#allocation7 + $0xfd8] sm:$0xff] }
 0x30c   :  { %4760 = vmatpush1.bf16.msra.mxu0 %v5679_v45  ;;  %v6221_v55 = vadd.f32 %v5032_v51, %v5031_v50  ;;  %v5728_v22 = vcombine.high %v1665_v8, %v1669_v54  ;;  %v1673_v16 = vld [vmem:[#allocation7 + $0xfd0] sm:$0xff]  ;;  %v1678_v30 = vld [vmem:[#allocation7 + $0xff8] sm:$0xff]  ;;  %v5727_v31 = vcombine.low %v1665_v8, %v1669_v54  ;;  %v5729_v32 = vcombine.low %v1666_v38, %v1670_v10 }
 0x30d   :  { %4924 = vmatpush1.bf16.msra.mxu1 %v5681_v35  ;;  %4761 = vmatprep.subr.bf16.mxu0 %v5688_v57  ;;  %v1677_v26 = vld [vmem:[#allocation7 + $0xff0] sm:$0xff]  ;;  %v5738_v42 = vcombine.high %v1674_v27, %v1678_v30  ;;  %v5737_v45 = vcombine.low %v1674_v27, %v1678_v30  ;;  %v1711_v34 = vrot.slane %v6169_v17, %v6126_v29 }
 0x30e   :  { %4925 = vmatprep.subr.bf16.mxu1 %v5690_v46  ;;  %v5736_v41 = vcombine.high %v1673_v16, %v1677_v26  ;;  %v5735_v43 = vcombine.low %v1673_v16, %v1677_v26  ;;  %v1719_v35 = vrot.slane %v6169_v17, %v6146_v21  ;;  %v1715_v57 = vrot.slane %v6169_v17, %v6106_v60 }
 0x30f   :  { %v1723_v46 = vrot.slane %v6169_v17, %v6129_v33  ;;  %v4997_v47 = vrot.slane %v6171_v25, %v6126_v29  ;;  %v5005_v17 = vrot.slane %v6171_v25, %v6146_v21  ;;  %v5009_v44 = vrot.slane %v6171_v25, %v6129_v33  ;;  %v4976_v33 = vld [vmem:[#allocation8 + $0x5] ss:$0 sm:$0xff] }
 0x310   :  { %4762 = vmatpush1.bf16.msra.mxu0 %v5687_v53  ;;  %v5001_v53 = vrot.slane %v6171_v25, %v6106_v60 }
 0x311   :  { %4926 = vmatpush1.bf16.msra.mxu1 %v5689_v39  ;;  %4763 = vmatprep.subr.bf16.mxu0 %v5696_v37 }
 0x312   :  { %4927 = vmatprep.subr.bf16.mxu1 %v5698_v56 }
 0x314   :  { %4764 = vmatpush1.bf16.msra.mxu0 %v5695_v0 }
 0x315   :  { %4928 = vmatpush1.bf16.msra.mxu1 %v5697_v5  ;;  %4765 = vmatprep.subr.bf16.mxu0 %v5704_v6 }
 0x316   :  { %4929 = vmatprep.subr.bf16.mxu1 %v5706_v28 }
 0x318   :  { %4766 = vmatpush1.bf16.msra.mxu0 %v5703_v9 }
 0x319   :  { %4930 = vmatpush1.bf16.msra.mxu1 %v5705_v11  ;;  %4767 = vmatprep.subr.bf16.mxu0 %v5712_v40 }
 0x31a   :  { %4931 = vmatprep.subr.bf16.mxu1 %v5714_v12 }
 0x31c   :  { %4768 = vmatpush1.bf16.msra.mxu0 %v5711_v15 }
 0x31d   :  { %4932 = vmatpush1.bf16.msra.mxu1 %v5713_v3  ;;  %4769 = vmatprep.subr.bf16.mxu0 %v5720_v4  ;;  %v5941_v3 = vmov 0  }
 0x31e   :  { %4933 = vmatprep.subr.bf16.mxu1 %v5722_v18  ;;  %5806 = vset.pattern.permute.xlu0 %v5941_v3 }
 0x320   :  { %4770 = vmatpush1.bf16.msra.mxu0 %v5719_v19 }
 0x321   :  { %4934 = vmatpush1.bf16.msra.mxu1 %v5721_v20  ;;  %4771 = vmatprep.subr.bf16.mxu0 %v5728_v22  ;;  %v5051_v20 = vld [vmem:[%s6262_s1] sm:$0xf]  ;;  %s5942_s1 = smov [#allocation10]  }
 0x322   :  { %4935 = vmatprep.subr.bf16.mxu1 %v5730_v23  ;;  %v5052_v22 = vmul.f32 0.8, %v5051_v20  ;;  %s5088_s17 = sshll.u32 %s5942_s1, 4  ;;  %s5089_s17 = int_to_ptr.vmem [resolvable:$true] %s5088_s17 }
 0x323   :  { %s5903_s18 = scalar_lea.vmem %s5089_s17, 16  ;;  %s5907_s19 = scalar_lea.vmem %s5089_s17, 32 }
 0x324   :  { %4772 = vmatpush1.bf16.msra.mxu0 %v5727_v31  ;;  %v5053_v23 = vadd.f32 0.1, %v5052_v22  ;;  %p5904_p4 = scmp.ne.s32.totalorder %s5089_s17, %s5903_s18  ;;  %p5908_p5 = scmp.lt.s32.totalorder %s5089_s17, %s5089_s17 }
 0x325   :  { %4936 = vmatpush1.bf16.msra.mxu1 %v5729_v32  ;;  %4773 = vmatprep.subr.bf16.mxu0 %v5736_v41  ;;  %p5909_p6 = scmp.lt.s32.totalorder %s5907_s19, %s5903_s18 }
 0x326   :  { %4937 = vmatprep.subr.bf16.mxu1 %v5738_v42  ;;  %v5062_v27 = vsub.f32 1.0, %v5053_v23 }
 0x327   :  { %p5910_p7 = por %p5909_p6, %p5908_p5 }
 0x328   :  { %4774 = vmatpush1.bf16.msra.mxu0 %v5735_v43 }
 0x329   :  { %4938 = vmatpush1.bf16.msra.mxu1 %v5737_v45  ;;  %p5911_p8 = pnand %p5910_p7, %p5904_p4 }
 0x32b   :  { %4776 = vmatmul.mubr.bf16.vlgmr.msra.gmra.mrb[12].mxu0 %v6151_v1 }
 0x32c   :  { %4940 = vmatmul.mubr.bf16.vlgmr.msra.gmra.mrb[12].mxu1 %v6151_v1 }
 0x3fe   :  { %v4777_v48 = vpop.f32.mrb[12].mxu0 }
 0x3ff   :  { %v5744_v49 = vadd.f32 %v4777_v48, %v1711_v34  ;;  %v4941_v50 = vpop.f32.mrb[12].mxu1  ;;  %v4779_v51 = vpop.f32.mrb[13].mxu0 }
 0x400   :  { %v5746_v1 = vadd.f32 %v4941_v50, %v1719_v35  ;;  %v5745_v52 = vadd.f32 %v4779_v51, %v1715_v57  ;;  %v4943_v39 = vpop.f32.mrb[13].mxu1  ;;  %v4781_v37 = vpop.f32.mrb[14].mxu0 }
 0x401   :  { %vm4952_vm0 = vcmp.gt.f32.partialorder %v5744_v49, 0.0  ;;  %v4960_v56 = vmul.f32 0.01, %v5744_v49  ;;  %v5747_v59 = vadd.f32 %v4943_v39, %v1723_v46  ;;  %v4945_v61 = vpop.f32.mrb[14].mxu1  ;;  %v4782_v62 = vpop.f32.mrb[15].mxu0 }
 0x402   :  { %vm4954_vm1 = vcmp.gt.f32.partialorder %v5746_v1, 0.0  ;;  %v4962_v63 = vmul.f32 0.01, %v5746_v1  ;;  %vm4953_vm2 = vcmp.gt.f32.partialorder %v5745_v52, 0.0  ;;  %v4961_v0 = vmul.f32 0.01, %v5745_v52 }
 0x403   :  { %v4968_v29 = vsel %vm4952_vm0, %v5744_v49, %v4960_v56  ;;  %vm4955_vm3 = vcmp.gt.f32.partialorder %v5747_v59, 0.0  ;;  %v4963_v5 = vmul.f32 0.01, %v5747_v59  ;;  %v4946_v6 = vpop.f32.mrb[15].mxu1 }
 0x404   :  { %v5022_v28 = vmul.f32 %v4997_v47, %v4968_v29  ;;  %v4970_v60 = vsel %vm4954_vm1, %v5746_v1, %v4962_v63  ;;  %v4969_v7 = vsel %vm4953_vm2, %v5745_v52, %v4961_v0 }
 0x405   :  { %v5023_v24 = vmul.f32 %v5001_v53, %v4969_v7  ;;  %v4971_v2 = vsel %vm4955_vm3, %v5747_v59, %v4963_v5  ;;  %v5024_v9 = vmul.f32 %v5005_v17, %v4970_v60 }
 0x406   :  { %v5034_v11 = vsel %vm5026_vm11, %v5022_v28, 0.0  ;;  %v5025_v12 = vmul.f32 %v5009_v44, %v4971_v2 }
 0x407   :  { %v5035_v21 = vadd.f32 %v5034_v11, %v6221_v55  ;;  %v5036_v40 = vsel %vm5026_vm11, %v5023_v24, 0.0  ;;  %v5038_v58 = vsel %vm5026_vm11, %v5024_v9, 0.0 }
 0x408   :  { %v5040_v14 = vsel %vm5026_vm11, %v5025_v12, 0.0 }
 0x409   :  { %v5037_v13 = vadd.f32 %v5036_v40, %v5035_v21 }
 0x40b   :  { %v5039_v36 = vadd.f32 %v5038_v58, %v5037_v13 }
 0x40d   :  { %v5041_v15 = vadd.f32 %v5040_v14, %v5039_v36 }
 0x40f   :  { %5042 = vadd.xlane.f32.xlu0 %v5041_v15 }
 0x49c   :  { %v5043_v25 = vpop.xlane.xlu0 %5042 }
 0x49d   :  { %v5044_v4 = vadd.f32 %v5043_v25, %v4976_v33 }
 0x49f   :  { %v5739_v18 = vmul.f32 -1.442695, %v5044_v4 }
 0x4a1   :  { %5807 = vpow2.f32 %v5739_v18 }
 0x4ab   :  { %v5808_v8 = vpop.eup %5807 }
 0x4ac   :  { %v5048_v55 = vadd.f32 1.0, %v5808_v8 }
 0x4ae   :  { %5809 = vrcp.f32 %v5048_v55 }
 0x4b8   :  { %v5810_v54 = vpop.eup %5809 }
 0x4b9   :  { %v5054_v38 = vadd.f32 1e-12, %v5810_v54  ;;  %v5058_v10 = vsub.f32 1.0, %v5810_v54 }
 0x4bb   :  { %5811 = vlog2.f32 %v5054_v38  ;;  %v5059_v19 = vadd.f32 1e-12, %v5058_v10 }
 0x4bd   :  { %5813 = vlog2.f32 %v5059_v19 }
 0x4c5   :  { %v5812_v16 = vpop.eup %5811 }
 0x4c6   :  { %v5056_v26 = vmul.f32 0.6931472, %v5812_v16 }
 0x4c7   :  { %v5814_v30 = vpop.eup %5813 }
 0x4c8   :  { %v5061_v31 = vmul.f32 0.6931472, %v5814_v30  ;;  %v5057_v32 = vmul.f32 %v5056_v26, %v5053_v23 }
 0x4ca   :  { %v5063_v41 = vmul.f32 %v5062_v27, %v5061_v31 }
 0x4cc   :  { %v5064_v42 = vadd.f32 %v5063_v41, %v5057_v32 }
 0x4ce   :  { %v5066_v43 = vsel %vm5065_vm4, %v5064_v42, 0.0 }
 0x4cf   :  { %v5067_v45 = vrot.slane %v5066_v43, 4 }
 0x4d1   :  { %v5068_v34 = vadd.f32 %v5067_v45, %v5066_v43 }
 0x4d3   :  { %v5069_v35 = vrot.slane %v5068_v34, 2 }
 0x4d5   :  { %v5070_v57 = vadd.f32 %v5069_v35, %v5068_v34 }
 0x4d7   :  { %v5071_v46 = vrot.slane %v5070_v57, 1 }
 0x4d9   :  { %v5072_v48 = vadd.f32 %v5071_v46, %v5070_v57 }
 0x4db   :  { %v5073_v49 = vsub.f32 0.0, %v5072_v48 }
 0x4dd   :  { %v5075_v50 = vmul.f32 0.25, %v5073_v49 }
 0x4df   :  { %5078 = vperm.xlu0 %5806, %v5075_v50  }
 0x55e   :  { %v5079_v51 = vpop.permute.xlu0 %5078 }
 0x55f   :  { %5081 = vst [vmem:[#allocation10] sm:$0x1] %v5079_v51 }
 0x560   :  { %5914 = shalt.err (!%p5911_p8)
}
 0x561   :  { %s5915_s22 = scalar_lea.hbm %s6266_s5, 16 }
 0x562   :  { %p5916_p9 = scmp.ne.s32.totalorder %s6266_s5, %s5915_s22  ;;  %p5919_p10 = scmp.lt.u32.totalorder %s5915_s22, %s6266_s5 }
 0x564   :  { %p5921_p11 = pnand %p5919_p10, %p5916_p9 }
 0x566   :  { %5924 = shalt.err (!%p5921_p11)
}
 0x567   :  { %5091 = dma.vmem_to_hbm [thread:$0]  %s5089_s17, 16, %s6266_s5, [#allocation4]  }
 0x568   :  { %5931 = dma.done.wait [#allocation4], 16  }
 0x569   :  { %5932 = vsyncadd [#allocation4], 4294967280 }
 0x56a   :  { %5095 = vsyncpa [#allocation3], 1 }
 0x56b   :  { %5096 = vsyncpa [#allocation6], 1 }
 0x56c   :  { %5097 = vsyncpa [#allocation9], 1 }
 0x56d   :  { %5098 = vsyncpa [#allocation4], 1 }

</bundles_post_ra>
